<compile_context>
chip_gen: v5e
topology: v5e:2x2
jax: 0.10.0
libtpu: 0.0.40
codegen_flags: <defaults>
</compile_context>

<pallas_src>
import functools
import math

import jax
import jax.numpy as jnp
from jax.experimental import pallas as pl
from jax.experimental.pallas import tpu as pltpu

_HALF_LOG_2PI = 0.5 * math.log(2.0 * math.pi)   # python float -> constant

_ROW_BASE = 256       # multiple of MXU rows on all generations (128 v5e, 256 v6e/v7x)
_MAX_ROW_TILE = 2048  # keeps live VMEM well under default scoped limits everywhere


def _round_up(x, m):
    return ((x + m - 1) // m) * m


def _tpu_defaults():
    """(bf16_elementwise, num_tensorcores) derived from the attached TPU."""
    kind = ""
    try:
        kind = jax.devices()[0].device_kind.lower()
    except Exception:
        pass
    # bf16 VPU elementwise only pays off on v6e / v7x (v5e would emulate it).
    bf16_elementwise = ("v6" in kind) or ("v7" in kind)
    # chips exposing 2 TensorCores behind one device (megacore / v7x).
    num_tc = 2 if any(tag in kind for tag in ("v4", "v5p", "v7")) else 1
    return bf16_elementwise, num_tc


def _choose_row_tile(rows, num_tc, row_tile):
    """Pick a row tile (multiple of 128/256) and the padded row count."""
    if row_tile is not None:
        tm = min(_MAX_ROW_TILE, _round_up(max(int(row_tile), _ROW_BASE), _ROW_BASE))
    else:
        rp = _round_up(rows, _ROW_BASE)
        if rp <= _MAX_ROW_TILE:
            # Small/medium R: one tile, except split across 2 TCs if there is
            # enough work for both (>= 256 rows per core).
            tm = rp // 2 if (num_tc >= 2 and rp >= 2 * _ROW_BASE) else rp
        else:
            tm = _MAX_ROW_TILE
    rows_p = _round_up(rows, tm)
    return tm, rows_p


# ----------------------------------------------------------------------------
# Pallas kernel: full actor forward for one row tile (TM rows).
# ----------------------------------------------------------------------------
def _actor_kernel(state_ref, eps_ref,
                  w1_ref, b1_ref, w2_ref, b2_ref, w3_ref, b3_ref,
                  wmu_ref, bmu_ref, wls_ref, bls_ref,
                  act_ref, logp_ref, *, max_action, bf16_elementwise):
    x = state_ref[...]                                           # (TM, S) f32

    def dense_relu(v, w_ref, b_ref):
        # bf16 operands -> native MXU rate; f32 MXU accumulation.
        y = jnp.dot(v.astype(jnp.bfloat16), w_ref[...],
                    preferred_element_type=jnp.float32)
        if bf16_elementwise:
            # v6e/v7x: bias-add + ReLU in bf16 (2-per-lane VPU, half the vreg traffic).
            y = y.astype(jnp.bfloat16) + b_ref[...].astype(jnp.bfloat16)
        else:
            # v5e: keep elementwise trunk math in f32 (no bf16 VPU).
            y = y + b_ref[...]
        return jnp.maximum(y, 0.0)

    # trunk: Linear -> ReLU, x3
    h = dense_relu(x, w1_ref, b1_ref)
    h = dense_relu(h, w2_ref, b2_ref)
    h = dense_relu(h, w3_ref, b3_ref)
    hb = h.astype(jnp.bfloat16)

    # two separate heads (no in-vreg lane split), f32 results
    mu = jnp.dot(hb, wmu_ref[...], preferred_element_type=jnp.float32) + bmu_ref[...]
    log_std = jnp.dot(hb, wls_ref[...], preferred_element_type=jnp.float32) + bls_ref[...]
    log_std = jnp.clip(log_std, -20.0, 2.0)
    std = jnp.exp(log_std)

    # reparameterized action with externally supplied (colored) noise
    eps = eps_ref[...]                                           # (TM, A) f32
    action = mu + eps * std
    t = jnp.tanh(action)

    # Normal(mu, std).log_prob(action) with (action-mu)/std == eps, minus the
    # tanh-squash correction log(1 - tanh(a)^2 + 1e-6), combined per element.
    elem = (-0.5 * eps * eps - log_std - _HALF_LOG_2PI
            - jnp.log(1.0 - t * t + 1e-6))                       # (TM, A)
    total = jnp.sum(elem, axis=-1, keepdims=True)                # (TM, 1)

    act_ref[...] = t * max_action
    # Lane-dense log_prob: (TM,1) -> (1,TM) via XLU transpose, unmasked store.
    logp_ref[...] = jnp.transpose(total)[None]                   # (1, 1, TM)


# ----------------------------------------------------------------------------
# Wrapper: tiles (stacked) rows over a parallel grid axis, keeps weights
# VMEM-resident via constant index_maps.
# ----------------------------------------------------------------------------
def colored_actor_forward(state, eps, params, max_action=1.0,
                          row_tile=None, bf16_elementwise=None):
    """state: (R, state_dim) f32, eps: (R, action_dim) f32.
    R can be batch_size or (timesteps * batch_size) stacked rows."""
    rows, S = state.shape
    A = eps.shape[-1]
    H = params["w1"].shape[-1]

    auto_bf16, num_tc = _tpu_defaults()
    if bf16_elementwise is None:
        bf16_elementwise = auto_bf16

    tm, rows_p = _choose_row_tile(rows, num_tc, row_tile)
    if rows_p != rows:
        pad = rows_p - rows
        state = jnp.pad(state, ((0, pad), (0, 0)))
        eps = jnp.pad(eps, ((0, pad), (0, 0)))
    num_tiles = rows_p // tm

    # weights/biases: constant block index -> DMA'd once, stay VMEM-resident
    const = lambda shape: pl.BlockSpec(shape, lambda i: (0, 0))

    in_specs = [
        pl.BlockSpec((tm, S), lambda i: (i, 0)),   # state tile
        pl.BlockSpec((tm, A), lambda i: (i, 0)),   # eps tile
        const((S, H)), const((1, H)),              # w1 (bf16), b1 (f32)
        const((H, H)), const((1, H)),              # w2, b2
        const((H, H)), const((1, H)),              # w3, b3
        const((H, A)), const((1, A)),              # mu head
        const((H, A)), const((1, A)),              # log_std head
    ]
    out_specs = (
        pl.BlockSpec((tm, A), lambda i: (i, 0)),       # action
        pl.BlockSpec((1, 1, tm), lambda i: (i, 0, 0)), # log_prob, lane-dense
    )

    kernel = functools.partial(_actor_kernel,
                               max_action=float(max_action),
                               bf16_elementwise=bool(bf16_elementwise))
    action, logp = pl.pallas_call(
        kernel,
        grid=(num_tiles,),
        in_specs=in_specs,
        out_specs=out_specs,
        out_shape=(
            jax.ShapeDtypeStruct((rows_p, A), jnp.float32),
            jax.ShapeDtypeStruct((num_tiles, 1, tm), jnp.float32),
        ),
        compiler_params=pltpu.CompilerParams(
            dimension_semantics=("parallel",)),
    )(state, eps,
      params["w1"], params["b1"], params["w2"], params["b2"],
      params["w3"], params["b3"],
      params["w_mu"], params["b_mu"],
      params["w_log_std"], params["b_log_std"])
    return action[:rows], logp.reshape(rows_p)[:rows]


# ----------------------------------------------------------------------------
# Glue: deterministic parameter init + colored noise (plain JAX).
# ----------------------------------------------------------------------------
def init_params(key, state_dim, hidden_dim, action_dim):
    ks = jax.random.split(key, 10)

    def linear(kw, kb, fan_in, fan_out):
        # matches torch.nn.Linear default: U(-1/sqrt(fan_in), 1/sqrt(fan_in))
        lim = 1.0 / math.sqrt(fan_in)
        w = jax.random.uniform(kw, (fan_in, fan_out), jnp.float32, -lim, lim)
        b = jax.random.uniform(kb, (1, fan_out), jnp.float32, -lim, lim)
        return w.astype(jnp.bfloat16), b

    w1, b1 = linear(ks[0], ks[1], state_dim, hidden_dim)
    w2, b2 = linear(ks[2], ks[3], hidden_dim, hidden_dim)
    w3, b3 = linear(ks[4], ks[5], hidden_dim, hidden_dim)
    w_mu, b_mu = linear(ks[6], ks[7], hidden_dim, action_dim)
    w_ls, b_ls = linear(ks[8], ks[9], hidden_dim, action_dim)
    return dict(w1=w1, b1=b1, w2=w2, b2=b2, w3=w3, b3=b3,
                w_mu=w_mu, b_mu=b_mu, w_log_std=w_ls, b_log_std=b_ls)


def colored_noise_series(key, beta, batch_size, action_dim, seq_len):
    """Power-law (1/f^beta) Gaussian noise series; returns (T, B, A).
    # TODO(synk): FFT-based ColoredNoiseProcess has no Pallas equivalent;
    # noise is generated in plain JAX and fed to the kernel as an input.
    """
    freqs = jnp.fft.rfftfreq(seq_len)
    f = freqs.at[0].set(freqs[1])
    scale = f ** (-beta / 2.0)
    k1, k2 = jax.random.split(key)
    shape = (batch_size, action_dim, freqs.shape[0])
    sr = jax.random.normal(k1, shape, jnp.float32) * scale
    si = jax.random.normal(k2, shape, jnp.float32) * scale
    si = si.at[..., 0].set(0.0)
    if seq_len % 2 == 0:
        si = si.at[..., -1].set(0.0)
    spectrum = sr + 1j * si
    sigma = 2.0 * jnp.sqrt(jnp.sum(scale ** 2)) / seq_len
    series = jnp.fft.irfft(spectrum, n=seq_len, axis=-1) / sigma   # (B, A, T)
    return jnp.transpose(series, (2, 0, 1)).astype(jnp.float32)    # (T, B, A)


# Pure-JAX reference (same bf16-weight math as the kernel) for correctness check.
def reference_forward(state, eps, p, max_action=1.0, bf16_elementwise=False):
    def dense_relu(v, w, b):
        y = jnp.dot(v.astype(jnp.bfloat16), w, preferred_element_type=jnp.float32)
        if bf16_elementwise:
            y = y.astype(jnp.bfloat16) + b.astype(jnp.bfloat16)
        else:
            y = y + b
        return jnp.maximum(y, 0.0)

    h = dense_relu(state, p["w1"], p["b1"])
    h = dense_relu(h, p["w2"], p["b2"])
    h = dense_relu(h, p["w3"], p["b3"])
    hb = h.astype(jnp.bfloat16)
    mu = jnp.dot(hb, p["w_mu"], preferred_element_type=jnp.float32) + p["b_mu"]
    log_std = jnp.dot(hb, p["w_log_std"],
                      preferred_element_type=jnp.float32) + p["b_log_std"]
    log_std = jnp.clip(log_std, -20.0, 2.0)
    std = jnp.exp(log_std)
    action = mu + eps * std
    lp = (-0.5 * ((action - mu) / std) ** 2 - log_std
          - 0.5 * jnp.log(2.0 * jnp.pi)).sum(-1)
    lp = lp - jnp.log(1.0 - jnp.tanh(action) ** 2 + 1e-6).sum(-1)
    return jnp.tanh(action) * max_action, lp


if __name__ == "__main__":
    # Small shapes consistent with the module's constructor.
    beta = 1.0
    seq_len = 8           # rollout length (noise process length)
    batch_size = 8        # "number of envs running in parallel"
    state_dim = 16
    action_dim = 8
    hidden_dim = 256
    max_action = 1.0

    root = jax.random.PRNGKey(0)
    k_param, k_state, k_noise = jax.random.split(root, 3)

    params = init_params(k_param, state_dim, hidden_dim, action_dim)

    # Stack seq_len timesteps x batch envs into one call; the wrapper pads this
    # small R to one 256-row tile and runs grid=(1,) (no per-step overhead).
    states = jax.random.normal(
        k_state, (seq_len, batch_size, state_dim), jnp.float32)
    eps_series = colored_noise_series(
        k_noise, beta, batch_size, action_dim, seq_len)          # (T, B, A)

    state_rows = states.reshape(seq_len * batch_size, state_dim)
    eps_rows = eps_series.reshape(seq_len * batch_size, action_dim)

    bf16_elem, _ = _tpu_defaults()
    action, log_prob = colored_actor_forward(
        state_rows, eps_rows, params, max_action,
        bf16_elementwise=bf16_elem)
    jax.block_until_ready((action, log_prob))

    ref_action, ref_logp = reference_forward(
        state_rows, eps_rows, params, max_action, bf16_elem)

    assert action.shape == (seq_len * batch_size, action_dim)
    assert log_prob.shape == (seq_len * batch_size,)
    assert jnp.allclose(action, ref_action, atol=2e-2, rtol=2e-2)
    assert jnp.allclose(log_prob, ref_logp, atol=5e-2, rtol=5e-2)

    print("KERNEL_OK")
</pallas_src>

<mosaic_0001>
module attributes {stable_mosaic.version = 11 : i64} {
  func.func @_actor_kernel(%arg0: i32, %arg1: memref<256x16xf32, #tpu.memory_space<vmem>>, %arg2: memref<256x8xf32, #tpu.memory_space<vmem>>, %arg3: memref<16x256xbf16, #tpu.memory_space<vmem>>, %arg4: memref<1x256xf32, #tpu.memory_space<vmem>>, %arg5: memref<256x256xbf16, #tpu.memory_space<vmem>>, %arg6: memref<1x256xf32, #tpu.memory_space<vmem>>, %arg7: memref<256x256xbf16, #tpu.memory_space<vmem>>, %arg8: memref<1x256xf32, #tpu.memory_space<vmem>>, %arg9: memref<256x8xbf16, #tpu.memory_space<vmem>>, %arg10: memref<1x8xf32, #tpu.memory_space<vmem>>, %arg11: memref<256x8xbf16, #tpu.memory_space<vmem>>, %arg12: memref<1x8xf32, #tpu.memory_space<vmem>>, %arg13: memref<256x8xf32, #tpu.memory_space<vmem>>, %arg14: memref<1x1x256xf32, #tpu.memory_space<vmem>>) attributes {dimension_semantics = [#tpu.dimension_semantics<parallel>], iteration_bounds = array<i64: 1>, scalar_prefetch = 0 : i64, scratch_operands = 0 : i64, tpu.core_type = #tpu.core_type<tc>, window_params = [{transform_indices = @transform_0, window_bounds = array<i64: 256, 16>}, {transform_indices = @transform_1, window_bounds = array<i64: 256, 8>}, {pipeline_mode = #tpu.pipeline_mode<synchronous>, transform_indices = @transform_2, window_bounds = array<i64: 16, 256>}, {pipeline_mode = #tpu.pipeline_mode<synchronous>, transform_indices = @transform_3, window_bounds = array<i64: 1, 256>}, {pipeline_mode = #tpu.pipeline_mode<synchronous>, transform_indices = @transform_4, window_bounds = array<i64: 256, 256>}, {pipeline_mode = #tpu.pipeline_mode<synchronous>, transform_indices = @transform_5, window_bounds = array<i64: 1, 256>}, {pipeline_mode = #tpu.pipeline_mode<synchronous>, transform_indices = @transform_6, window_bounds = array<i64: 256, 256>}, {pipeline_mode = #tpu.pipeline_mode<synchronous>, transform_indices = @transform_7, window_bounds = array<i64: 1, 256>}, {pipeline_mode = #tpu.pipeline_mode<synchronous>, transform_indices = @transform_8, window_bounds = array<i64: 256, 8>}, {pipeline_mode = #tpu.pipeline_mode<synchronous>, transform_indices = @transform_9, window_bounds = array<i64: 1, 8>}, {pipeline_mode = #tpu.pipeline_mode<synchronous>, transform_indices = @transform_10, window_bounds = array<i64: 256, 8>}, {pipeline_mode = #tpu.pipeline_mode<synchronous>, transform_indices = @transform_11, window_bounds = array<i64: 1, 8>}, {transform_indices = @transform_12, window_bounds = array<i64: 256, 8>}, {transform_indices = @transform_13, window_bounds = array<i64: 1, 1, 256>}]} {
    %c0 = arith.constant 0 : index
    %c0_0 = arith.constant 0 : index
    %0 = vector.load %arg1[%c0, %c0_0] : memref<256x16xf32, #tpu.memory_space<vmem>>, vector<256x16xf32>
    %1 = arith.truncf %0 : vector<256x16xf32> to vector<256x16xbf16>
    %c0_1 = arith.constant 0 : index
    %c0_2 = arith.constant 0 : index
    %2 = vector.load %arg3[%c0_1, %c0_2] : memref<16x256xbf16, #tpu.memory_space<vmem>>, vector<16x256xbf16>
    %cst = arith.constant dense<0.000000e+00> : vector<256x256xf32>
    %3 = tpu.matmul %1, %2, %cst {dimension_numbers = #tpu.dot_dimension_numbers<[1], [0], [0], [1], [0, 0, 1, 1], [], []>} : vector<256x16xbf16>, vector<16x256xbf16>, vector<256x256xf32> -> vector<256x256xf32>
    %c0_3 = arith.constant 0 : index
    %c0_4 = arith.constant 0 : index
    %4 = vector.load %arg4[%c0_3, %c0_4] : memref<1x256xf32, #tpu.memory_space<vmem>>, vector<1x256xf32>
    %5 = vector.broadcast %4 : vector<1x256xf32> to vector<256x256xf32>
    %6 = arith.addf %3, %5 : vector<256x256xf32>
    %cst_5 = arith.constant 0.000000e+00 : f32
    %7 = vector.broadcast %cst_5 : f32 to vector<256x256xf32>
    %8 = arith.maximumf %6, %7 : vector<256x256xf32>
    %9 = arith.truncf %8 : vector<256x256xf32> to vector<256x256xbf16>
    %c0_6 = arith.constant 0 : index
    %c0_7 = arith.constant 0 : index
    %10 = vector.load %arg5[%c0_6, %c0_7] : memref<256x256xbf16, #tpu.memory_space<vmem>>, vector<256x256xbf16>
    %cst_8 = arith.constant dense<0.000000e+00> : vector<256x256xf32>
    %11 = tpu.matmul %9, %10, %cst_8 {dimension_numbers = #tpu.dot_dimension_numbers<[1], [0], [0], [1], [0, 0, 1, 1], [], []>} : vector<256x256xbf16>, vector<256x256xbf16>, vector<256x256xf32> -> vector<256x256xf32>
    %c0_9 = arith.constant 0 : index
    %c0_10 = arith.constant 0 : index
    %12 = vector.load %arg6[%c0_9, %c0_10] : memref<1x256xf32, #tpu.memory_space<vmem>>, vector<1x256xf32>
    %13 = vector.broadcast %12 : vector<1x256xf32> to vector<256x256xf32>
    %14 = arith.addf %11, %13 : vector<256x256xf32>
    %cst_11 = arith.constant 0.000000e+00 : f32
    %15 = vector.broadcast %cst_11 : f32 to vector<256x256xf32>
    %16 = arith.maximumf %14, %15 : vector<256x256xf32>
    %17 = arith.truncf %16 : vector<256x256xf32> to vector<256x256xbf16>
    %c0_12 = arith.constant 0 : index
    %c0_13 = arith.constant 0 : index
    %18 = vector.load %arg7[%c0_12, %c0_13] : memref<256x256xbf16, #tpu.memory_space<vmem>>, vector<256x256xbf16>
    %cst_14 = arith.constant dense<0.000000e+00> : vector<256x256xf32>
    %19 = tpu.matmul %17, %18, %cst_14 {dimension_numbers = #tpu.dot_dimension_numbers<[1], [0], [0], [1], [0, 0, 1, 1], [], []>} : vector<256x256xbf16>, vector<256x256xbf16>, vector<256x256xf32> -> vector<256x256xf32>
    %c0_15 = arith.constant 0 : index
    %c0_16 = arith.constant 0 : index
    %20 = vector.load %arg8[%c0_15, %c0_16] : memref<1x256xf32, #tpu.memory_space<vmem>>, vector<1x256xf32>
    %21 = vector.broadcast %20 : vector<1x256xf32> to vector<256x256xf32>
    %22 = arith.addf %19, %21 : vector<256x256xf32>
    %cst_17 = arith.constant 0.000000e+00 : f32
    %23 = vector.broadcast %cst_17 : f32 to vector<256x256xf32>
    %24 = arith.maximumf %22, %23 : vector<256x256xf32>
    %25 = arith.truncf %24 : vector<256x256xf32> to vector<256x256xbf16>
    %c0_18 = arith.constant 0 : index
    %c0_19 = arith.constant 0 : index
    %26 = vector.load %arg9[%c0_18, %c0_19] : memref<256x8xbf16, #tpu.memory_space<vmem>>, vector<256x8xbf16>
    %cst_20 = arith.constant dense<0.000000e+00> : vector<256x8xf32>
    %27 = tpu.matmul %25, %26, %cst_20 {dimension_numbers = #tpu.dot_dimension_numbers<[1], [0], [0], [1], [0, 0, 1, 1], [], []>} : vector<256x256xbf16>, vector<256x8xbf16>, vector<256x8xf32> -> vector<256x8xf32>
    %c0_21 = arith.constant 0 : index
    %c0_22 = arith.constant 0 : index
    %28 = vector.load %arg10[%c0_21, %c0_22] : memref<1x8xf32, #tpu.memory_space<vmem>>, vector<1x8xf32>
    %29 = vector.broadcast %28 : vector<1x8xf32> to vector<256x8xf32>
    %30 = arith.addf %27, %29 : vector<256x8xf32>
    %c0_23 = arith.constant 0 : index
    %c0_24 = arith.constant 0 : index
    %31 = vector.load %arg11[%c0_23, %c0_24] : memref<256x8xbf16, #tpu.memory_space<vmem>>, vector<256x8xbf16>
    %cst_25 = arith.constant dense<0.000000e+00> : vector<256x8xf32>
    %32 = tpu.matmul %25, %31, %cst_25 {dimension_numbers = #tpu.dot_dimension_numbers<[1], [0], [0], [1], [0, 0, 1, 1], [], []>} : vector<256x256xbf16>, vector<256x8xbf16>, vector<256x8xf32> -> vector<256x8xf32>
    %c0_26 = arith.constant 0 : index
    %c0_27 = arith.constant 0 : index
    %33 = vector.load %arg12[%c0_26, %c0_27] : memref<1x8xf32, #tpu.memory_space<vmem>>, vector<1x8xf32>
    %34 = vector.broadcast %33 : vector<1x8xf32> to vector<256x8xf32>
    %35 = arith.addf %32, %34 : vector<256x8xf32>
    %cst_28 = arith.constant -2.000000e+01 : f32
    %cst_29 = arith.constant 2.000000e+00 : f32
    %36 = vector.broadcast %cst_28 : f32 to vector<256x8xf32>
    %37 = arith.maximumf %36, %35 : vector<256x8xf32>
    %38 = vector.broadcast %cst_29 : f32 to vector<256x8xf32>
    %39 = arith.minimumf %38, %37 : vector<256x8xf32>
    %40 = math.exp %39 : vector<256x8xf32>
    %c0_30 = arith.constant 0 : index
    %c0_31 = arith.constant 0 : index
    %41 = vector.load %arg2[%c0_30, %c0_31] : memref<256x8xf32, #tpu.memory_space<vmem>>, vector<256x8xf32>
    %42 = arith.mulf %41, %40 : vector<256x8xf32>
    %43 = arith.addf %30, %42 : vector<256x8xf32>
    %44 = math.tanh %43 : vector<256x8xf32>
    %cst_32 = arith.constant -5.000000e-01 : f32
    %45 = vector.broadcast %cst_32 : f32 to vector<256x8xf32>
    %46 = arith.mulf %45, %41 : vector<256x8xf32>
    %47 = arith.mulf %46, %41 : vector<256x8xf32>
    %48 = arith.subf %47, %39 : vector<256x8xf32>
    %cst_33 = arith.constant 0.918938517 : f32
    %49 = vector.broadcast %cst_33 : f32 to vector<256x8xf32>
    %50 = arith.subf %48, %49 : vector<256x8xf32>
    %51 = arith.mulf %44, %44 : vector<256x8xf32>
    %cst_34 = arith.constant 1.000000e+00 : f32
    %52 = vector.broadcast %cst_34 : f32 to vector<256x8xf32>
    %53 = arith.subf %52, %51 : vector<256x8xf32>
    %cst_35 = arith.constant 9.99999997E-7 : f32
    %54 = vector.broadcast %cst_35 : f32 to vector<256x8xf32>
    %55 = arith.addf %53, %54 : vector<256x8xf32>
    %56 = math.log %55 : vector<256x8xf32>
    %57 = arith.subf %50, %56 : vector<256x8xf32>
    %cst_36 = arith.constant dense<0.000000e+00> : vector<256xf32>
    %58 = vector.multi_reduction <add>, %57, %cst_36 [1] : vector<256x8xf32> to vector<256xf32>
    %59 = vector.shape_cast %58 : vector<256xf32> to vector<256x1xf32>
    %cst_37 = arith.constant 1.000000e+00 : f32
    %60 = vector.broadcast %cst_37 : f32 to vector<256x8xf32>
    %61 = arith.mulf %44, %60 : vector<256x8xf32>
    %c0_38 = arith.constant 0 : index
    %c0_39 = arith.constant 0 : index
    %62 = vector.load %arg13[%c0_38, %c0_39] : memref<256x8xf32, #tpu.memory_space<vmem>>, vector<256x8xf32>
    tpu.vector_store %arg13[%c0_38, %c0_39], %61 {strides = array<i32>} : memref<256x8xf32, #tpu.memory_space<vmem>>, vector<256x8xf32>,
    %63 = tpu.transpose %59, [1, 0] : vector<256x1xf32> -> vector<1x256xf32>
    %64 = vector.shape_cast %63 : vector<1x256xf32> to vector<1x1x256xf32>
    %c0_40 = arith.constant 0 : index
    %c0_41 = arith.constant 0 : index
    %c0_42 = arith.constant 0 : index
    %65 = vector.load %arg14[%c0_40, %c0_41, %c0_42] : memref<1x1x256xf32, #tpu.memory_space<vmem>>, vector<1x1x256xf32>
    tpu.vector_store %arg14[%c0_40, %c0_41, %c0_42], %64 {strides = array<i32>} : memref<1x1x256xf32, #tpu.memory_space<vmem>>, vector<1x1x256xf32>,
    return
  }
  func.func @transform_0(%arg0: i32) -> (i32, i32) {
    %c0_i32 = arith.constant 0 : i32
    %c0_i32_0 = arith.constant 0 : i32
    return %arg0, %c0_i32 : i32, i32
  }
  func.func @transform_1(%arg0: i32) -> (i32, i32) {
    %c0_i32 = arith.constant 0 : i32
    %c0_i32_0 = arith.constant 0 : i32
    return %arg0, %c0_i32 : i32, i32
  }
  func.func @transform_2(%arg0: i32) -> (i32, i32) {
    %c0_i32 = arith.constant 0 : i32
    %c0_i32_0 = arith.constant 0 : i32
    %c0_i32_1 = arith.constant 0 : i32
    return %c0_i32, %c0_i32_0 : i32, i32
  }
  func.func @transform_3(%arg0: i32) -> (i32, i32) {
    %c0_i32 = arith.constant 0 : i32
    %c0_i32_0 = arith.constant 0 : i32
    %c0_i32_1 = arith.constant 0 : i32
    return %c0_i32, %c0_i32_0 : i32, i32
  }
  func.func @transform_4(%arg0: i32) -> (i32, i32) {
    %c0_i32 = arith.constant 0 : i32
    %c0_i32_0 = arith.constant 0 : i32
    %c0_i32_1 = arith.constant 0 : i32
    return %c0_i32, %c0_i32_0 : i32, i32
  }
  func.func @transform_5(%arg0: i32) -> (i32, i32) {
    %c0_i32 = arith.constant 0 : i32
    %c0_i32_0 = arith.constant 0 : i32
    %c0_i32_1 = arith.constant 0 : i32
    return %c0_i32, %c0_i32_0 : i32, i32
  }
  func.func @transform_6(%arg0: i32) -> (i32, i32) {
    %c0_i32 = arith.constant 0 : i32
    %c0_i32_0 = arith.constant 0 : i32
    %c0_i32_1 = arith.constant 0 : i32
    return %c0_i32, %c0_i32_0 : i32, i32
  }
  func.func @transform_7(%arg0: i32) -> (i32, i32) {
    %c0_i32 = arith.constant 0 : i32
    %c0_i32_0 = arith.constant 0 : i32
    %c0_i32_1 = arith.constant 0 : i32
    return %c0_i32, %c0_i32_0 : i32, i32
  }
  func.func @transform_8(%arg0: i32) -> (i32, i32) {
    %c0_i32 = arith.constant 0 : i32
    %c0_i32_0 = arith.constant 0 : i32
    %c0_i32_1 = arith.constant 0 : i32
    return %c0_i32, %c0_i32_0 : i32, i32
  }
  func.func @transform_9(%arg0: i32) -> (i32, i32) {
    %c0_i32 = arith.constant 0 : i32
    %c0_i32_0 = arith.constant 0 : i32
    %c0_i32_1 = arith.constant 0 : i32
    return %c0_i32, %c0_i32_0 : i32, i32
  }
  func.func @transform_10(%arg0: i32) -> (i32, i32) {
    %c0_i32 = arith.constant 0 : i32
    %c0_i32_0 = arith.constant 0 : i32
    %c0_i32_1 = arith.constant 0 : i32
    return %c0_i32, %c0_i32_0 : i32, i32
  }
  func.func @transform_11(%arg0: i32) -> (i32, i32) {
    %c0_i32 = arith.constant 0 : i32
    %c0_i32_0 = arith.constant 0 : i32
    %c0_i32_1 = arith.constant 0 : i32
    return %c0_i32, %c0_i32_0 : i32, i32
  }
  func.func @transform_12(%arg0: i32) -> (i32, i32) {
    %c0_i32 = arith.constant 0 : i32
    %c0_i32_0 = arith.constant 0 : i32
    return %arg0, %c0_i32 : i32, i32
  }
  func.func @transform_13(%arg0: i32) -> (i32, i32, i32) {
    %c0_i32 = arith.constant 0 : i32
    %c0_i32_0 = arith.constant 0 : i32
    %c0_i32_1 = arith.constant 0 : i32
    return %arg0, %c0_i32, %c0_i32_0 : i32, i32, i32
  }
}

</mosaic_0001>

<bundles_post_ra>
// kernel: tpu_custom_call.1
= control target key start
LH: loop header
LB: loop body
LE: loop exit
PB: predicated region body
PF: predicated region fallthrough
CT: control target
= control target key end

     0   :  { %vm111_vm0 = vcmask 130048   ;;  %s5802_s0 = inlined_call_operand.vmem [shape: f32[256,16], index: 0, kind: input, shape index: {}]   ;;  %s5803_s1 = inlined_call_operand.vmem [shape: f32[256,8], index: 1, kind: input, shape index: {}]   ;;  %s5804_s2 = inlined_call_operand.vmem [shape: bf16[16,256], index: 2, kind: input, shape index: {}]   ;;  %s5805_s3 = inlined_call_operand.vmem [shape: f32[1,256], index: 3, kind: input, shape index: {}]   ;;  %s5806_s4 = inlined_call_operand.vmem [shape: bf16[256,256], index: 4, kind: input, shape index: {}]   ;;  %s5807_s5 = inlined_call_operand.vmem [shape: f32[1,256], index: 5, kind: input, shape index: {}]   ;;  %s5808_s6 = inlined_call_operand.vmem [shape: bf16[256,256], index: 6, kind: input, shape index: {}]   ;;  %s5809_s7 = inlined_call_operand.vmem [shape: f32[1,256], index: 7, kind: input, shape index: {}]   ;;  %s5810_s8 = inlined_call_operand.vmem [shape: bf16[256,8], index: 8, kind: input, shape index: {}]   ;;  %s5811_s9 = inlined_call_operand.vmem [shape: f32[1,8], index: 9, kind: input, shape index: {}]   ;;  %s5812_s10 = inlined_call_operand.vmem [shape: bf16[256,8], index: 10, kind: input, shape index: {}]   ;;  %s5813_s11 = inlined_call_operand.vmem [shape: f32[1,8], index: 11, kind: input, shape index: {}]   ;;  %s5814_s12 = inlined_call_operand.vmem [shape: f32[256,8], index: 12, kind: output, shape index: {0}]   ;;  %s5815_s13 = inlined_call_operand.hbm [shape: f32[1,1,256], index: 13, kind: output, shape index: {1}]  }
   0x1   :  { %v3156_v0 = vld [vmem:[%s5804_s2] sm:$0xf]  ;;  %v3611_v1 = vld [vmem:[%s5804_s2 + $0x4] sm:$0xf0]  ;;  %v3610_v2 = vld [vmem:[%s5804_s2 + $0x4] sm:$0xf] }
   0x2   :  { %v3157_v3 = vor.u32 %v3611_v1, %v3156_v0  ;;  %v3158_v4 = vld [vmem:[%s5804_s2 + $0x8] sm:$0xf0]  ;;  %v45_v5 = vld [vmem:[%s5802_s0] sm:$0xff]  ;;  %v63_v12 = vld [vmem:[%s5802_s0 + $0x90] sm:$0xff] }
   0x3   :  { %v46_v6 = vld [vmem:[%s5802_s0 + $0x8] sm:$0xff]  ;;  %v3161_v7 = vor.u32 %v3610_v2, %v3158_v4  ;;  %v61_v9 = vld [vmem:[%s5802_s0 + $0x80] sm:$0xff]  ;;  %v64_v13 = vld [vmem:[%s5802_s0 + $0x98] sm:$0xff] }
   0x4   :  { %v77_v8 = vpack.c.bf16 %v46_v6, %v45_v5  ;;  %v62_v10 = vld [vmem:[%s5802_s0 + $0x88] sm:$0xff]  ;;  %167 = vmatpush.bf16.msra.mxu0 %v3157_v3  ;;  %3708 = vmatpush.bf16.msra.mxu2 %v3157_v3  ;;  %v86_v14 = vpack.c.bf16 %v64_v13, %v63_v12  ;;  %v3252_v15 = vld [vmem:[%s5806_s4 + $0x70] sm:$0xf]  ;;  %v3627_v16 = vld [vmem:[%s5806_s4 + $0x74] sm:$0xf0] }
   0x5   :  { %v4036_v11 = vpack.c.bf16 %v62_v10, %v61_v9  ;;  %256 = vmatpush.bf16.msra.mxu1 %v3161_v7  ;;  %3709 = vmatpush.bf16.msra.mxu3 %v3161_v7  ;;  %v3253_v17 = vor.u32 %v3627_v16, %v3252_v15 }
   0x7   :  { %3162 = vmatmul.msk.bf16.vlgmr.msra.gmra.mxu0 %vm111_vm0, %v77_v8  ;;  %3171 = vmatmul.msk.bf16.vlgmr.msra.gmra.mxu2 %vm111_vm0, %v86_v14 }
   0x8   :  { %19 = vsyncpa [#allocation3], 0  ;;  %3178 = vmatmul.msk.bf16.vlgmr.msra.gmra.mxu1 %vm111_vm0, %v77_v8  ;;  %3186 = vmatmul.msk.bf16.vlgmr.msra.gmra.mxu3 %vm111_vm0, %v4036_v11  ;;  %v3626_v18 = vld [vmem:[%s5806_s4 + $0x74] sm:$0xf]  ;;  %v3254_v19 = vld [vmem:[%s5806_s4 + $0x78] sm:$0xf0] }
   0x9   :  { %632 = vmatpush.bf16.msrb.mxu2 %v3253_v17  ;;  %v3257_v20 = vor.u32 %v3626_v18, %v3254_v19  ;;  %v3642_v21 = vld [vmem:[%s5806_s4 + $0xf4] sm:$0xf]  ;;  %v3318_v22 = vld [vmem:[%s5806_s4 + $0xf8] sm:$0xf0]  ;;  %v3244_v24 = vld [vmem:[%s5806_s4 + $0x60] sm:$0xf] }
   0xa   :  { %v3321_v23 = vor.u32 %v3642_v21, %v3318_v22  ;;  %v3625_v25 = vld [vmem:[%s5806_s4 + $0x64] sm:$0xf0]  ;;  %v3316_v26 = vld [vmem:[%s5806_s4 + $0xf0] sm:$0xf]  ;;  %v3643_v28 = vld [vmem:[%s5806_s4 + $0xf4] sm:$0xf0] }
   0xb   :  { %810 = vmatpush.bf16.msrb.mxu0 %v3257_v20  ;;  %v3245_v27 = vor.u32 %v3625_v25, %v3244_v24  ;;  %v3317_v29 = vor.u32 %v3643_v28, %v3316_v26  ;;  %v47_v30 = vld [vmem:[%s5802_s0 + $0x10] sm:$0xff]  ;;  %v48_v31 = vld [vmem:[%s5802_s0 + $0x18] sm:$0xff]  ;;  %v65_v32 = vld [vmem:[%s5802_s0 + $0xa0] sm:$0xff]  ;;  %vm2930_vm1 = vcmask 64512   ;;  %s3143_s25 = sshll.u32 %s5815_s13, 4  ;;  %vm3126_vm2 = vcmask 1040384   ;;  %s3144_s25 = int_to_ptr.hbm [resolvable:$true] %s3143_s25 }
   0xc   :  { %899 = vmatpush.bf16.msrb.mxu1 %v3321_v23  ;;  %v66_v33 = vld [vmem:[%s5802_s0 + $0xa8] sm:$0xff]  ;;  %v78_v34 = vpack.c.bf16 %v48_v31, %v47_v30  ;;  %v3624_v36 = vld [vmem:[%s5806_s4 + $0x64] sm:$0xf]  ;;  %v3236_v42 = vld [vmem:[%s5806_s4 + $0x50] sm:$0xf] }
   0xd   :  { %633 = vmatpush.bf16.msrb.mxu2 %v3245_v27  ;;  %721 = vmatpush.bf16.msrb.mxu3 %v3317_v29  ;;  %v87_v35 = vpack.c.bf16 %v66_v33, %v65_v32  ;;  %v3246_v37 = vld [vmem:[%s5806_s4 + $0x68] sm:$0xf0]  ;;  %v3640_v38 = vld [vmem:[%s5806_s4 + $0xe4] sm:$0xf]  ;;  %v3623_v43 = vld [vmem:[%s5806_s4 + $0x54] sm:$0xf0] }
   0xe   :  { %v3310_v39 = vld [vmem:[%s5806_s4 + $0xe8] sm:$0xf0]  ;;  %v3249_v40 = vor.u32 %v3624_v36, %v3246_v37  ;;  %v3308_v44 = vld [vmem:[%s5806_s4 + $0xe0] sm:$0xf]  ;;  %v3237_v45 = vor.u32 %v3623_v43, %v3236_v42  ;;  %v3641_v46 = vld [vmem:[%s5806_s4 + $0xe4] sm:$0xf0] }
   0xf   :  { %v3313_v41 = vor.u32 %v3640_v38, %v3310_v39  ;;  %v3309_v47 = vor.u32 %v3641_v46, %v3308_v44  ;;  %v49_v48 = vld [vmem:[%s5802_s0 + $0x20] sm:$0xff]  ;;  %v50_v49 = vld [vmem:[%s5802_s0 + $0x28] sm:$0xff]  ;;  %v67_v50 = vld [vmem:[%s5802_s0 + $0xb0] sm:$0xff] }
  0x10   :  { %811 = vmatpush.bf16.msrb.mxu0 %v3249_v40  ;;  %v68_v51 = vld [vmem:[%s5802_s0 + $0xb8] sm:$0xff]  ;;  %v79_v52 = vpack.c.bf16 %v50_v49, %v49_v48  ;;  %v3638_v54 = vld [vmem:[%s5806_s4 + $0xd4] sm:$0xf]  ;;  %v3228_v56 = vld [vmem:[%s5806_s4 + $0x40] sm:$0xf] }
  0x11   :  { %900 = vmatpush.bf16.msrb.mxu1 %v3313_v41  ;;  %634 = vmatpush.bf16.msrb.mxu2 %v3237_v45  ;;  %v88_v53 = vpack.c.bf16 %v68_v51, %v67_v50  ;;  %v3302_v55 = vld [vmem:[%s5806_s4 + $0xd8] sm:$0xf0]  ;;  %v3621_v57 = vld [vmem:[%s5806_s4 + $0x44] sm:$0xf0]  ;;  %v3622_v60 = vld [vmem:[%s5806_s4 + $0x54] sm:$0xf] }
  0x12   :  { %722 = vmatpush.bf16.msrb.mxu3 %v3309_v47  ;;  %v3305_v58 = vor.u32 %v3638_v54, %v3302_v55  ;;  %v3229_v59 = vor.u32 %v3621_v57, %v3228_v56  ;;  %v3238_v61 = vld [vmem:[%s5806_s4 + $0x58] sm:$0xf0]  ;;  %v3300_v62 = vld [vmem:[%s5806_s4 + $0xd0] sm:$0xf]  ;;  %v3639_v0 = vld [vmem:[%s5806_s4 + $0xd4] sm:$0xf0] }
  0x13   :  { %v3241_v63 = vor.u32 %v3622_v60, %v3238_v61  ;;  %v3301_v1 = vor.u32 %v3639_v0, %v3300_v62  ;;  %v51_v2 = vld [vmem:[%s5802_s0 + $0x30] sm:$0xff]  ;;  %v52_v3 = vld [vmem:[%s5802_s0 + $0x38] sm:$0xff]  ;;  %v69_v4 = vld [vmem:[%s5802_s0 + $0xc0] sm:$0xff] }
  0x14   :  { %v70_v5 = vld [vmem:[%s5802_s0 + $0xc8] sm:$0xff]  ;;  %v80_v6 = vpack.c.bf16 %v52_v3, %v51_v2  ;;  %v3220_v8 = vld [vmem:[%s5806_s4 + $0x30] sm:$0xf]  ;;  %v3619_v9 = vld [vmem:[%s5806_s4 + $0x34] sm:$0xf0] }
  0x15   :  { %901 = vmatpush.bf16.msrb.mxu1 %v3305_v58  ;;  %635 = vmatpush.bf16.msrb.mxu2 %v3229_v59  ;;  %v89_v7 = vpack.c.bf16 %v70_v5, %v69_v4  ;;  %v3636_v10 = vld [vmem:[%s5806_s4 + $0xc4] sm:$0xf]  ;;  %v3294_v12 = vld [vmem:[%s5806_s4 + $0xc8] sm:$0xf0]  ;;  %v3221_v13 = vor.u32 %v3619_v9, %v3220_v8  ;;  %v3292_v17 = vld [vmem:[%s5806_s4 + $0xc0] sm:$0xf] }
  0x16   :  { %812 = vmatpush.bf16.msrb.mxu0 %v3241_v63  ;;  %723 = vmatpush.bf16.msrb.mxu3 %v3301_v1  ;;  %v3620_v15 = vld [vmem:[%s5806_s4 + $0x44] sm:$0xf]  ;;  %v3230_v16 = vld [vmem:[%s5806_s4 + $0x48] sm:$0xf0]  ;;  %v3637_v19 = vld [vmem:[%s5806_s4 + $0xc4] sm:$0xf0] }
  0x17   :  { %3163 = vmatmul.msk.bf16.gmra.mxu0 %vm111_vm0, %v78_v34  ;;  %3172 = vmatmul.msk.bf16.gmra.mxu2 %vm111_vm0, %v87_v35  ;;  %v3233_v18 = vor.u32 %v3620_v15, %v3230_v16  ;;  %v3293_v20 = vor.u32 %v3637_v19, %v3292_v17  ;;  %v53_v21 = vld [vmem:[%s5802_s0 + $0x40] sm:$0xff]  ;;  %v54_v22 = vld [vmem:[%s5802_s0 + $0x48] sm:$0xff]  ;;  %v71_v23 = vld [vmem:[%s5802_s0 + $0xd0] sm:$0xff] }
  0x18   :  { %3179 = vmatmul.msk.bf16.gmra.mxu1 %vm111_vm0, %v78_v34  ;;  %3187 = vmatmul.msk.bf16.gmra.mxu3 %vm111_vm0, %v86_v14  ;;  %v3297_v14 = vor.u32 %v3636_v10, %v3294_v12  ;;  %v72_v24 = vld [vmem:[%s5802_s0 + $0xd8] sm:$0xff]  ;;  %v81_v25 = vpack.c.bf16 %v54_v22, %v53_v21  ;;  %v3212_v27 = vld [vmem:[%s5806_s4 + $0x20] sm:$0xf]  ;;  %v3617_v28 = vld [vmem:[%s5806_s4 + $0x24] sm:$0xf0] }
  0x19   :  { %636 = vmatpush.bf16.msrb.mxu2 %v3221_v13  ;;  %v90_v26 = vpack.c.bf16 %v72_v24, %v71_v23  ;;  %v3213_v29 = vor.u32 %v3617_v28, %v3212_v27  ;;  %v3634_v30 = vld [vmem:[%s5806_s4 + $0xb4] sm:$0xf]  ;;  %v3286_v31 = vld [vmem:[%s5806_s4 + $0xb8] sm:$0xf0]  ;;  %v3635_v37 = vld [vmem:[%s5806_s4 + $0xb4] sm:$0xf0] }
  0x1a   :  { %902 = vmatpush.bf16.msrb.mxu1 %v3297_v14  ;;  %813 = vmatpush.bf16.msrb.mxu0 %v3233_v18  ;;  %v3289_v32 = vor.u32 %v3634_v30, %v3286_v31  ;;  %v3618_v33 = vld [vmem:[%s5806_s4 + $0x34] sm:$0xf]  ;;  %v3222_v34 = vld [vmem:[%s5806_s4 + $0x38] sm:$0xf0]  ;;  %v73_v41 = vld [vmem:[%s5802_s0 + $0xe0] sm:$0xff] }
  0x1b   :  { %724 = vmatpush.bf16.msrb.mxu3 %v3293_v20  ;;  %v3225_v36 = vor.u32 %v3618_v33, %v3222_v34  ;;  %v55_v39 = vld [vmem:[%s5802_s0 + $0x50] sm:$0xff]  ;;  %v56_v40 = vld [vmem:[%s5802_s0 + $0x58] sm:$0xff]  ;;  %v74_v42 = vld [vmem:[%s5802_s0 + $0xe8] sm:$0xff] }
  0x1c   :  { %v82_v43 = vpack.c.bf16 %v56_v40, %v55_v39  ;;  %v91_v44 = vpack.c.bf16 %v74_v42, %v73_v41  ;;  %v3204_v45 = vld [vmem:[%s5806_s4 + $0x10] sm:$0xf]  ;;  %v3615_v46 = vld [vmem:[%s5806_s4 + $0x14] sm:$0xf0]  ;;  %v3632_v48 = vld [vmem:[%s5806_s4 + $0xa4] sm:$0xf] }
  0x1d   :  { %637 = vmatpush.bf16.msrb.mxu2 %v3213_v29  ;;  %v3205_v47 = vor.u32 %v3615_v46, %v3204_v45  ;;  %v3278_v49 = vld [vmem:[%s5806_s4 + $0xa8] sm:$0xf0]  ;;  %v3616_v51 = vld [vmem:[%s5806_s4 + $0x24] sm:$0xf]  ;;  %v75_v56 = vld [vmem:[%s5802_s0 + $0xf0] sm:$0xff] }
  0x1e   :  { %903 = vmatpush.bf16.msrb.mxu1 %v3289_v32  ;;  %814 = vmatpush.bf16.msrb.mxu0 %v3225_v36  ;;  %v3281_v50 = vor.u32 %v3632_v48, %v3278_v49  ;;  %v57_v54 = vld [vmem:[%s5802_s0 + $0x60] sm:$0xff]  ;;  %v58_v55 = vld [vmem:[%s5802_s0 + $0x68] sm:$0xff]  ;;  %v76_v57 = vld [vmem:[%s5802_s0 + $0xf8] sm:$0xff] }
  0x1f   :  { %v83_v58 = vpack.c.bf16 %v58_v55, %v57_v54  ;;  %v92_v59 = vpack.c.bf16 %v76_v57, %v75_v56  ;;  %v3276_v60 = vld [vmem:[%s5806_s4 + $0xa0] sm:$0xf]  ;;  %v3633_v61 = vld [vmem:[%s5806_s4 + $0xa4] sm:$0xf0]  ;;  %v3630_v1 = vld [vmem:[%s5806_s4 + $0x94] sm:$0xf] }
  0x20   :  { %v3277_v62 = vor.u32 %v3633_v61, %v3276_v60  ;;  %v3196_v63 = vld [vmem:[%s5806_s4] sm:$0xf]  ;;  %v3613_v0 = vld [vmem:[%s5806_s4 + $0x4] sm:$0xf0]  ;;  %v3270_v3 = vld [vmem:[%s5806_s4 + $0x98] sm:$0xf0] }
  0x21   :  { %638 = vmatpush.bf16.msrb.mxu2 %v3205_v47  ;;  %v3197_v2 = vor.u32 %v3613_v0, %v3196_v63  ;;  %v3273_v4 = vor.u32 %v3630_v1, %v3270_v3  ;;  %v3268_v5 = vld [vmem:[%s5806_s4 + $0x90] sm:$0xf]  ;;  %v3260_v8 = vld [vmem:[%s5806_s4 + $0x80] sm:$0xf]  ;;  %v3629_v9 = vld [vmem:[%s5806_s4 + $0x84] sm:$0xf0] }
  0x22   :  { %904 = vmatpush.bf16.msrb.mxu1 %v3281_v50  ;;  %v3614_v10 = vld [vmem:[%s5806_s4 + $0x14] sm:$0xf]  ;;  %v3261_v12 = vor.u32 %v3629_v9, %v3260_v8  ;;  %v3206_v13 = vld [vmem:[%s5806_s4 + $0x18] sm:$0xf0]  ;;  %v3628_v14 = vld [vmem:[%s5806_s4 + $0x84] sm:$0xf] }
  0x23   :  { %v3262_v15 = vld [vmem:[%s5806_s4 + $0x88] sm:$0xf0]  ;;  %v59_v16 = vld [vmem:[%s5802_s0 + $0x70] sm:$0xff]  ;;  %v60_v17 = vld [vmem:[%s5802_s0 + $0x78] sm:$0xff]  ;;  %v3209_v18 = vor.u32 %v3614_v10, %v3206_v13 }
  0x24   :  { %v3265_v19 = vor.u32 %v3628_v14, %v3262_v15  ;;  %v3612_v20 = vld [vmem:[%s5806_s4 + $0x4] sm:$0xf]  ;;  %v3198_v21 = vld [vmem:[%s5806_s4 + $0x8] sm:$0xf0]  ;;  %v84_v22 = vpack.c.bf16 %v60_v17, %v59_v16  ;;  %v3380_v24 = vld [vmem:[%s5808_s6 + $0x70] sm:$0xf] }
  0x25   :  { %639 = vmatpush.bf16.msrb.mxu2 %v3197_v2  ;;  %v3201_v23 = vor.u32 %v3612_v20, %v3198_v21  ;;  %v95_v27 = vld [vmem:[%s5805_s3] sm:$0x3]  ;;  %v3674_v32 = vld [vmem:[%s5808_s6 + $0xf4] sm:$0xf]  ;;  %v3446_v33 = vld [vmem:[%s5808_s6 + $0xf8] sm:$0xf0] }
  0x26   :  { %905 = vmatpush.bf16.msrb.mxu1 %v3273_v4  ;;  %v4355_v30 = vperm.slane %v95_v27, 1  ;;  %v4357_v31 = vperm.slane %v95_v27, 0  ;;  %v3449_v34 = vor.u32 %v3674_v32, %v3446_v33  ;;  %v3372_v50 = vld [vmem:[%s5808_s6 + $0x60] sm:$0xf]  ;;  %v3444_v57 = vld [vmem:[%s5808_s6 + $0xf0] sm:$0xf] }
  0x27   :  { %3164 = vmatmul.msk.bf16.gmra.mxu0 %vm111_vm0, %v79_v52  ;;  %3173 = vmatmul.msk.bf16.gmra.mxu2 %vm111_vm0, %v88_v53  ;;  %v3382_v63 = vld [vmem:[%s5808_s6 + $0x78] sm:$0xf0] }
  0x28   :  { %3180 = vmatmul.msk.bf16.gmra.mxu1 %vm111_vm0, %v79_v52  ;;  %3188 = vmatmul.msk.bf16.gmra.mxu3 %vm111_vm0, %v87_v35  ;;  %v3284_v35 = vld [vmem:[%s5806_s4 + $0xb0] sm:$0xf]  ;;  %v3214_v52 = vld [vmem:[%s5806_s4 + $0x28] sm:$0xf0] }
  0x29   :  { %v3285_v38 = vor.u32 %v3635_v37, %v3284_v35 }
  0x2a   :  { %906 = vmatpush.bf16.msrb.mxu1 %v3265_v19 }
  0x2b   :  { %725 = vmatpush.bf16.msrb.mxu3 %v3285_v38 }
  0x2e   :  { %1549 = vmatpush.bf16.msra.mxu1 %v3449_v34 }
  0x2f   :  { %726 = vmatpush.bf16.msrb.mxu3 %v3277_v62  ;;  %v3658_v62 = vld [vmem:[%s5808_s6 + $0x74] sm:$0xf] }
  0x30   :  { %v3385_v1 = vor.u32 %v3658_v62, %v3382_v63 }
  0x37   :  { %3165 = vmatmul.msk.bf16.gmra.mxu0 %vm111_vm0, %v80_v6  ;;  %3174 = vmatmul.msk.bf16.gmra.mxu2 %vm111_vm0, %v89_v7 }
  0x38   :  { %3181 = vmatmul.msk.bf16.gmra.mxu1 %vm111_vm0, %v80_v6  ;;  %3189 = vmatmul.msk.bf16.gmra.mxu3 %vm111_vm0, %v88_v53  ;;  %v3217_v53 = vor.u32 %v3616_v51, %v3214_v52  ;;  %v3631_v6 = vld [vmem:[%s5806_s4 + $0x94] sm:$0xf0]  ;;  %v3657_v51 = vld [vmem:[%s5808_s6 + $0x64] sm:$0xf0] }
  0x39   :  { %v3373_v56 = vor.u32 %v3657_v51, %v3372_v50 }
  0x3a   :  { %815 = vmatpush.bf16.msrb.mxu0 %v3217_v53 }
  0x3e   :  { %816 = vmatpush.bf16.msrb.mxu0 %v3209_v18 }
  0x42   :  { %817 = vmatpush.bf16.msrb.mxu0 %v3201_v23  ;;  %v3438_v23 = vld [vmem:[%s5808_s6 + $0xe8] sm:$0xf0] }
  0x46   :  { %1460 = vmatpush.bf16.msra.mxu0 %v3385_v1 }
  0x47   :  { %3166 = vmatmul.msk.bf16.gmra.mxu0 %vm111_vm0, %v81_v25  ;;  %3175 = vmatmul.msk.bf16.gmra.mxu2 %vm111_vm0, %v90_v26 }
  0x48   :  { %3182 = vmatmul.msk.bf16.gmra.mxu1 %vm111_vm0, %v81_v25  ;;  %3190 = vmatmul.msk.bf16.gmra.mxu3 %vm111_vm0, %v89_v7  ;;  %v3269_v7 = vor.u32 %v3631_v6, %v3268_v5  ;;  %v3659_v25 = vld [vmem:[%s5808_s6 + $0x74] sm:$0xf0] }
  0x4a   :  { %727 = vmatpush.bf16.msrb.mxu3 %v3269_v7 }
  0x4e   :  { %728 = vmatpush.bf16.msrb.mxu3 %v3261_v12 }
  0x57   :  { %3167 = vmatmul.msk.bf16.gmra.mxu0 %vm111_vm0, %v82_v43  ;;  %3176 = vmatmul.msk.bf16.gmra.mxu2 %vm111_vm0, %v91_v44 }
  0x58   :  { %3183 = vmatmul.msk.bf16.gmra.mxu1 %vm111_vm0, %v82_v43  ;;  %3191 = vmatmul.msk.bf16.gmra.mxu3 %vm111_vm0, %v90_v26  ;;  %v3381_v26 = vor.u32 %v3659_v25, %v3380_v24 }
  0x5a   :  { %1282 = vmatpush.bf16.msra.mxu2 %v3381_v26 }
  0x5e   :  { %1283 = vmatpush.bf16.msra.mxu2 %v3373_v56 }
  0x67   :  { %3168 = vmatmul.msk.bf16.gmra.mxu0 %vm111_vm0, %v83_v58  ;;  %3177 = vmatmul.msk.bf16.gmra.mxu2 %vm111_vm0, %v92_v59 }
  0x68   :  { %3184 = vmatmul.msk.bf16.gmra.mxu1 %vm111_vm0, %v83_v58  ;;  %3192 = vmatmul.msk.bf16.gmra.mxu3 %vm111_vm0, %v91_v44  ;;  %v3675_v58 = vld [vmem:[%s5808_s6 + $0xf4] sm:$0xf0] }
  0x69   :  { %v3445_v61 = vor.u32 %v3675_v58, %v3444_v57 }
  0x6b   :  { %1371 = vmatpush.bf16.msra.mxu3 %v3445_v61 }
  0x77   :  { %3169 = vmatmul.msk.bf16.gmra.mxu0 %vm111_vm0, %v84_v22 }
  0x78   :  { %3185 = vmatmul.msk.bf16.gmra.mxu1 %vm111_vm0, %v84_v22  ;;  %3193 = vmatmul.msk.bf16.gmra.mxu3 %vm111_vm0, %v92_v59  ;;  %v3672_v22 = vld [vmem:[%s5808_s6 + $0xe4] sm:$0xf] }
  0x79   :  { %v3441_v27 = vor.u32 %v3672_v22, %v3438_v23  ;;  %v3670_v22 = vld [vmem:[%s5808_s6 + $0xd4] sm:$0xf]  ;;  %v3430_v23 = vld [vmem:[%s5808_s6 + $0xd8] sm:$0xf0] }
  0x7b   :  { %1550 = vmatpush.bf16.msra.mxu1 %v3441_v27  ;;  %v3433_v27 = vor.u32 %v3670_v22, %v3430_v23 }
  0x7f   :  { %1551 = vmatpush.bf16.msra.mxu1 %v3433_v27 }
  0x84   :  { %v169_v28 = vpop.f32.mrf.mxu0 }
  0x85   :  { %v258_v29 = vpop.f32.mrf.mxu1  ;;  %v170_v36 = vadd.f32 %v169_v28, %v4357_v31 }
  0x86   :  { %v259_v35 = vadd.f32 %v258_v29, %v4355_v30 }
  0x87   :  { %3170 = vmatmul.msk.bf16.gmra.mxu0 %vm111_vm0, %v4036_v11  ;;  %v338_v43 = vmax.f32 %v170_v36, 0.0 }
  0x88   :  { %v339_v41 = vmax.f32 %v259_v35, 0.0 }
  0x8a   :  { %v4369_v38 = vpop.f32.mrf.mxu2 }
  0x8b   :  { %v298_v37 = vpop.f32.mrf.mxu3 }
  0x8c   :  { %v171_v39 = vpop.f32.mrf.mxu0  ;;  %v299_v53 = vadd.f32 %v298_v37, %v4355_v30 }
  0x8d   :  { %v172_v11 = vadd.f32 %v171_v39, %v4357_v31  ;;  %v260_v40 = vpop.f32.mrf.mxu1 }
  0x8e   :  { %v261_v42 = vadd.f32 %v260_v40, %v4355_v30  ;;  %v371_v59 = vmax.f32 %v299_v53, 0.0  ;;  %v3436_v53 = vld [vmem:[%s5808_s6 + $0xe0] sm:$0xf] }
  0x8f   :  { %v340_v44 = vmax.f32 %v172_v11, 0.0 }
  0x90   :  { %v341_v45 = vmax.f32 %v261_v42, 0.0 }
  0x91   :  { %v402_v46 = vpack.c.bf16 %v340_v44, %v338_v43 }
  0x92   :  { %v403_v47 = vpack.c.bf16 %v341_v45, %v339_v41  ;;  %v4381_v55 = vpop.f32.mrf.mxu2 }
  0x93   :  { %640 = vmatmul.bf16.vlgmr.msrb.gmra.mxu2 %v402_v46  ;;  %v300_v48 = vpop.f32.mrf.mxu3 }
  0x94   :  { %729 = vmatmul.bf16.vlgmr.msrb.gmra.mxu3 %v403_v47  ;;  %907 = vmatmul.bf16.vlgmr.msrb.gmra.mxu1 %v403_v47  ;;  %v174_v49 = vpop.f32.mrf.mxu0  ;;  %v301_v54 = vadd.f32 %v300_v48, %v4355_v30  ;;  %v3364_v47 = vld [vmem:[%s5808_s6 + $0x50] sm:$0xf]  ;;  %v3655_v48 = vld [vmem:[%s5808_s6 + $0x54] sm:$0xf0] }
  0x95   :  { %v263_v52 = vpop.f32.mrf.mxu1  ;;  %v175_v2 = vadd.f32 %v174_v49, %v4357_v31 }
  0x96   :  { %v373_v60 = vmax.f32 %v301_v54, 0.0  ;;  %v264_v0 = vadd.f32 %v263_v52, %v4355_v30  ;;  %v3365_v52 = vor.u32 %v3655_v48, %v3364_v47  ;;  %v3673_v54 = vld [vmem:[%s5808_s6 + $0xe4] sm:$0xf0] }
  0x97   :  { %818 = vmatmul.bf16.vlgmr.msrb.gmra.mxu0 %v402_v46  ;;  %v342_v10 = vmax.f32 %v175_v2, 0.0  ;;  %v3437_v58 = vor.u32 %v3673_v54, %v3436_v53 }
  0x98   :  { %v4398_v7 = vpack.c.bf16 %v373_v60, %v371_v59  ;;  %v343_v8 = vmax.f32 %v264_v0, 0.0  ;;  %1284 = vmatpush.bf16.msra.mxu2 %v3365_v52  ;;  %v3656_v59 = vld [vmem:[%s5808_s6 + $0x64] sm:$0xf]  ;;  %v3374_v60 = vld [vmem:[%s5808_s6 + $0x68] sm:$0xf0] }
  0x99   :  { %v3377_v62 = vor.u32 %v3656_v59, %v3374_v60  ;;  %1372 = vmatpush.bf16.msra.mxu3 %v3437_v58 }
  0x9a   :  { %v4401_v13 = vpop.f32.mrf.mxu2 }
  0x9b   :  { %v303_v3 = vpop.f32.mrf.mxu3  ;;  %1461 = vmatpush.bf16.msra.mxu0 %v3377_v62  ;;  %v3366_v62 = vld [vmem:[%s5808_s6 + $0x58] sm:$0xf0] }
  0x9c   :  { %v176_v4 = vpop.f32.mrf.mxu0  ;;  %v304_v20 = vadd.f32 %v303_v3, %v4355_v30 }
  0x9d   :  { %v177_v5 = vadd.f32 %v176_v4, %v4357_v31  ;;  %v265_v6 = vpop.f32.mrf.mxu1 }
  0x9e   :  { %v266_v9 = vadd.f32 %v265_v6, %v4355_v30  ;;  %v375_v24 = vmax.f32 %v304_v20, 0.0 }
  0x9f   :  { %v344_v12 = vmax.f32 %v177_v5, 0.0 }
  0xa0   :  { %v345_v14 = vmax.f32 %v266_v9, 0.0 }
  0xa1   :  { %v404_v15 = vpack.c.bf16 %v344_v12, %v342_v10 }
  0xa2   :  { %v405_v16 = vpack.c.bf16 %v345_v14, %v343_v8  ;;  %v4411_v26 = vpop.f32.mrf.mxu2 }
  0xa3   :  { %645 = vmatmul.bf16.gmra.mxu2 %v404_v15  ;;  %v305_v17 = vpop.f32.mrf.mxu3 }
  0xa4   :  { %734 = vmatmul.bf16.gmra.mxu3 %v405_v16  ;;  %912 = vmatmul.bf16.gmra.mxu1 %v405_v16  ;;  %v179_v18 = vpop.f32.mrf.mxu0  ;;  %v306_v21 = vadd.f32 %v305_v17, %v4355_v30 }
  0xa5   :  { %v268_v19 = vpop.f32.mrf.mxu1  ;;  %v180_v29 = vadd.f32 %v179_v18, %v4357_v31 }
  0xa6   :  { %v377_v25 = vmax.f32 %v306_v21, 0.0  ;;  %v269_v28 = vadd.f32 %v268_v19, %v4355_v30 }
  0xa7   :  { %823 = vmatmul.bf16.gmra.mxu0 %v404_v15  ;;  %v346_v11 = vmax.f32 %v180_v29, 0.0 }
  0xa8   :  { %v4416_v36 = vpack.c.bf16 %v377_v25, %v375_v24  ;;  %v347_v37 = vmax.f32 %v269_v28, 0.0 }
  0xaa   :  { %v4419_v44 = vpop.f32.mrf.mxu2 }
  0xab   :  { %v308_v32 = vpop.f32.mrf.mxu3 }
  0xac   :  { %v181_v33 = vpop.f32.mrf.mxu0  ;;  %v309_v50 = vadd.f32 %v308_v32, %v4355_v30 }
  0xad   :  { %v182_v34 = vadd.f32 %v181_v33, %v4357_v31  ;;  %v270_v35 = vpop.f32.mrf.mxu1 }
  0xae   :  { %v271_v39 = vadd.f32 %v270_v35, %v4355_v30  ;;  %v379_v56 = vmax.f32 %v309_v50, 0.0  ;;  %v3653_v50 = vld [vmem:[%s5808_s6 + $0x44] sm:$0xf0] }
  0xaf   :  { %v348_v40 = vmax.f32 %v182_v34, 0.0 }
  0xb0   :  { %v349_v41 = vmax.f32 %v271_v39, 0.0 }
  0xb1   :  { %v406_v42 = vpack.c.bf16 %v348_v40, %v346_v11 }
  0xb2   :  { %v407_v43 = vpack.c.bf16 %v349_v41, %v347_v37  ;;  %v4444_v4 = vpop.f32.mrf.mxu2 }
  0xb3   :  { %650 = vmatmul.bf16.gmra.mxu2 %v406_v42  ;;  %v310_v45 = vpop.f32.mrf.mxu3 }
  0xb4   :  { %739 = vmatmul.bf16.gmra.mxu3 %v407_v43  ;;  %917 = vmatmul.bf16.gmra.mxu1 %v407_v43  ;;  %v184_v46 = vpop.f32.mrf.mxu0  ;;  %v311_v51 = vadd.f32 %v310_v45, %v4355_v30 }
  0xb5   :  { %v273_v49 = vpop.f32.mrf.mxu1  ;;  %v185_v63 = vadd.f32 %v184_v46, %v4357_v31 }
  0xb6   :  { %v381_v57 = vmax.f32 %v311_v51, 0.0  ;;  %v274_v61 = vadd.f32 %v273_v49, %v4355_v30  ;;  %v3356_v49 = vld [vmem:[%s5808_s6 + $0x40] sm:$0xf] }
  0xb7   :  { %828 = vmatmul.bf16.gmra.mxu0 %v406_v42  ;;  %v350_v9 = vmax.f32 %v185_v63, 0.0  ;;  %v3357_v54 = vor.u32 %v3653_v50, %v3356_v49 }
  0xb8   :  { %v4446_v5 = vpack.c.bf16 %v381_v57, %v379_v56  ;;  %v351_v6 = vmax.f32 %v274_v61, 0.0  ;;  %v3428_v56 = vld [vmem:[%s5808_s6 + $0xd0] sm:$0xf]  ;;  %v3671_v57 = vld [vmem:[%s5808_s6 + $0xd4] sm:$0xf0] }
  0xb9   :  { %1285 = vmatpush.bf16.msra.mxu2 %v3357_v54  ;;  %v3429_v60 = vor.u32 %v3671_v57, %v3428_v56  ;;  %v3654_v61 = vld [vmem:[%s5808_s6 + $0x54] sm:$0xf]  ;;  %v3348_v57 = vld [vmem:[%s5808_s6 + $0x30] sm:$0xf] }
  0xba   :  { %v4451_v21 = vpop.f32.mrf.mxu2 }
  0xbb   :  { %v313_v0 = vpop.f32.mrf.mxu3  ;;  %1373 = vmatpush.bf16.msra.mxu3 %v3429_v60 }
  0xbc   :  { %v186_v1 = vpop.f32.mrf.mxu0  ;;  %v314_v19 = vadd.f32 %v313_v0, %v4355_v30  ;;  %v3369_v0 = vor.u32 %v3654_v61, %v3366_v62 }
  0xbd   :  { %v187_v2 = vadd.f32 %v186_v1, %v4357_v31  ;;  %v275_v3 = vpop.f32.mrf.mxu1 }
  0xbe   :  { %v276_v8 = vadd.f32 %v275_v3, %v4355_v30  ;;  %v383_v24 = vmax.f32 %v314_v19, 0.0  ;;  %1462 = vmatpush.bf16.msra.mxu0 %v3369_v0 }
  0xbf   :  { %v352_v10 = vmax.f32 %v187_v2, 0.0 }
  0xc0   :  { %v353_v12 = vmax.f32 %v276_v8, 0.0 }
  0xc1   :  { %v408_v14 = vpack.c.bf16 %v352_v10, %v350_v9 }
  0xc2   :  { %v409_v15 = vpack.c.bf16 %v353_v12, %v351_v6  ;;  %v4465_v45 = vpop.f32.mrf.mxu2 }
  0xc3   :  { %655 = vmatmul.bf16.gmra.mxu2 %v408_v14  ;;  %v315_v16 = vpop.f32.mrf.mxu3 }
  0xc4   :  { %744 = vmatmul.bf16.gmra.mxu3 %v409_v15  ;;  %922 = vmatmul.bf16.gmra.mxu1 %v409_v15  ;;  %v189_v17 = vpop.f32.mrf.mxu0  ;;  %v316_v20 = vadd.f32 %v315_v16, %v4355_v30 }
  0xc5   :  { %v278_v18 = vpop.f32.mrf.mxu1  ;;  %v190_v29 = vadd.f32 %v189_v17, %v4357_v31 }
  0xc6   :  { %v385_v25 = vmax.f32 %v316_v20, 0.0  ;;  %v279_v28 = vadd.f32 %v278_v18, %v4355_v30 }
  0xc7   :  { %833 = vmatmul.bf16.gmra.mxu0 %v408_v14  ;;  %v354_v40 = vmax.f32 %v190_v29, 0.0  ;;  %v3422_v29 = vld [vmem:[%s5808_s6 + $0xc8] sm:$0xf0] }
  0xc8   :  { %v4462_v37 = vpack.c.bf16 %v385_v25, %v383_v24  ;;  %v355_v39 = vmax.f32 %v279_v28, 0.0  ;;  %v3668_v28 = vld [vmem:[%s5808_s6 + $0xc4] sm:$0xf] }
  0xca   :  { %v4489_v2 = vpop.f32.mrf.mxu2 }
  0xcb   :  { %v318_v32 = vpop.f32.mrf.mxu3 }
  0xcc   :  { %v191_v33 = vpop.f32.mrf.mxu0  ;;  %v319_v52 = vadd.f32 %v318_v32, %v4355_v30  ;;  %v3425_v32 = vor.u32 %v3668_v28, %v3422_v29 }
  0xcd   :  { %v192_v34 = vadd.f32 %v191_v33, %v4357_v31  ;;  %v280_v35 = vpop.f32.mrf.mxu1 }
  0xce   :  { %v281_v11 = vadd.f32 %v280_v35, %v4355_v30  ;;  %v387_v58 = vmax.f32 %v319_v52, 0.0  ;;  %1552 = vmatpush.bf16.msra.mxu1 %v3425_v32 }
  0xcf   :  { %v356_v41 = vmax.f32 %v192_v34, 0.0 }
  0xd0   :  { %v357_v42 = vmax.f32 %v281_v11, 0.0 }
  0xd1   :  { %v410_v43 = vpack.c.bf16 %v356_v41, %v354_v40 }
  0xd2   :  { %v411_v46 = vpack.c.bf16 %v357_v42, %v355_v39  ;;  %v4495_v24 = vpop.f32.mrf.mxu2 }
  0xd3   :  { %660 = vmatmul.bf16.gmra.mxu2 %v410_v43  ;;  %v320_v47 = vpop.f32.mrf.mxu3 }
  0xd4   :  { %749 = vmatmul.bf16.gmra.mxu3 %v411_v46  ;;  %927 = vmatmul.bf16.gmra.mxu1 %v411_v46  ;;  %v194_v48 = vpop.f32.mrf.mxu0  ;;  %v321_v53 = vadd.f32 %v320_v47, %v4355_v30 }
  0xd5   :  { %v283_v51 = vpop.f32.mrf.mxu1  ;;  %v195_v1 = vadd.f32 %v194_v48, %v4357_v31 }
  0xd6   :  { %v389_v59 = vmax.f32 %v321_v53, 0.0  ;;  %v284_v63 = vadd.f32 %v283_v51, %v4355_v30 }
  0xd7   :  { %838 = vmatmul.bf16.gmra.mxu0 %v410_v43  ;;  %v358_v15 = vmax.f32 %v195_v1, 0.0 }
  0xd8   :  { %v4492_v10 = vpack.c.bf16 %v389_v59, %v387_v58  ;;  %v359_v12 = vmax.f32 %v284_v63, 0.0  ;;  %v3651_v58 = vld [vmem:[%s5808_s6 + $0x34] sm:$0xf0] }
  0xd9   :  { %v3349_v62 = vor.u32 %v3651_v58, %v3348_v57 }
  0xda   :  { %v4511_v50 = vpop.f32.mrf.mxu2 }
  0xdb   :  { %v323_v3 = vpop.f32.mrf.mxu3  ;;  %1286 = vmatpush.bf16.msra.mxu2 %v3349_v62 }
  0xdc   :  { %v196_v6 = vpop.f32.mrf.mxu0  ;;  %v324_v25 = vadd.f32 %v323_v3, %v4355_v30  ;;  %v3420_v3 = vld [vmem:[%s5808_s6 + $0xc0] sm:$0xf] }
  0xdd   :  { %v197_v8 = vadd.f32 %v196_v6, %v4357_v31  ;;  %v285_v9 = vpop.f32.mrf.mxu1  ;;  %v3669_v6 = vld [vmem:[%s5808_s6 + $0xc4] sm:$0xf0] }
  0xde   :  { %v286_v14 = vadd.f32 %v285_v9, %v4355_v30  ;;  %v391_v33 = vmax.f32 %v324_v25, 0.0  ;;  %v3421_v9 = vor.u32 %v3669_v6, %v3420_v3 }
  0xdf   :  { %v360_v16 = vmax.f32 %v197_v8, 0.0 }
  0xe0   :  { %v361_v17 = vmax.f32 %v286_v14, 0.0  ;;  %1374 = vmatpush.bf16.msra.mxu3 %v3421_v9 }
  0xe1   :  { %v412_v18 = vpack.c.bf16 %v360_v16, %v358_v15  ;;  %v3652_v15 = vld [vmem:[%s5808_s6 + $0x44] sm:$0xf]  ;;  %v3358_v16 = vld [vmem:[%s5808_s6 + $0x48] sm:$0xf0] }
  0xe2   :  { %v413_v19 = vpack.c.bf16 %v361_v17, %v359_v12  ;;  %v4521_v63 = vpop.f32.mrf.mxu2 }
  0xe3   :  { %665 = vmatmul.bf16.gmra.mxu2 %v412_v18  ;;  %v325_v20 = vpop.f32.mrf.mxu3 }
  0xe4   :  { %754 = vmatmul.bf16.gmra.mxu3 %v413_v19  ;;  %932 = vmatmul.bf16.gmra.mxu1 %v413_v19  ;;  %v199_v22 = vpop.f32.mrf.mxu0  ;;  %v326_v27 = vadd.f32 %v325_v20, %v4355_v30 }
  0xe5   :  { %v288_v23 = vpop.f32.mrf.mxu1  ;;  %v200_v39 = vadd.f32 %v199_v22, %v4357_v31 }
  0xe6   :  { %v393_v34 = vmax.f32 %v326_v27, 0.0  ;;  %v289_v35 = vadd.f32 %v288_v23, %v4355_v30 }
  0xe7   :  { %843 = vmatmul.bf16.gmra.mxu0 %v412_v18  ;;  %v362_v48 = vmax.f32 %v200_v39, 0.0  ;;  %v3361_v18 = vor.u32 %v3652_v15, %v3358_v16  ;;  %v217_v15 = vadd.f32 %v4381_v55, %v4357_v31 }
  0xe8   :  { %v4508_v43 = vpack.c.bf16 %v393_v34, %v391_v33  ;;  %v363_v46 = vmax.f32 %v289_v35, 0.0 }
  0xe9   :  { %1463 = vmatpush.bf16.msra.mxu0 %v3361_v18  ;;  %v3412_v18 = vld [vmem:[%s5808_s6 + $0xb0] sm:$0xf] }
  0xea   :  { %v4541_v34 = vpop.f32.mrf.mxu2 }
  0xeb   :  { %v328_v11 = vpop.f32.mrf.mxu3 }
  0xec   :  { %v201_v40 = vpop.f32.mrf.mxu0  ;;  %v329_v60 = vadd.f32 %v328_v11, %v4355_v30 }
  0xed   :  { %v202_v41 = vadd.f32 %v201_v40, %v4357_v31  ;;  %v290_v42 = vpop.f32.mrf.mxu1 }
  0xee   :  { %v291_v47 = vadd.f32 %v290_v42, %v4355_v30  ;;  %v395_v0 = vmax.f32 %v329_v60, 0.0 }
  0xef   :  { %v364_v49 = vmax.f32 %v202_v41, 0.0 }
  0xf0   :  { %v365_v51 = vmax.f32 %v291_v47, 0.0  ;;  %v3666_v47 = vld [vmem:[%s5808_s6 + $0xb4] sm:$0xf] }
  0xf1   :  { %v414_v52 = vpack.c.bf16 %v364_v49, %v362_v48  ;;  %v3414_v48 = vld [vmem:[%s5808_s6 + $0xb8] sm:$0xf0] }
  0xf2   :  { %v415_v53 = vpack.c.bf16 %v365_v51, %v363_v46  ;;  %v3417_v51 = vor.u32 %v3666_v47, %v3414_v48 }
  0xf3   :  { %670 = vmatmul.bf16.gmra.mxu2 %v414_v52  ;;  %v330_v54 = vpop.f32.mrf.mxu3 }
  0xf4   :  { %759 = vmatmul.bf16.gmra.mxu3 %v415_v53  ;;  %937 = vmatmul.bf16.gmra.mxu1 %v415_v53  ;;  %v204_v56 = vpop.f32.mrf.mxu0  ;;  %v331_v61 = vadd.f32 %v330_v54, %v4355_v30  ;;  %v466_v54 = vld [vmem:[%s5807_s5] sm:$0x3] }
  0xf5   :  { %v293_v59 = vpop.f32.mrf.mxu1  ;;  %v205_v12 = vadd.f32 %v204_v56, %v4357_v31  ;;  %1553 = vmatpush.bf16.msra.mxu1 %v3417_v51  ;;  %v4560_v60 = vperm.slane %v466_v54, 1 }
  0xf6   :  { %v397_v1 = vmax.f32 %v331_v61, 0.0  ;;  %v294_v8 = vadd.f32 %v293_v59, %v4355_v30  ;;  %v4562_v61 = vperm.slane %v466_v54, 0 }
  0xf7   :  { %848 = vmatmul.bf16.gmra.mxu0 %v414_v52  ;;  %v366_v27 = vmax.f32 %v205_v12, 0.0 }
  0xf8   :  { %v4538_v22 = vpack.c.bf16 %v397_v1, %v395_v0  ;;  %v367_v23 = vmax.f32 %v294_v8, 0.0  ;;  %v3340_v0 = vld [vmem:[%s5808_s6 + $0x20] sm:$0xf]  ;;  %v3649_v1 = vld [vmem:[%s5808_s6 + $0x24] sm:$0xf0] }
  0xf9   :  { %v3341_v6 = vor.u32 %v3649_v1, %v3340_v0  ;;  %v222_v0 = vadd.f32 %v4411_v26, %v4357_v31 }
  0xfb   :  { %v333_v14 = vpop.f32.mrf.mxu3  ;;  %1287 = vmatpush.bf16.msra.mxu2 %v3341_v6  ;;  %v3406_v6 = vld [vmem:[%s5808_s6 + $0xa8] sm:$0xf0] }
  0xfc   :  { %v206_v17 = vpop.f32.mrf.mxu0  ;;  %v334_v11 = vadd.f32 %v333_v14, %v4355_v30 }
  0xfd   :  { %v207_v19 = vadd.f32 %v206_v17, %v4357_v31  ;;  %v295_v20 = vpop.f32.mrf.mxu1 }
  0xfe   :  { %v296_v25 = vadd.f32 %v295_v20, %v4355_v30  ;;  %v399_v41 = vmax.f32 %v334_v11, 0.0 }
  0xff   :  { %v368_v28 = vmax.f32 %v207_v19, 0.0  ;;  %v3667_v19 = vld [vmem:[%s5808_s6 + $0xb4] sm:$0xf0] }
 0x100   :  { %v369_v29 = vmax.f32 %v296_v25, 0.0  ;;  %v3413_v20 = vor.u32 %v3667_v19, %v3412_v18 }
 0x101   :  { %v416_v32 = vpack.c.bf16 %v368_v28, %v366_v27  ;;  %v376_v28 = vmax.f32 %v217_v15, 0.0 }
 0x102   :  { %v417_v33 = vpack.c.bf16 %v369_v29, %v367_v23  ;;  %v3650_v23 = vld [vmem:[%s5808_s6 + $0x34] sm:$0xf]  ;;  %1375 = vmatpush.bf16.msra.mxu3 %v3413_v20 }
 0x103   :  { %675 = vmatmul.bf16.gmra.mxu2 %v416_v32  ;;  %v335_v39 = vpop.f32.mrf.mxu3 }
 0x104   :  { %764 = vmatmul.bf16.gmra.mxu3 %v417_v33  ;;  %942 = vmatmul.bf16.gmra.mxu1 %v417_v33  ;;  %v209_v35 = vpop.f32.mrf.mxu0  ;;  %v336_v40 = vadd.f32 %v335_v39, %v4355_v30  ;;  %v4555_v30 = vpop.f32.mrf.mxu2 }
 0x105   :  { %v210_v46 = vadd.f32 %v209_v35, %v4357_v31 }
 0x106   :  { %v401_v42 = vmax.f32 %v336_v40, 0.0 }
 0x107   :  { %853 = vmatmul.bf16.gmra.mxu0 %v416_v32  ;;  %v370_v56 = vmax.f32 %v210_v46, 0.0 }
 0x108   :  { %v4553_v53 = vpack.c.bf16 %v401_v42, %v399_v41 }
 0x10c   :  { %v211_v49 = vpop.f32.mrf.mxu0 }
 0x10d   :  { %v212_v52 = vadd.f32 %v211_v49, %v4357_v31 }
 0x10f   :  { %v372_v57 = vmax.f32 %v212_v52, 0.0 }
 0x111   :  { %v908_v58 = vpop.f32.mrf.mxu1  ;;  %v418_v59 = vpack.c.bf16 %v372_v57, %v370_v56 }
 0x113   :  { %680 = vmatmul.bf16.gmra.mxu2 %v418_v59 }
 0x114   :  { %769 = vmatmul.bf16.gmra.mxu3 %v4398_v7  ;;  %947 = vmatmul.bf16.gmra.mxu1 %v4398_v7  ;;  %v819_v62 = vpop.f32.mrf.mxu0  ;;  %v215_v7 = vadd.f32 %v4369_v38, %v4357_v31  ;;  %v3350_v38 = vld [vmem:[%s5808_s6 + $0x38] sm:$0xf0] }
 0x115   :  { %v820_v3 = vadd.f32 %v819_v62, %v4560_v60  ;;  %v3353_v25 = vor.u32 %v3650_v23, %v3350_v38  ;;  %v220_v62 = vadd.f32 %v4401_v13, %v4357_v31 }
 0x116   :  { %v641_v8 = vpop.f32.mrf.mxu2  ;;  %v374_v27 = vmax.f32 %v215_v7, 0.0 }
 0x117   :  { %v909_v9 = vadd.f32 %v908_v58, %v820_v3  ;;  %v642_v12 = vadd.f32 %v641_v8, %v4562_v61  ;;  %v730_v14 = vpop.f32.mrf.mxu3  ;;  %858 = vmatmul.bf16.gmra.mxu0 %v418_v59 }
 0x118   :  { %1464 = vmatpush.bf16.msra.mxu0 %v3353_v25  ;;  %v420_v46 = vpack.c.bf16 %v376_v28, %v374_v27  ;;  %v3332_v28 = vld [vmem:[%s5808_s6 + $0x10] sm:$0xf] }
 0x119   :  { %v731_v16 = vadd.f32 %v730_v14, %v642_v12  ;;  %v910_v17 = vpop.f32.mrf.mxu1  ;;  %v989_v11 = vmax.f32 %v909_v9, 0.0  ;;  %v378_v12 = vmax.f32 %v220_v62, 0.0  ;;  %v380_v14 = vmax.f32 %v222_v0, 0.0 }
 0x11b   :  { %v988_v47 = vmax.f32 %v731_v16, 0.0  ;;  %v422_v23 = vpack.c.bf16 %v380_v14, %v378_v12 }
 0x11c   :  { %v821_v55 = vpop.f32.mrf.mxu0 }
 0x11d   :  { %v822_v29 = vadd.f32 %v821_v55, %v4560_v60 }
 0x11e   :  { %v643_v32 = vpop.f32.mrf.mxu2 }
 0x11f   :  { %v911_v33 = vadd.f32 %v910_v17, %v822_v29  ;;  %v644_v35 = vadd.f32 %v643_v32, %v4562_v61  ;;  %v732_v39 = vpop.f32.mrf.mxu3  ;;  %v3647_v29 = vld [vmem:[%s5808_s6 + $0x14] sm:$0xf0] }
 0x121   :  { %v991_v40 = vmax.f32 %v911_v33, 0.0  ;;  %v733_v41 = vadd.f32 %v732_v39, %v644_v35  ;;  %v913_v42 = vpop.f32.mrf.mxu1  ;;  %v3333_v33 = vor.u32 %v3647_v29, %v3332_v28  ;;  %v3398_v29 = vld [vmem:[%s5808_s6 + $0x98] sm:$0xf0] }
 0x123   :  { %v4592_v48 = vpack.c.bf16 %v991_v40, %v989_v11  ;;  %v990_v49 = vmax.f32 %v733_v41, 0.0  ;;  %685 = vmatmul.bf16.gmra.mxu2 %v420_v46 }
 0x124   :  { %774 = vmatmul.bf16.gmra.mxu3 %v4416_v36  ;;  %952 = vmatmul.bf16.gmra.mxu1 %v4416_v36  ;;  %v824_v51 = vpop.f32.mrf.mxu0  ;;  %v3664_v36 = vld [vmem:[%s5808_s6 + $0xa4] sm:$0xf] }
 0x125   :  { %v4596_v52 = vpack.c.bf16 %v990_v49, %v988_v47  ;;  %v825_v54 = vadd.f32 %v824_v51, %v4560_v60  ;;  %v3409_v9 = vor.u32 %v3664_v36, %v3406_v6  ;;  %1288 = vmatpush.bf16.msra.mxu2 %v3333_v33  ;;  %v3404_v49 = vld [vmem:[%s5808_s6 + $0xa0] sm:$0xf]  ;;  %v3665_v51 = vld [vmem:[%s5808_s6 + $0xa4] sm:$0xf0] }
 0x126   :  { %v646_v56 = vpop.f32.mrf.mxu2 }
 0x127   :  { %v914_v57 = vadd.f32 %v913_v42, %v825_v54  ;;  %v647_v58 = vadd.f32 %v646_v56, %v4562_v61  ;;  %v735_v59 = vpop.f32.mrf.mxu3  ;;  %863 = vmatmul.bf16.gmra.mxu0 %v420_v46  ;;  %1554 = vmatpush.bf16.msra.mxu1 %v3409_v9  ;;  %v227_v42 = vadd.f32 %v4444_v4, %v4357_v31  ;;  %v3648_v56 = vld [vmem:[%s5808_s6 + $0x24] sm:$0xf] }
 0x128   :  { %v3405_v54 = vor.u32 %v3665_v51, %v3404_v49 }
 0x129   :  { %v736_v1 = vadd.f32 %v735_v59, %v647_v58  ;;  %v915_v3 = vpop.f32.mrf.mxu1  ;;  %v993_v17 = vmax.f32 %v914_v57, 0.0  ;;  %v384_v59 = vmax.f32 %v227_v42, 0.0 }
 0x12a   :  { %1376 = vmatpush.bf16.msra.mxu3 %v3405_v54 }
 0x12b   :  { %v992_v38 = vmax.f32 %v736_v1, 0.0 }
 0x12c   :  { %v826_v8 = vpop.f32.mrf.mxu0 }
 0x12d   :  { %v827_v7 = vadd.f32 %v826_v8, %v4560_v60 }
 0x12e   :  { %v648_v13 = vpop.f32.mrf.mxu2 }
 0x12f   :  { %v916_v15 = vadd.f32 %v915_v3, %v827_v7  ;;  %v649_v26 = vadd.f32 %v648_v13, %v4562_v61  ;;  %v737_v16 = vpop.f32.mrf.mxu3 }
 0x131   :  { %v995_v18 = vmax.f32 %v916_v15, 0.0  ;;  %v738_v19 = vadd.f32 %v737_v16, %v649_v26  ;;  %v918_v20 = vpop.f32.mrf.mxu1 }
 0x133   :  { %v994_v55 = vmax.f32 %v738_v19, 0.0  ;;  %690 = vmatmul.bf16.gmra.mxu2 %v422_v23  ;;  %v4612_v25 = vpack.c.bf16 %v995_v18, %v993_v17 }
 0x134   :  { %779 = vmatmul.bf16.gmra.mxu3 %v4446_v5  ;;  %957 = vmatmul.bf16.gmra.mxu1 %v4446_v5  ;;  %v829_v27 = vpop.f32.mrf.mxu0  ;;  %v225_v5 = vadd.f32 %v4419_v44, %v4357_v31  ;;  %v3342_v44 = vld [vmem:[%s5808_s6 + $0x28] sm:$0xf0] }
 0x135   :  { %v830_v32 = vadd.f32 %v829_v27, %v4560_v60  ;;  %v4623_v35 = vpack.c.bf16 %v994_v55, %v992_v38  ;;  %v3345_v57 = vor.u32 %v3648_v56, %v3342_v44  ;;  %v230_v38 = vadd.f32 %v4451_v21, %v4357_v31 }
 0x136   :  { %v651_v39 = vpop.f32.mrf.mxu2  ;;  %v382_v58 = vmax.f32 %v225_v5, 0.0  ;;  %v232_v55 = vadd.f32 %v4465_v45, %v4357_v31 }
 0x137   :  { %v919_v11 = vadd.f32 %v918_v20, %v830_v32  ;;  %v652_v40 = vadd.f32 %v651_v39, %v4562_v61  ;;  %v740_v41 = vpop.f32.mrf.mxu3  ;;  %868 = vmatmul.bf16.gmra.mxu0 %v422_v23  ;;  %v386_v39 = vmax.f32 %v230_v38, 0.0 }
 0x138   :  { %1465 = vmatpush.bf16.msra.mxu0 %v3345_v57  ;;  %v424_v14 = vpack.c.bf16 %v384_v59, %v382_v58  ;;  %v3324_v57 = vld [vmem:[%s5808_s6] sm:$0xf]  ;;  %v3645_v58 = vld [vmem:[%s5808_s6 + $0x4] sm:$0xf0] }
 0x139   :  { %v741_v46 = vadd.f32 %v740_v41, %v652_v40  ;;  %v920_v47 = vpop.f32.mrf.mxu1  ;;  %v997_v6 = vmax.f32 %v919_v11, 0.0  ;;  %v388_v11 = vmax.f32 %v232_v55, 0.0 }
 0x13b   :  { %v996_v7 = vmax.f32 %v741_v46, 0.0  ;;  %v426_v51 = vpack.c.bf16 %v388_v11, %v386_v39 }
 0x13c   :  { %v831_v4 = vpop.f32.mrf.mxu0 }
 0x13d   :  { %v832_v62 = vadd.f32 %v831_v4, %v4560_v60 }
 0x13e   :  { %v653_v0 = vpop.f32.mrf.mxu2 }
 0x13f   :  { %v921_v1 = vadd.f32 %v920_v47, %v832_v62  ;;  %v654_v3 = vadd.f32 %v653_v0, %v4562_v61  ;;  %v742_v36 = vpop.f32.mrf.mxu3  ;;  %v3325_v62 = vor.u32 %v3645_v58, %v3324_v57 }
 0x141   :  { %v999_v8 = vmax.f32 %v921_v1, 0.0  ;;  %v743_v9 = vadd.f32 %v742_v36, %v654_v3  ;;  %v923_v12 = vpop.f32.mrf.mxu1  ;;  %1289 = vmatpush.bf16.msra.mxu2 %v3325_v62 }
 0x143   :  { %v998_v13 = vmax.f32 %v743_v9, 0.0  ;;  %695 = vmatmul.bf16.gmra.mxu2 %v424_v14  ;;  %v4644_v15 = vpack.c.bf16 %v999_v8, %v997_v6  ;;  %v237_v8 = vadd.f32 %v4495_v24, %v4357_v31 }
 0x144   :  { %784 = vmatmul.bf16.gmra.mxu3 %v4462_v37  ;;  %962 = vmatmul.bf16.gmra.mxu1 %v4462_v37  ;;  %v834_v26 = vpop.f32.mrf.mxu0  ;;  %v3662_v37 = vld [vmem:[%s5808_s6 + $0x94] sm:$0xf] }
 0x145   :  { %v835_v16 = vadd.f32 %v834_v26, %v4560_v60  ;;  %v4649_v17 = vpack.c.bf16 %v998_v13, %v996_v7  ;;  %v3401_v33 = vor.u32 %v3662_v37, %v3398_v29  ;;  %v3663_v7 = vld [vmem:[%s5808_s6 + $0x94] sm:$0xf0]  ;;  %v3646_v26 = vld [vmem:[%s5808_s6 + $0x14] sm:$0xf] }
 0x146   :  { %v656_v18 = vpop.f32.mrf.mxu2 }
 0x147   :  { %v924_v19 = vadd.f32 %v923_v12, %v835_v16  ;;  %v657_v20 = vadd.f32 %v656_v18, %v4562_v61  ;;  %v745_v23 = vpop.f32.mrf.mxu3  ;;  %873 = vmatmul.bf16.gmra.mxu0 %v424_v14  ;;  %1555 = vmatpush.bf16.msra.mxu1 %v3401_v33  ;;  %v3396_v14 = vld [vmem:[%s5808_s6 + $0x90] sm:$0xf] }
 0x148   :  { %v3397_v13 = vor.u32 %v3663_v7, %v3396_v14 }
 0x149   :  { %v746_v27 = vadd.f32 %v745_v23, %v657_v20  ;;  %v925_v28 = vpop.f32.mrf.mxu1  ;;  %v1001_v42 = vmax.f32 %v924_v19, 0.0  ;;  %v392_v19 = vmax.f32 %v237_v8, 0.0 }
 0x14a   :  { %1377 = vmatpush.bf16.msra.mxu3 %v3397_v13 }
 0x14b   :  { %v1000_v54 = vmax.f32 %v746_v27, 0.0 }
 0x14c   :  { %v836_v32 = vpop.f32.mrf.mxu0 }
 0x14d   :  { %v837_v40 = vadd.f32 %v836_v32, %v4560_v60 }
 0x14e   :  { %v658_v21 = vpop.f32.mrf.mxu2 }
 0x14f   :  { %v926_v41 = vadd.f32 %v925_v28, %v837_v40  ;;  %v659_v45 = vadd.f32 %v658_v21, %v4562_v61  ;;  %v747_v5 = vpop.f32.mrf.mxu3 }
 0x151   :  { %v1003_v46 = vmax.f32 %v926_v41, 0.0  ;;  %v748_v47 = vadd.f32 %v747_v5, %v659_v45  ;;  %v928_v49 = vpop.f32.mrf.mxu1 }
 0x153   :  { %v1002_v56 = vmax.f32 %v748_v47, 0.0  ;;  %700 = vmatmul.bf16.gmra.mxu2 %v426_v51  ;;  %v4664_v44 = vpack.c.bf16 %v1003_v46, %v1001_v42 }
 0x154   :  { %789 = vmatmul.bf16.gmra.mxu3 %v4492_v10  ;;  %967 = vmatmul.bf16.gmra.mxu1 %v4492_v10  ;;  %v839_v4 = vpop.f32.mrf.mxu0  ;;  %v235_v10 = vadd.f32 %v4489_v2, %v4357_v31  ;;  %v3334_v2 = vld [vmem:[%s5808_s6 + $0x18] sm:$0xf0] }
 0x155   :  { %v840_v59 = vadd.f32 %v839_v4, %v4560_v60  ;;  %v4675_v0 = vpack.c.bf16 %v1002_v56, %v1000_v54  ;;  %v3337_v16 = vor.u32 %v3646_v26, %v3334_v2  ;;  %v3390_v4 = vld [vmem:[%s5808_s6 + $0x88] sm:$0xf0]  ;;  %v3644_v26 = vld [vmem:[%s5808_s6 + $0x4] sm:$0xf] }
 0x156   :  { %v661_v1 = vpop.f32.mrf.mxu2  ;;  %v390_v18 = vmax.f32 %v235_v10, 0.0  ;;  %v3326_v2 = vld [vmem:[%s5808_s6 + $0x8] sm:$0xf0] }
 0x157   :  { %v929_v3 = vadd.f32 %v928_v49, %v840_v59  ;;  %v662_v36 = vadd.f32 %v661_v1, %v4562_v61  ;;  %v750_v6 = vpop.f32.mrf.mxu3  ;;  %878 = vmatmul.bf16.gmra.mxu0 %v426_v51  ;;  %v240_v49 = vadd.f32 %v4511_v50, %v4357_v31  ;;  %v242_v51 = vadd.f32 %v4521_v63, %v4357_v31  ;;  %v3388_v63 = vld [vmem:[%s5808_s6 + $0x80] sm:$0xf] }
 0x158   :  { %1466 = vmatpush.bf16.msra.mxu0 %v3337_v16  ;;  %v428_v33 = vpack.c.bf16 %v392_v19, %v390_v18  ;;  %v3329_v18 = vor.u32 %v3644_v26, %v3326_v2 }
 0x159   :  { %v751_v9 = vadd.f32 %v750_v6, %v662_v36  ;;  %v930_v12 = vpop.f32.mrf.mxu1  ;;  %v1005_v28 = vmax.f32 %v929_v3, 0.0  ;;  %v394_v59 = vmax.f32 %v240_v49, 0.0  ;;  %v396_v62 = vmax.f32 %v242_v51, 0.0  ;;  %v3661_v3 = vld [vmem:[%s5808_s6 + $0x84] sm:$0xf0] }
 0x15a   :  { %v3389_v8 = vor.u32 %v3661_v3, %v3388_v63 }
 0x15b   :  { %v1004_v39 = vmax.f32 %v751_v9, 0.0  ;;  %v430_v13 = vpack.c.bf16 %v396_v62, %v394_v59 }
 0x15c   :  { %v841_v24 = vpop.f32.mrf.mxu0  ;;  %1378 = vmatpush.bf16.msra.mxu3 %v3389_v8  ;;  %1467 = vmatpush.bf16.msra.mxu0 %v3329_v18 }
 0x15d   :  { %v842_v20 = vadd.f32 %v841_v24, %v4560_v60 }
 0x15e   :  { %v663_v23 = vpop.f32.mrf.mxu2 }
 0x15f   :  { %v931_v38 = vadd.f32 %v930_v12, %v842_v20  ;;  %v664_v55 = vadd.f32 %v663_v23, %v4562_v61  ;;  %v752_v27 = vpop.f32.mrf.mxu3  ;;  %v3683_v23 = vld [vmem:[%s5810_s8 + $0x38] sm:$0xff] }
 0x160   :  { %1866 = vmatpush.bf16.msrb.mxu2 %v3683_v23  ;;  %v3682_v23 = vld [vmem:[%s5810_s8 + $0x30] sm:$0xff] }
 0x161   :  { %v1007_v37 = vmax.f32 %v931_v38, 0.0  ;;  %v753_v29 = vadd.f32 %v752_v27, %v664_v55  ;;  %v933_v32 = vpop.f32.mrf.mxu1 }
 0x163   :  { %v1006_v11 = vmax.f32 %v753_v29, 0.0  ;;  %705 = vmatmul.bf16.gmra.mxu2 %v428_v33  ;;  %v4696_v40 = vpack.c.bf16 %v1007_v37, %v1005_v28 }
 0x164   :  { %794 = vmatmul.bf16.gmra.mxu3 %v4508_v43  ;;  %972 = vmatmul.bf16.gmra.mxu1 %v4508_v43  ;;  %v844_v21 = vpop.f32.mrf.mxu0  ;;  %v3660_v43 = vld [vmem:[%s5808_s6 + $0x84] sm:$0xf] }
 0x165   :  { %v845_v41 = vadd.f32 %v844_v21, %v4560_v60  ;;  %v4701_v45 = vpack.c.bf16 %v1006_v11, %v1004_v39  ;;  %v3393_v58 = vor.u32 %v3660_v43, %v3390_v4  ;;  %1867 = vmatpush.bf16.msrb.mxu2 %v3682_v23 }
 0x166   :  { %v666_v5 = vpop.f32.mrf.mxu2 }
 0x167   :  { %v934_v42 = vadd.f32 %v933_v32, %v845_v41  ;;  %v667_v46 = vadd.f32 %v666_v5, %v4562_v61  ;;  %v755_v47 = vpop.f32.mrf.mxu3  ;;  %883 = vmatmul.bf16.gmra.mxu0 %v428_v33  ;;  %1556 = vmatpush.bf16.msra.mxu1 %v3393_v58  ;;  %v247_v32 = vadd.f32 %v4555_v30, %v4357_v31 }
 0x169   :  { %v756_v54 = vadd.f32 %v755_v47, %v667_v46  ;;  %v935_v56 = vpop.f32.mrf.mxu1  ;;  %v1009_v9 = vmax.f32 %v934_v42, 0.0  ;;  %v400_v41 = vmax.f32 %v247_v32, 0.0 }
 0x16b   :  { %v1008_v24 = vmax.f32 %v756_v54, 0.0 }
 0x16c   :  { %v846_v57 = vpop.f32.mrf.mxu0 }
 0x16d   :  { %v847_v1 = vadd.f32 %v846_v57, %v4560_v60 }
 0x16e   :  { %v668_v50 = vpop.f32.mrf.mxu2 }
 0x16f   :  { %v936_v36 = vadd.f32 %v935_v56, %v847_v1  ;;  %v669_v6 = vadd.f32 %v668_v50, %v4562_v61  ;;  %v757_v10 = vpop.f32.mrf.mxu3 }
 0x171   :  { %v1011_v12 = vmax.f32 %v936_v36, 0.0  ;;  %v758_v14 = vadd.f32 %v757_v10, %v669_v6  ;;  %v938_v7 = vpop.f32.mrf.mxu1  ;;  %v3707_v6 = vld [vmem:[%s5812_s10 + $0x78] sm:$0xff] }
 0x172   :  { %2265 = vmatpush.bf16.msrb.mxu1 %v3707_v6 }
 0x173   :  { %v1010_v16 = vmax.f32 %v758_v14, 0.0  ;;  %710 = vmatmul.bf16.gmra.mxu2 %v430_v13  ;;  %v4728_v19 = vpack.c.bf16 %v1011_v12, %v1009_v9 }
 0x174   :  { %799 = vmatmul.bf16.gmra.mxu3 %v4538_v22  ;;  %977 = vmatmul.bf16.gmra.mxu1 %v4538_v22  ;;  %v849_v20 = vpop.f32.mrf.mxu0  ;;  %v245_v22 = vadd.f32 %v4541_v34, %v4357_v31 }
 0x175   :  { %v850_v38 = vadd.f32 %v849_v20, %v4560_v60  ;;  %v4736_v55 = vpack.c.bf16 %v1010_v16, %v1008_v24 }
 0x176   :  { %v671_v27 = vpop.f32.mrf.mxu2  ;;  %v398_v21 = vmax.f32 %v245_v22, 0.0 }
 0x177   :  { %v939_v28 = vadd.f32 %v938_v7, %v850_v38  ;;  %v672_v37 = vadd.f32 %v671_v27, %v4562_v61  ;;  %v760_v29 = vpop.f32.mrf.mxu3  ;;  %888 = vmatmul.bf16.gmra.mxu0 %v430_v13 }
 0x178   :  { %v432_v34 = vpack.c.bf16 %v400_v41, %v398_v21 }
 0x179   :  { %v761_v33 = vadd.f32 %v760_v29, %v672_v37  ;;  %v940_v39 = vpop.f32.mrf.mxu1  ;;  %v1013_v51 = vmax.f32 %v939_v28, 0.0 }
 0x17b   :  { %v1012_v4 = vmax.f32 %v761_v33, 0.0 }
 0x17c   :  { %v851_v11 = vpop.f32.mrf.mxu0 }
 0x17d   :  { %v852_v5 = vadd.f32 %v851_v11, %v4560_v60 }
 0x17e   :  { %v673_v42 = vpop.f32.mrf.mxu2 }
 0x17f   :  { %v941_v46 = vadd.f32 %v940_v39, %v852_v5  ;;  %v674_v47 = vadd.f32 %v673_v42, %v4562_v61  ;;  %v762_v49 = vpop.f32.mrf.mxu3  ;;  %v4777_v39 = vld [vmem:[%s5812_s10 + $0x38] sm:$0xff] }
 0x180   :  { %2176 = vmatpush.bf16.msrb.mxu0 %v4777_v39 }
 0x181   :  { %v1015_v54 = vmax.f32 %v941_v46, 0.0  ;;  %v763_v56 = vadd.f32 %v762_v49, %v674_v47  ;;  %v943_v43 = vpop.f32.mrf.mxu1 }
 0x183   :  { %v1014_v57 = vmax.f32 %v763_v56, 0.0  ;;  %715 = vmatmul.bf16.gmra.mxu2 %v432_v34  ;;  %v4745_v31 = vpack.c.bf16 %v1015_v54, %v1013_v51 }
 0x184   :  { %804 = vmatmul.bf16.gmra.mxu3 %v4553_v53  ;;  %982 = vmatmul.bf16.gmra.mxu1 %v4553_v53  ;;  %v854_v30 = vpop.f32.mrf.mxu0 }
 0x185   :  { %v855_v58 = vadd.f32 %v854_v30, %v4560_v60  ;;  %v4750_v59 = vpack.c.bf16 %v1014_v57, %v1012_v4 }
 0x186   :  { %v676_v62 = vpop.f32.mrf.mxu2 }
 0x187   :  { %v944_v1 = vadd.f32 %v943_v43, %v855_v58  ;;  %v677_v50 = vadd.f32 %v676_v62, %v4562_v61  ;;  %v765_v63 = vpop.f32.mrf.mxu3  ;;  %893 = vmatmul.bf16.gmra.mxu0 %v432_v34 }
 0x189   :  { %v766_v3 = vadd.f32 %v765_v63, %v677_v50  ;;  %v945_v36 = vpop.f32.mrf.mxu1  ;;  %v1017_v7 = vmax.f32 %v944_v1, 0.0 }
 0x18b   :  { %v1016_v24 = vmax.f32 %v766_v3, 0.0  ;;  %v3706_v3 = vld [vmem:[%s5812_s10 + $0x70] sm:$0xff] }
 0x18c   :  { %v856_v10 = vpop.f32.mrf.mxu0  ;;  %2266 = vmatpush.bf16.msrb.mxu1 %v3706_v3 }
 0x18d   :  { %v857_v53 = vadd.f32 %v856_v10, %v4560_v60 }
 0x18e   :  { %v678_v8 = vpop.f32.mrf.mxu2 }
 0x18f   :  { %v946_v9 = vadd.f32 %v945_v36, %v857_v53  ;;  %v679_v12 = vadd.f32 %v678_v8, %v4562_v61  ;;  %v767_v14 = vpop.f32.mrf.mxu3 }
 0x191   :  { %v1019_v13 = vmax.f32 %v946_v9, 0.0  ;;  %v768_v26 = vadd.f32 %v767_v14, %v679_v12  ;;  %v948_v2 = vpop.f32.mrf.mxu1 }
 0x193   :  { %v1018_v16 = vmax.f32 %v768_v26, 0.0  ;;  %1290 = vmatmul.bf16.vlgmr.msra.gmra.mxu2 %v4596_v52  ;;  %v4759_v18 = vpack.c.bf16 %v1019_v13, %v1017_v7 }
 0x194   :  { %1379 = vmatmul.bf16.vlgmr.msra.gmra.mxu3 %v4592_v48  ;;  %1557 = vmatmul.bf16.vlgmr.msra.gmra.mxu1 %v4592_v48  ;;  %v859_v20 = vpop.f32.mrf.mxu0  ;;  %v3691_v48 = vld [vmem:[%s5810_s8 + $0x78] sm:$0xff] }
 0x195   :  { %v860_v38 = vadd.f32 %v859_v20, %v4560_v60  ;;  %v4767_v27 = vpack.c.bf16 %v1018_v16, %v1016_v24  ;;  %1955 = vmatpush.bf16.msrb.mxu3 %v3691_v48  ;;  %v3681_v24 = vld [vmem:[%s5810_s8 + $0x28] sm:$0xff] }
 0x196   :  { %v681_v28 = vpop.f32.mrf.mxu2  ;;  %1868 = vmatpush.bf16.msrb.mxu2 %v3681_v24 }
 0x197   :  { %v949_v37 = vadd.f32 %v948_v2, %v860_v38  ;;  %v682_v29 = vadd.f32 %v681_v28, %v4562_v61  ;;  %v770_v22 = vpop.f32.mrf.mxu3  ;;  %1468 = vmatmul.bf16.vlgmr.msra.gmra.mxu0 %v4596_v52 }
 0x199   :  { %v771_v32 = vadd.f32 %v770_v22, %v682_v29  ;;  %v950_v33 = vpop.f32.mrf.mxu1  ;;  %v1021_v46 = vmax.f32 %v949_v37, 0.0 }
 0x19b   :  { %v1020_v54 = vmax.f32 %v771_v32, 0.0  ;;  %v4816_v32 = vld [vmem:[%s5812_s10 + $0x30] sm:$0xff] }
 0x19c   :  { %v861_v11 = vpop.f32.mrf.mxu0  ;;  %2177 = vmatpush.bf16.msrb.mxu0 %v4816_v32 }
 0x19d   :  { %v862_v21 = vadd.f32 %v861_v11, %v4560_v60 }
 0x19e   :  { %v683_v41 = vpop.f32.mrf.mxu2 }
 0x19f   :  { %v951_v5 = vadd.f32 %v950_v33, %v862_v21  ;;  %v684_v52 = vadd.f32 %v683_v41, %v4562_v61  ;;  %v772_v42 = vpop.f32.mrf.mxu3 }
 0x1a1   :  { %v1023_v47 = vmax.f32 %v951_v5, 0.0  ;;  %v773_v49 = vadd.f32 %v772_v42, %v684_v52  ;;  %v953_v51 = vpop.f32.mrf.mxu1 }
 0x1a3   :  { %v1022_v56 = vmax.f32 %v773_v49, 0.0  ;;  %1295 = vmatmul.bf16.gmra.mxu2 %v4623_v35  ;;  %v4783_v43 = vpack.c.bf16 %v1023_v47, %v1021_v46 }
 0x1a4   :  { %1384 = vmatmul.bf16.gmra.mxu3 %v4612_v25  ;;  %1562 = vmatmul.bf16.gmra.mxu1 %v4612_v25  ;;  %v864_v34 = vpop.f32.mrf.mxu0 }
 0x1a5   :  { %v865_v4 = vadd.f32 %v864_v34, %v4560_v60  ;;  %v4788_v57 = vpack.c.bf16 %v1022_v56, %v1020_v54 }
 0x1a6   :  { %v686_v30 = vpop.f32.mrf.mxu2 }
 0x1a7   :  { %v954_v58 = vadd.f32 %v953_v51, %v865_v4  ;;  %v687_v62 = vadd.f32 %v686_v30, %v4562_v61  ;;  %v775_v1 = vpop.f32.mrf.mxu3  ;;  %1473 = vmatmul.bf16.gmra.mxu0 %v4623_v35 }
 0x1a9   :  { %v776_v50 = vadd.f32 %v775_v1, %v687_v62  ;;  %v955_v63 = vpop.f32.mrf.mxu1  ;;  %v1025_v9 = vmax.f32 %v954_v58, 0.0 }
 0x1ab   :  { %v1024_v35 = vmax.f32 %v776_v50, 0.0 }
 0x1ac   :  { %v866_v36 = vpop.f32.mrf.mxu0 }
 0x1ad   :  { %v867_v25 = vadd.f32 %v866_v36, %v4560_v60 }
 0x1ae   :  { %v688_v6 = vpop.f32.mrf.mxu2 }
 0x1af   :  { %v956_v10 = vadd.f32 %v955_v63, %v867_v25  ;;  %v689_v53 = vadd.f32 %v688_v6, %v4562_v61  ;;  %v777_v8 = vpop.f32.mrf.mxu3  ;;  %v3705_v63 = vld [vmem:[%s5812_s10 + $0x68] sm:$0xff] }
 0x1b0   :  { %2267 = vmatpush.bf16.msrb.mxu1 %v3705_v63  ;;  %v3704_v63 = vld [vmem:[%s5812_s10 + $0x60] sm:$0xff] }
 0x1b1   :  { %v1027_v12 = vmax.f32 %v956_v10, 0.0  ;;  %v778_v14 = vadd.f32 %v777_v8, %v689_v53  ;;  %v958_v7 = vpop.f32.mrf.mxu1 }
 0x1b3   :  { %v1026_v13 = vmax.f32 %v778_v14, 0.0  ;;  %1300 = vmatmul.bf16.gmra.mxu2 %v4649_v17  ;;  %v4798_v26 = vpack.c.bf16 %v1027_v12, %v1025_v9 }
 0x1b4   :  { %1389 = vmatmul.bf16.gmra.mxu3 %v4644_v15  ;;  %1567 = vmatmul.bf16.gmra.mxu1 %v4644_v15  ;;  %v869_v2 = vpop.f32.mrf.mxu0  ;;  %v3690_v15 = vld [vmem:[%s5810_s8 + $0x70] sm:$0xff] }
 0x1b5   :  { %v870_v16 = vadd.f32 %v869_v2, %v4560_v60  ;;  %v4806_v20 = vpack.c.bf16 %v1026_v13, %v1024_v35  ;;  %1956 = vmatpush.bf16.msrb.mxu3 %v3690_v15  ;;  %v3680_v13 = vld [vmem:[%s5810_s8 + $0x20] sm:$0xff]  ;;  %2268 = vmatpush.bf16.msrb.mxu1 %v3704_v63 }
 0x1b6   :  { %v691_v23 = vpop.f32.mrf.mxu2  ;;  %1869 = vmatpush.bf16.msrb.mxu2 %v3680_v13 }
 0x1b7   :  { %v959_v38 = vadd.f32 %v958_v7, %v870_v16  ;;  %v692_v28 = vadd.f32 %v691_v23, %v4562_v61  ;;  %v780_v37 = vpop.f32.mrf.mxu3  ;;  %1478 = vmatmul.bf16.gmra.mxu0 %v4649_v17 }
 0x1b9   :  { %v781_v29 = vadd.f32 %v780_v37, %v692_v28  ;;  %v960_v22 = vpop.f32.mrf.mxu1  ;;  %v1029_v5 = vmax.f32 %v959_v38, 0.0 }
 0x1bb   :  { %v1028_v47 = vmax.f32 %v781_v29, 0.0 }
 0x1bc   :  { %v871_v33 = vpop.f32.mrf.mxu0 }
 0x1bd   :  { %v872_v48 = vadd.f32 %v871_v33, %v4560_v60 }
 0x1be   :  { %v693_v11 = vpop.f32.mrf.mxu2 }
 0x1bf   :  { %v961_v21 = vadd.f32 %v960_v22, %v872_v48  ;;  %v694_v17 = vadd.f32 %v693_v11, %v4562_v61  ;;  %v782_v41 = vpop.f32.mrf.mxu3  ;;  %v4855_v22 = vld [vmem:[%s5812_s10 + $0x28] sm:$0xff] }
 0x1c0   :  { %2178 = vmatpush.bf16.msrb.mxu0 %v4855_v22 }
 0x1c1   :  { %v1031_v52 = vmax.f32 %v961_v21, 0.0  ;;  %v783_v42 = vadd.f32 %v782_v41, %v694_v17  ;;  %v963_v46 = vpop.f32.mrf.mxu1 }
 0x1c3   :  { %v1030_v49 = vmax.f32 %v783_v42, 0.0  ;;  %1305 = vmatmul.bf16.gmra.mxu2 %v4675_v0  ;;  %v4822_v51 = vpack.c.bf16 %v1031_v52, %v1029_v5 }
 0x1c4   :  { %1394 = vmatmul.bf16.gmra.mxu3 %v4664_v44  ;;  %1572 = vmatmul.bf16.gmra.mxu1 %v4664_v44  ;;  %v874_v54 = vpop.f32.mrf.mxu0 }
 0x1c5   :  { %v875_v56 = vadd.f32 %v874_v54, %v4560_v60  ;;  %v4827_v34 = vpack.c.bf16 %v1030_v49, %v1028_v47 }
 0x1c6   :  { %v696_v4 = vpop.f32.mrf.mxu2 }
 0x1c7   :  { %v964_v30 = vadd.f32 %v963_v46, %v875_v56  ;;  %v697_v58 = vadd.f32 %v696_v4, %v4562_v61  ;;  %v785_v62 = vpop.f32.mrf.mxu3  ;;  %1483 = vmatmul.bf16.gmra.mxu0 %v4675_v0 }
 0x1c9   :  { %v786_v1 = vadd.f32 %v785_v62, %v697_v58  ;;  %v965_v50 = vpop.f32.mrf.mxu1  ;;  %v1033_v53 = vmax.f32 %v964_v30, 0.0 }
 0x1cb   :  { %v1032_v0 = vmax.f32 %v786_v1, 0.0 }
 0x1cc   :  { %v876_v3 = vpop.f32.mrf.mxu0 }
 0x1cd   :  { %v877_v44 = vadd.f32 %v876_v3, %v4560_v60 }
 0x1ce   :  { %v698_v36 = vpop.f32.mrf.mxu2 }
 0x1cf   :  { %v966_v25 = vadd.f32 %v965_v50, %v877_v44  ;;  %v699_v6 = vadd.f32 %v698_v36, %v4562_v61  ;;  %v787_v10 = vpop.f32.mrf.mxu3 }
 0x1d1   :  { %v1035_v8 = vmax.f32 %v966_v25, 0.0  ;;  %v788_v9 = vadd.f32 %v787_v10, %v699_v6  ;;  %v968_v12 = vpop.f32.mrf.mxu1 }
 0x1d3   :  { %v1034_v14 = vmax.f32 %v788_v9, 0.0  ;;  %1310 = vmatmul.bf16.gmra.mxu2 %v4701_v45  ;;  %v4837_v7 = vpack.c.bf16 %v1035_v8, %v1033_v53 }
 0x1d4   :  { %1399 = vmatmul.bf16.gmra.mxu3 %v4696_v40  ;;  %1577 = vmatmul.bf16.gmra.mxu1 %v4696_v40  ;;  %v879_v35 = vpop.f32.mrf.mxu0  ;;  %v3689_v40 = vld [vmem:[%s5810_s8 + $0x68] sm:$0xff] }
 0x1d5   :  { %v880_v2 = vadd.f32 %v879_v35, %v4560_v60  ;;  %v4845_v24 = vpack.c.bf16 %v1034_v14, %v1032_v0  ;;  %1957 = vmatpush.bf16.msrb.mxu3 %v3689_v40  ;;  %v3679_v35 = vld [vmem:[%s5810_s8 + $0x18] sm:$0xff]  ;;  %v4894_v40 = vld [vmem:[%s5812_s10 + $0x20] sm:$0xff] }
 0x1d6   :  { %v701_v16 = vpop.f32.mrf.mxu2  ;;  %1870 = vmatpush.bf16.msrb.mxu2 %v3679_v35  ;;  %2179 = vmatpush.bf16.msrb.mxu0 %v4894_v40 }
 0x1d7   :  { %v969_v23 = vadd.f32 %v968_v12, %v880_v2  ;;  %v702_v38 = vadd.f32 %v701_v16, %v4562_v61  ;;  %v790_v28 = vpop.f32.mrf.mxu3  ;;  %1488 = vmatmul.bf16.gmra.mxu0 %v4701_v45 }
 0x1d9   :  { %v791_v37 = vadd.f32 %v790_v28, %v702_v38  ;;  %v970_v29 = vpop.f32.mrf.mxu1  ;;  %v1037_v17 = vmax.f32 %v969_v23, 0.0 }
 0x1db   :  { %v1036_v42 = vmax.f32 %v791_v37, 0.0 }
 0x1dc   :  { %v881_v15 = vpop.f32.mrf.mxu0 }
 0x1dd   :  { %v882_v33 = vadd.f32 %v881_v15, %v4560_v60 }
 0x1de   :  { %v703_v48 = vpop.f32.mrf.mxu2 }
 0x1df   :  { %v971_v11 = vadd.f32 %v970_v29, %v882_v33  ;;  %v704_v45 = vadd.f32 %v703_v48, %v4562_v61  ;;  %v792_v21 = vpop.f32.mrf.mxu3 }
 0x1e1   :  { %v1039_v41 = vmax.f32 %v971_v11, 0.0  ;;  %v793_v5 = vadd.f32 %v792_v21, %v704_v45  ;;  %v973_v52 = vpop.f32.mrf.mxu1 }
 0x1e3   :  { %v1038_v46 = vmax.f32 %v793_v5, 0.0  ;;  %1315 = vmatmul.bf16.gmra.mxu2 %v4736_v55  ;;  %v4861_v47 = vpack.c.bf16 %v1039_v41, %v1037_v17 }
 0x1e4   :  { %1404 = vmatmul.bf16.gmra.mxu3 %v4728_v19  ;;  %1582 = vmatmul.bf16.gmra.mxu1 %v4728_v19  ;;  %v884_v49 = vpop.f32.mrf.mxu0 }
 0x1e5   :  { %v885_v54 = vadd.f32 %v884_v49, %v4560_v60  ;;  %v4866_v56 = vpack.c.bf16 %v1038_v46, %v1036_v42 }
 0x1e6   :  { %v706_v4 = vpop.f32.mrf.mxu2 }
 0x1e7   :  { %v974_v30 = vadd.f32 %v973_v52, %v885_v54  ;;  %v707_v58 = vadd.f32 %v706_v4, %v4562_v61  ;;  %v795_v62 = vpop.f32.mrf.mxu3  ;;  %1493 = vmatmul.bf16.gmra.mxu0 %v4736_v55 }
 0x1e9   :  { %v796_v1 = vadd.f32 %v795_v62, %v707_v58  ;;  %v975_v50 = vpop.f32.mrf.mxu1  ;;  %v1041_v10 = vmax.f32 %v974_v30, 0.0 }
 0x1eb   :  { %v1040_v55 = vmax.f32 %v796_v1, 0.0 }
 0x1ec   :  { %v886_v3 = vpop.f32.mrf.mxu0 }
 0x1ed   :  { %v887_v19 = vadd.f32 %v886_v3, %v4560_v60  ;;  %v3703_v3 = vld [vmem:[%s5812_s10 + $0x58] sm:$0xff] }
 0x1ee   :  { %v708_v44 = vpop.f32.mrf.mxu2  ;;  %2269 = vmatpush.bf16.msrb.mxu1 %v3703_v3 }
 0x1ef   :  { %v976_v36 = vadd.f32 %v975_v50, %v887_v19  ;;  %v709_v25 = vadd.f32 %v708_v44, %v4562_v61  ;;  %v797_v6 = vpop.f32.mrf.mxu3 }
 0x1f1   :  { %v1043_v53 = vmax.f32 %v976_v36, 0.0  ;;  %v798_v8 = vadd.f32 %v797_v6, %v709_v25  ;;  %v978_v9 = vpop.f32.mrf.mxu1  ;;  %v1116_v36 = vld [vmem:[%s5809_s7] sm:$0x3] }
 0x1f3   :  { %v1042_v12 = vmax.f32 %v798_v8, 0.0  ;;  %1320 = vmatmul.bf16.gmra.mxu2 %v4750_v59  ;;  %v4876_v0 = vpack.c.bf16 %v1043_v53, %v1041_v10 }
 0x1f4   :  { %1409 = vmatmul.bf16.gmra.mxu3 %v4745_v31  ;;  %1587 = vmatmul.bf16.gmra.mxu1 %v4745_v31  ;;  %v889_v14 = vpop.f32.mrf.mxu0  ;;  %v3688_v31 = vld [vmem:[%s5810_s8 + $0x60] sm:$0xff] }
 0x1f5   :  { %v890_v13 = vadd.f32 %v889_v14, %v4560_v60  ;;  %v4884_v2 = vpack.c.bf16 %v1042_v12, %v1040_v55  ;;  %1958 = vmatpush.bf16.msrb.mxu3 %v3688_v31  ;;  %v4917_v55 = vperm.slane %v1116_v36, 1 }
 0x1f6   :  { %v711_v16 = vpop.f32.mrf.mxu2 }
 0x1f7   :  { %v979_v23 = vadd.f32 %v978_v9, %v890_v13  ;;  %v712_v38 = vadd.f32 %v711_v16, %v4562_v61  ;;  %v800_v28 = vpop.f32.mrf.mxu3  ;;  %1498 = vmatmul.bf16.gmra.mxu0 %v4750_v59  ;;  %v3678_v13 = vld [vmem:[%s5810_s8 + $0x10] sm:$0xff] }
 0x1f8   :  { %1871 = vmatpush.bf16.msrb.mxu2 %v3678_v13 }
 0x1f9   :  { %v801_v37 = vadd.f32 %v800_v28, %v712_v38  ;;  %v980_v29 = vpop.f32.mrf.mxu1  ;;  %v1045_v21 = vmax.f32 %v979_v23, 0.0 }
 0x1fb   :  { %v1044_v52 = vmax.f32 %v801_v37, 0.0 }
 0x1fc   :  { %v891_v15 = vpop.f32.mrf.mxu0 }
 0x1fd   :  { %v892_v33 = vadd.f32 %v891_v15, %v4560_v60 }
 0x1fe   :  { %v713_v48 = vpop.f32.mrf.mxu2 }
 0x1ff   :  { %v981_v11 = vadd.f32 %v980_v29, %v892_v33  ;;  %v714_v59 = vadd.f32 %v713_v48, %v4562_v61  ;;  %v802_v45 = vpop.f32.mrf.mxu3  ;;  %v4940_v33 = vld [vmem:[%s5812_s10 + $0x18] sm:$0xff] }
 0x200   :  { %2180 = vmatpush.bf16.msrb.mxu0 %v4940_v33 }
 0x201   :  { %v1047_v17 = vmax.f32 %v981_v11, 0.0  ;;  %v803_v41 = vadd.f32 %v802_v45, %v714_v59  ;;  %v983_v5 = vpop.f32.mrf.mxu1 }
 0x203   :  { %v1046_v42 = vmax.f32 %v803_v41, 0.0  ;;  %1325 = vmatmul.bf16.gmra.mxu2 %v4767_v27  ;;  %v4900_v46 = vpack.c.bf16 %v1047_v17, %v1045_v21 }
 0x204   :  { %1414 = vmatmul.bf16.gmra.mxu3 %v4759_v18  ;;  %1592 = vmatmul.bf16.gmra.mxu1 %v4759_v18  ;;  %v894_v49 = vpop.f32.mrf.mxu0 }
 0x205   :  { %v895_v54 = vadd.f32 %v894_v49, %v4560_v60  ;;  %v4905_v4 = vpack.c.bf16 %v1046_v42, %v1044_v52 }
 0x206   :  { %v716_v30 = vpop.f32.mrf.mxu2 }
 0x207   :  { %v984_v58 = vadd.f32 %v983_v5, %v895_v54  ;;  %v717_v62 = vadd.f32 %v716_v30, %v4562_v61  ;;  %v805_v1 = vpop.f32.mrf.mxu3  ;;  %1503 = vmatmul.bf16.gmra.mxu0 %v4767_v27 }
 0x209   :  { %v806_v50 = vadd.f32 %v805_v1, %v717_v62  ;;  %v985_v63 = vpop.f32.mrf.mxu1  ;;  %v1049_v27 = vmax.f32 %v984_v58, 0.0 }
 0x20b   :  { %v1048_v12 = vmax.f32 %v806_v50, 0.0 }
 0x20c   :  { %v896_v19 = vpop.f32.mrf.mxu0 }
 0x20d   :  { %v897_v18 = vadd.f32 %v896_v19, %v4560_v60  ;;  %v4920_v60 = vperm.slane %v1116_v36, 0 }
 0x20e   :  { %v718_v44 = vpop.f32.mrf.mxu2 }
 0x20f   :  { %v986_v25 = vadd.f32 %v985_v63, %v897_v18  ;;  %v719_v6 = vadd.f32 %v718_v44, %v4562_v61  ;;  %v807_v10 = vpop.f32.mrf.mxu3  ;;  %v3702_v44 = vld [vmem:[%s5812_s10 + $0x50] sm:$0xff] }
 0x210   :  { %2270 = vmatpush.bf16.msrb.mxu1 %v3702_v44 }
 0x211   :  { %v1051_v53 = vmax.f32 %v986_v25, 0.0  ;;  %v808_v8 = vadd.f32 %v807_v10, %v719_v6  ;;  %v1558_v9 = vpop.f32.mrf.mxu1 }
 0x213   :  { %v1050_v14 = vmax.f32 %v808_v8, 0.0  ;;  %1330 = vmatmul.bf16.gmra.mxu2 %v4788_v57  ;;  %v4922_v35 = vpack.c.bf16 %v1051_v53, %v1049_v27 }
 0x214   :  { %1419 = vmatmul.bf16.gmra.mxu3 %v4783_v43  ;;  %1597 = vmatmul.bf16.gmra.mxu1 %v4783_v43  ;;  %v1469_v61 = vpop.f32.mrf.mxu0  ;;  %v3687_v43 = vld [vmem:[%s5810_s8 + $0x58] sm:$0xff] }
 0x215   :  { %v1470_v16 = vadd.f32 %v1469_v61, %v4917_v55  ;;  %v4930_v23 = vpack.c.bf16 %v1050_v14, %v1048_v12  ;;  %1959 = vmatpush.bf16.msrb.mxu3 %v3687_v43 }
 0x216   :  { %v1291_v38 = vpop.f32.mrf.mxu2 }
 0x217   :  { %v1559_v28 = vadd.f32 %v1558_v9, %v1470_v16  ;;  %v1292_v37 = vadd.f32 %v1291_v38, %v4920_v60  ;;  %v1380_v29 = vpop.f32.mrf.mxu3  ;;  %1508 = vmatmul.bf16.gmra.mxu0 %v4788_v57  ;;  %v3677_v16 = vld [vmem:[%s5810_s8 + $0x8] sm:$0xff] }
 0x218   :  { %1872 = vmatpush.bf16.msrb.mxu2 %v3677_v16 }
 0x219   :  { %v1381_v31 = vadd.f32 %v1380_v29, %v1292_v37  ;;  %v1560_v15 = vpop.f32.mrf.mxu1  ;;  %v1639_v17 = vmax.f32 %v1559_v28, 0.0 }
 0x21b   :  { %v1638_v42 = vmax.f32 %v1381_v31, 0.0 }
 0x21c   :  { %v1471_v48 = vpop.f32.mrf.mxu0 }
 0x21d   :  { %v1472_v11 = vadd.f32 %v1471_v48, %v4917_v55 }
 0x21e   :  { %v1293_v59 = vpop.f32.mrf.mxu2 }
 0x21f   :  { %v1561_v45 = vadd.f32 %v1560_v15, %v1472_v11  ;;  %v1294_v57 = vadd.f32 %v1293_v59, %v4920_v60  ;;  %v1382_v21 = vpop.f32.mrf.mxu3  ;;  %v4979_v11 = vld [vmem:[%s5812_s10 + $0x10] sm:$0xff] }
 0x220   :  { %2181 = vmatpush.bf16.msrb.mxu0 %v4979_v11 }
 0x221   :  { %v1641_v41 = vmax.f32 %v1561_v45, 0.0  ;;  %v1383_v5 = vadd.f32 %v1382_v21, %v1294_v57  ;;  %v1563_v52 = vpop.f32.mrf.mxu1 }
 0x223   :  { %v4945_v49 = vpack.c.bf16 %v1641_v41, %v1639_v17  ;;  %v1640_v54 = vmax.f32 %v1383_v5, 0.0  ;;  %1335 = vmatmul.bf16.gmra.mxu2 %v4806_v20 }
 0x224   :  { %1424 = vmatmul.bf16.gmra.mxu3 %v4798_v26  ;;  %1602 = vmatmul.bf16.gmra.mxu1 %v4798_v26  ;;  %v1474_v30 = vpop.f32.mrf.mxu0 }
 0x225   :  { %v4950_v58 = vpack.c.bf16 %v1640_v54, %v1638_v42  ;;  %v1475_v62 = vadd.f32 %v1474_v30, %v4917_v55 }
 0x226   :  { %v1296_v1 = vpop.f32.mrf.mxu2 }
 0x227   :  { %v1564_v50 = vadd.f32 %v1563_v52, %v1475_v62  ;;  %v1297_v63 = vadd.f32 %v1296_v1, %v4920_v60  ;;  %v1385_v3 = vpop.f32.mrf.mxu3  ;;  %1513 = vmatmul.bf16.gmra.mxu0 %v4806_v20 }
 0x229   :  { %v1386_v19 = vadd.f32 %v1385_v3, %v1297_v63  ;;  %v1565_v18 = vpop.f32.mrf.mxu1  ;;  %v1643_v53 = vmax.f32 %v1564_v50, 0.0 }
 0x22b   :  { %v1642_v20 = vmax.f32 %v1386_v19, 0.0 }
 0x22c   :  { %v1476_v36 = vpop.f32.mrf.mxu0 }
 0x22d   :  { %v1477_v26 = vadd.f32 %v1476_v36, %v4917_v55 }
 0x22e   :  { %v1298_v25 = vpop.f32.mrf.mxu2 }
 0x22f   :  { %v1566_v6 = vadd.f32 %v1565_v18, %v1477_v26  ;;  %v1299_v10 = vadd.f32 %v1298_v25, %v4920_v60  ;;  %v1387_v27 = vpop.f32.mrf.mxu3  ;;  %v3701_v25 = vld [vmem:[%s5812_s10 + $0x48] sm:$0xff] }
 0x230   :  { %2271 = vmatpush.bf16.msrb.mxu1 %v3701_v25 }
 0x231   :  { %v1645_v8 = vmax.f32 %v1566_v6, 0.0  ;;  %v1388_v9 = vadd.f32 %v1387_v27, %v1299_v10  ;;  %v1568_v12 = vpop.f32.mrf.mxu1 }
 0x233   :  { %v1644_v14 = vmax.f32 %v1388_v9, 0.0  ;;  %1340 = vmatmul.bf16.gmra.mxu2 %v4827_v34  ;;  %v4961_v61 = vpack.c.bf16 %v1645_v8, %v1643_v53 }
 0x234   :  { %1429 = vmatmul.bf16.gmra.mxu3 %v4822_v51  ;;  %1607 = vmatmul.bf16.gmra.mxu1 %v4822_v51  ;;  %v1479_v13 = vpop.f32.mrf.mxu0  ;;  %v3686_v51 = vld [vmem:[%s5810_s8 + $0x50] sm:$0xff] }
 0x235   :  { %v1480_v38 = vadd.f32 %v1479_v13, %v4917_v55  ;;  %v4969_v28 = vpack.c.bf16 %v1644_v14, %v1642_v20  ;;  %1960 = vmatpush.bf16.msrb.mxu3 %v3686_v51 }
 0x236   :  { %v1301_v37 = vpop.f32.mrf.mxu2 }
 0x237   :  { %v1569_v29 = vadd.f32 %v1568_v12, %v1480_v38  ;;  %v1302_v31 = vadd.f32 %v1301_v37, %v4920_v60  ;;  %v1390_v15 = vpop.f32.mrf.mxu3  ;;  %1518 = vmatmul.bf16.gmra.mxu0 %v4827_v34  ;;  %v3676_v37 = vld [vmem:[%s5810_s8] sm:$0xff] }
 0x238   :  { %1873 = vmatpush.bf16.msrb.mxu2 %v3676_v37 }
 0x239   :  { %v1391_v43 = vadd.f32 %v1390_v15, %v1302_v31  ;;  %v1570_v48 = vpop.f32.mrf.mxu1  ;;  %v1647_v41 = vmax.f32 %v1569_v29, 0.0 }
 0x23b   :  { %v1646_v54 = vmax.f32 %v1391_v43, 0.0 }
 0x23c   :  { %v1481_v59 = vpop.f32.mrf.mxu0  ;;  %3710 = vmatpush.bf16.msra.mxu2 %v4777_v39 }
 0x23d   :  { %v1482_v45 = vadd.f32 %v1481_v59, %v4917_v55 }
 0x23e   :  { %v1303_v57 = vpop.f32.mrf.mxu2 }
 0x23f   :  { %v1571_v21 = vadd.f32 %v1570_v48, %v1482_v45  ;;  %v1304_v34 = vadd.f32 %v1303_v57, %v4920_v60  ;;  %v1392_v17 = vpop.f32.mrf.mxu3  ;;  %v3685_v45 = vld [vmem:[%s5810_s8 + $0x48] sm:$0xff] }
 0x240   :  { %1961 = vmatpush.bf16.msrb.mxu3 %v3685_v45  ;;  %v3693_v57 = vld [vmem:[%s5812_s10 + $0x8] sm:$0xff]  ;;  %3711 = vmatpush.bf16.msra.mxu2 %v4816_v32 }
 0x241   :  { %v1649_v5 = vmax.f32 %v1571_v21, 0.0  ;;  %v1393_v52 = vadd.f32 %v1392_v17, %v1304_v34  ;;  %v1573_v42 = vpop.f32.mrf.mxu1  ;;  %2182 = vmatpush.bf16.msrb.mxu0 %v3693_v57 }
 0x243   :  { %v1648_v30 = vmax.f32 %v1393_v52, 0.0  ;;  %1345 = vmatmul.bf16.gmra.mxu2 %v4845_v24  ;;  %v4985_v62 = vpack.c.bf16 %v1649_v5, %v1647_v41 }
 0x244   :  { %1434 = vmatmul.bf16.gmra.mxu3 %v4837_v7  ;;  %1612 = vmatmul.bf16.gmra.mxu1 %v4837_v7  ;;  %v1484_v1 = vpop.f32.mrf.mxu0 }
 0x245   :  { %v1485_v50 = vadd.f32 %v1484_v1, %v4917_v55  ;;  %v4990_v63 = vpack.c.bf16 %v1648_v30, %v1646_v54  ;;  %3712 = vmatpush.bf16.msra.mxu2 %v4855_v22 }
 0x246   :  { %v1306_v3 = vpop.f32.mrf.mxu2 }
 0x247   :  { %v1574_v19 = vadd.f32 %v1573_v42, %v1485_v50  ;;  %v1307_v18 = vadd.f32 %v1306_v3, %v4920_v60  ;;  %v1395_v44 = vpop.f32.mrf.mxu3  ;;  %1523 = vmatmul.bf16.gmra.mxu0 %v4845_v24 }
 0x249   :  { %v1396_v36 = vadd.f32 %v1395_v44, %v1307_v18  ;;  %v1575_v26 = vpop.f32.mrf.mxu1  ;;  %v1651_v9 = vmax.f32 %v1574_v19, 0.0  ;;  %3713 = vmatpush.bf16.msra.mxu2 %v4894_v40 }
 0x24b   :  { %v1650_v24 = vmax.f32 %v1396_v36, 0.0 }
 0x24c   :  { %v1486_v6 = vpop.f32.mrf.mxu0 }
 0x24d   :  { %v1487_v7 = vadd.f32 %v1486_v6, %v4917_v55  ;;  %3714 = vmatpush.bf16.msra.mxu2 %v4940_v33 }
 0x24e   :  { %v1308_v10 = vpop.f32.mrf.mxu2 }
 0x24f   :  { %v1576_v27 = vadd.f32 %v1575_v26, %v1487_v7  ;;  %v1309_v53 = vadd.f32 %v1308_v10, %v4920_v60  ;;  %v1397_v8 = vpop.f32.mrf.mxu3 }
 0x251   :  { %v1653_v12 = vmax.f32 %v1576_v27, 0.0  ;;  %v1398_v20 = vadd.f32 %v1397_v8, %v1309_v53  ;;  %v1578_v14 = vpop.f32.mrf.mxu1  ;;  %3715 = vmatpush.bf16.msra.mxu2 %v4979_v11  ;;  %v3692_v11 = vld [vmem:[%s5812_s10] sm:$0xff] }
 0x252   :  { %2183 = vmatpush.bf16.msrb.mxu0 %v3692_v11 }
 0x253   :  { %v1652_v13 = vmax.f32 %v1398_v20, 0.0  ;;  %1350 = vmatmul.bf16.gmra.mxu2 %v4866_v56  ;;  %v5000_v16 = vpack.c.bf16 %v1653_v12, %v1651_v9 }
 0x254   :  { %1439 = vmatmul.bf16.gmra.mxu3 %v4861_v47  ;;  %1617 = vmatmul.bf16.gmra.mxu1 %v4861_v47  ;;  %v1489_v38 = vpop.f32.mrf.mxu0 }
 0x255   :  { %v1490_v29 = vadd.f32 %v1489_v38, %v4917_v55  ;;  %v5008_v31 = vpack.c.bf16 %v1652_v13, %v1650_v24  ;;  %3716 = vmatpush.bf16.msra.mxu2 %v3693_v57 }
 0x256   :  { %v1311_v15 = vpop.f32.mrf.mxu2 }
 0x257   :  { %v1579_v43 = vadd.f32 %v1578_v14, %v1490_v29  ;;  %v1312_v48 = vadd.f32 %v1311_v15, %v4920_v60  ;;  %v1400_v51 = vpop.f32.mrf.mxu3  ;;  %1528 = vmatmul.bf16.gmra.mxu0 %v4866_v56 }
 0x259   :  { %v1401_v47 = vadd.f32 %v1400_v51, %v1312_v48  ;;  %v1580_v59 = vpop.f32.mrf.mxu1  ;;  %v1655_v5 = vmax.f32 %v1579_v43, 0.0  ;;  %3717 = vmatpush.bf16.msra.mxu2 %v3692_v11 }
 0x25b   :  { %v1654_v30 = vmax.f32 %v1401_v47, 0.0 }
 0x25c   :  { %v1491_v21 = vpop.f32.mrf.mxu0 }
 0x25d   :  { %v1492_v34 = vadd.f32 %v1491_v21, %v4917_v55 }
 0x25e   :  { %v1313_v56 = vpop.f32.mrf.mxu2 }
 0x25f   :  { %v1581_v17 = vadd.f32 %v1580_v59, %v1492_v34  ;;  %v1314_v39 = vadd.f32 %v1313_v56, %v4920_v60  ;;  %v1402_v41 = vpop.f32.mrf.mxu3 }
 0x261   :  { %v1657_v52 = vmax.f32 %v1581_v17, 0.0  ;;  %v1403_v42 = vadd.f32 %v1402_v41, %v1314_v39  ;;  %v1583_v54 = vpop.f32.mrf.mxu1 }
 0x263   :  { %v1656_v1 = vmax.f32 %v1403_v42, 0.0  ;;  %1355 = vmatmul.bf16.gmra.mxu2 %v4884_v2  ;;  %v5024_v32 = vpack.c.bf16 %v1657_v52, %v1655_v5 }
 0x264   :  { %1444 = vmatmul.bf16.gmra.mxu3 %v4876_v0  ;;  %1622 = vmatmul.bf16.gmra.mxu1 %v4876_v0  ;;  %v1494_v50 = vpop.f32.mrf.mxu0  ;;  %v3700_v0 = vld [vmem:[%s5812_s10 + $0x40] sm:$0xff] }
 0x265   :  { %v1495_v3 = vadd.f32 %v1494_v50, %v4917_v55  ;;  %v5029_v19 = vpack.c.bf16 %v1656_v1, %v1654_v30  ;;  %2272 = vmatpush.bf16.msrb.mxu1 %v3700_v0 }
 0x266   :  { %v1316_v22 = vpop.f32.mrf.mxu2 }
 0x267   :  { %v1584_v18 = vadd.f32 %v1583_v54, %v1495_v3  ;;  %v1317_v44 = vadd.f32 %v1316_v22, %v4920_v60  ;;  %v1405_v36 = vpop.f32.mrf.mxu3  ;;  %1533 = vmatmul.bf16.gmra.mxu0 %v4884_v2  ;;  %v3684_v2 = vld [vmem:[%s5810_s8 + $0x40] sm:$0xff] }
 0x268   :  { %1962 = vmatpush.bf16.msrb.mxu3 %v3684_v2 }
 0x269   :  { %v1406_v26 = vadd.f32 %v1405_v36, %v1317_v44  ;;  %v1585_v25 = vpop.f32.mrf.mxu1  ;;  %v1659_v33 = vmax.f32 %v1584_v18, 0.0 }
 0x26b   :  { %v1658_v20 = vmax.f32 %v1406_v26, 0.0 }
 0x26c   :  { %v1496_v6 = vpop.f32.mrf.mxu0 }
 0x26d   :  { %v1497_v7 = vadd.f32 %v1496_v6, %v4917_v55 }
 0x26e   :  { %v1318_v40 = vpop.f32.mrf.mxu2 }
 0x26f   :  { %v1586_v10 = vadd.f32 %v1585_v25, %v1497_v7  ;;  %v1319_v27 = vadd.f32 %v1318_v40, %v4920_v60  ;;  %v1407_v53 = vpop.f32.mrf.mxu3 }
 0x271   :  { %v1661_v8 = vmax.f32 %v1586_v10, 0.0  ;;  %v1408_v9 = vadd.f32 %v1407_v53, %v1319_v27  ;;  %v1588_v12 = vpop.f32.mrf.mxu1 }
 0x273   :  { %v1660_v14 = vmax.f32 %v1408_v9, 0.0  ;;  %1360 = vmatmul.bf16.gmra.mxu2 %v4905_v4  ;;  %v5048_v24 = vpack.c.bf16 %v1661_v8, %v1659_v33 }
 0x274   :  { %1449 = vmatmul.bf16.gmra.mxu3 %v4900_v46  ;;  %1627 = vmatmul.bf16.gmra.mxu1 %v4900_v46  ;;  %v1499_v13 = vpop.f32.mrf.mxu0 }
 0x275   :  { %v1500_v38 = vadd.f32 %v1499_v13, %v4917_v55  ;;  %v5053_v37 = vpack.c.bf16 %v1660_v14, %v1658_v20 }
 0x276   :  { %v1321_v29 = vpop.f32.mrf.mxu2 }
 0x277   :  { %v1589_v15 = vadd.f32 %v1588_v12, %v1500_v38  ;;  %v1322_v43 = vadd.f32 %v1321_v29, %v4920_v60  ;;  %v1410_v48 = vpop.f32.mrf.mxu3  ;;  %1538 = vmatmul.bf16.gmra.mxu0 %v4905_v4 }
 0x279   :  { %v1411_v51 = vadd.f32 %v1410_v48, %v1322_v43  ;;  %v1590_v47 = vpop.f32.mrf.mxu1  ;;  %v1663_v56 = vmax.f32 %v1589_v15, 0.0 }
 0x27b   :  { %v1662_v5 = vmax.f32 %v1411_v51, 0.0 }
 0x27c   :  { %v1501_v59 = vpop.f32.mrf.mxu0 }
 0x27d   :  { %v1502_v45 = vadd.f32 %v1501_v59, %v4917_v55 }
 0x27e   :  { %v1323_v46 = vpop.f32.mrf.mxu2 }
 0x27f   :  { %v1591_v57 = vadd.f32 %v1590_v47, %v1502_v45  ;;  %v1324_v21 = vadd.f32 %v1323_v46, %v4920_v60  ;;  %v1412_v34 = vpop.f32.mrf.mxu3 }
 0x281   :  { %v1665_v17 = vmax.f32 %v1591_v57, 0.0  ;;  %v1413_v39 = vadd.f32 %v1412_v34, %v1324_v21  ;;  %v1593_v41 = vpop.f32.mrf.mxu1 }
 0x283   :  { %v1664_v52 = vmax.f32 %v1413_v39, 0.0  ;;  %1365 = vmatmul.bf16.gmra.mxu2 %v4930_v23  ;;  %v5060_v42 = vpack.c.bf16 %v1665_v17, %v1663_v56 }
 0x284   :  { %1454 = vmatmul.bf16.gmra.mxu3 %v4922_v35  ;;  %1632 = vmatmul.bf16.gmra.mxu1 %v4922_v35  ;;  %v1504_v4 = vpop.f32.mrf.mxu0 }
 0x285   :  { %v1505_v54 = vadd.f32 %v1504_v4, %v4917_v55  ;;  %v5065_v30 = vpack.c.bf16 %v1664_v52, %v1662_v5 }
 0x286   :  { %v1326_v1 = vpop.f32.mrf.mxu2 }
 0x287   :  { %v1594_v50 = vadd.f32 %v1593_v41, %v1505_v54  ;;  %v1327_v3 = vadd.f32 %v1326_v1, %v4920_v60  ;;  %v1415_v22 = vpop.f32.mrf.mxu3  ;;  %1543 = vmatmul.bf16.gmra.mxu0 %v4930_v23 }
 0x289   :  { %v1416_v18 = vadd.f32 %v1415_v22, %v1327_v3  ;;  %v1595_v44 = vpop.f32.mrf.mxu1  ;;  %v1667_v7 = vmax.f32 %v1594_v50, 0.0 }
 0x28b   :  { %v1666_v53 = vmax.f32 %v1416_v18, 0.0 }
 0x28c   :  { %v1506_v36 = vpop.f32.mrf.mxu0 }
 0x28d   :  { %v1507_v26 = vadd.f32 %v1506_v36, %v4917_v55 }
 0x28e   :  { %v1328_v25 = vpop.f32.mrf.mxu2 }
 0x28f   :  { %v1596_v0 = vadd.f32 %v1595_v44, %v1507_v26  ;;  %v1329_v35 = vadd.f32 %v1328_v25, %v4920_v60  ;;  %v1417_v6 = vpop.f32.mrf.mxu3 }
 0x291   :  { %v1669_v40 = vmax.f32 %v1596_v0, 0.0  ;;  %v1418_v10 = vadd.f32 %v1417_v6, %v1329_v35  ;;  %v1598_v27 = vpop.f32.mrf.mxu1 }
 0x293   :  { %v1668_v2 = vmax.f32 %v1418_v10, 0.0  ;;  %1874 = vmatmul.bf16.vlgmr.msrb.gmra.mxu2 %v4950_v58  ;;  %v5072_v33 = vpack.c.bf16 %v1669_v40, %v1667_v7 }
 0x294   :  { %1963 = vmatmul.bf16.vlgmr.msrb.gmra.mxu3 %v4945_v49  ;;  %2273 = vmatmul.bf16.vlgmr.msrb.gmra.mxu1 %v4945_v49  ;;  %v1509_v23 = vpop.f32.mrf.mxu0 }
 0x295   :  { %v1510_v8 = vadd.f32 %v1509_v23, %v4917_v55  ;;  %v5077_v9 = vpack.c.bf16 %v1668_v2, %v1666_v53 }
 0x296   :  { %v1331_v12 = vpop.f32.mrf.mxu2 }
 0x297   :  { %v1599_v20 = vadd.f32 %v1598_v27, %v1510_v8  ;;  %v1332_v14 = vadd.f32 %v1331_v12, %v4920_v60  ;;  %v1420_v11 = vpop.f32.mrf.mxu3  ;;  %2184 = vmatmul.bf16.vlgmr.msrb.gmra.mxu0 %v4950_v58 }
 0x299   :  { %v1421_v13 = vadd.f32 %v1420_v11, %v1332_v14  ;;  %v1600_v38 = vpop.f32.mrf.mxu1  ;;  %v1671_v47 = vmax.f32 %v1599_v20, 0.0 }
 0x29b   :  { %v1670_v57 = vmax.f32 %v1421_v13, 0.0 }
 0x29c   :  { %v1511_v29 = vpop.f32.mrf.mxu0 }
 0x29d   :  { %v1512_v15 = vadd.f32 %v1511_v29, %v4917_v55 }
 0x29e   :  { %v1333_v43 = vpop.f32.mrf.mxu2 }
 0x29f   :  { %v1601_v48 = vadd.f32 %v1600_v38, %v1512_v15  ;;  %v1334_v49 = vadd.f32 %v1333_v43, %v4920_v60  ;;  %v1422_v51 = vpop.f32.mrf.mxu3 }
 0x2a1   :  { %v1673_v59 = vmax.f32 %v1601_v48, 0.0  ;;  %v1423_v45 = vadd.f32 %v1422_v51, %v1334_v49  ;;  %v1603_v46 = vpop.f32.mrf.mxu1 }
 0x2a3   :  { %v1672_v21 = vmax.f32 %v1423_v45, 0.0  ;;  %1879 = vmatmul.bf16.gmra.mxu2 %v4969_v28  ;;  %v5084_v34 = vpack.c.bf16 %v1673_v59, %v1671_v47 }
 0x2a4   :  { %1968 = vmatmul.bf16.gmra.mxu3 %v4961_v61  ;;  %2278 = vmatmul.bf16.gmra.mxu1 %v4961_v61  ;;  %v1514_v58 = vpop.f32.mrf.mxu0 }
 0x2a5   :  { %v1515_v56 = vadd.f32 %v1514_v58, %v4917_v55  ;;  %v5089_v17 = vpack.c.bf16 %v1672_v21, %v1670_v57 }
 0x2a6   :  { %v1336_v39 = vpop.f32.mrf.mxu2 }
 0x2a7   :  { %v1604_v41 = vadd.f32 %v1603_v46, %v1515_v56  ;;  %v1337_v5 = vadd.f32 %v1336_v39, %v4920_v60  ;;  %v1425_v52 = vpop.f32.mrf.mxu3  ;;  %2189 = vmatmul.bf16.gmra.mxu0 %v4969_v28 }
 0x2a9   :  { %v1426_v4 = vadd.f32 %v1425_v52, %v1337_v5  ;;  %v1605_v54 = vpop.f32.mrf.mxu1  ;;  %v1675_v44 = vmax.f32 %v1604_v41, 0.0 }
 0x2ab   :  { %v1674_v0 = vmax.f32 %v1426_v4, 0.0 }
 0x2ac   :  { %v1516_v1 = vpop.f32.mrf.mxu0 }
 0x2ad   :  { %v1517_v50 = vadd.f32 %v1516_v1, %v4917_v55 }
 0x2ae   :  { %v1338_v3 = vpop.f32.mrf.mxu2 }
 0x2af   :  { %v1606_v22 = vadd.f32 %v1605_v54, %v1517_v50  ;;  %v1339_v61 = vadd.f32 %v1338_v3, %v4920_v60  ;;  %v1427_v18 = vpop.f32.mrf.mxu3 }
 0x2b1   :  { %v1677_v36 = vmax.f32 %v1606_v22, 0.0  ;;  %v1428_v26 = vadd.f32 %v1427_v18, %v1339_v61  ;;  %v1608_v25 = vpop.f32.mrf.mxu1 }
 0x2b3   :  { %v1676_v35 = vmax.f32 %v1428_v26, 0.0  ;;  %1884 = vmatmul.bf16.gmra.mxu2 %v4990_v63  ;;  %v5096_v6 = vpack.c.bf16 %v1677_v36, %v1675_v44 }
 0x2b4   :  { %1973 = vmatmul.bf16.gmra.mxu3 %v4985_v62  ;;  %2283 = vmatmul.bf16.gmra.mxu1 %v4985_v62  ;;  %v1519_v28 = vpop.f32.mrf.mxu0 }
 0x2b5   :  { %v1520_v7 = vadd.f32 %v1519_v28, %v4917_v55  ;;  %v5101_v40 = vpack.c.bf16 %v1676_v35, %v1674_v0 }
 0x2b6   :  { %v1341_v10 = vpop.f32.mrf.mxu2 }
 0x2b7   :  { %v1609_v27 = vadd.f32 %v1608_v25, %v1520_v7  ;;  %v1342_v53 = vadd.f32 %v1341_v10, %v4920_v60  ;;  %v1430_v2 = vpop.f32.mrf.mxu3  ;;  %2194 = vmatmul.bf16.gmra.mxu0 %v4990_v63 }
 0x2b9   :  { %v1431_v23 = vadd.f32 %v1430_v2, %v1342_v53  ;;  %v1610_v8 = vpop.f32.mrf.mxu1  ;;  %v1679_v38 = vmax.f32 %v1609_v27, 0.0 }
 0x2bb   :  { %v1678_v48 = vmax.f32 %v1431_v23, 0.0 }
 0x2bc   :  { %v1521_v12 = vpop.f32.mrf.mxu0 }
 0x2bd   :  { %v1522_v20 = vadd.f32 %v1521_v12, %v4917_v55 }
 0x2be   :  { %v1343_v14 = vpop.f32.mrf.mxu2 }
 0x2bf   :  { %v1611_v11 = vadd.f32 %v1610_v8, %v1522_v20  ;;  %v1344_v62 = vadd.f32 %v1343_v14, %v4920_v60  ;;  %v1432_v13 = vpop.f32.mrf.mxu3 }
 0x2c1   :  { %v1681_v29 = vmax.f32 %v1611_v11, 0.0  ;;  %v1433_v15 = vadd.f32 %v1432_v13, %v1344_v62  ;;  %v1613_v43 = vpop.f32.mrf.mxu1 }
 0x2c3   :  { %v1680_v49 = vmax.f32 %v1433_v15, 0.0  ;;  %1889 = vmatmul.bf16.gmra.mxu2 %v5008_v31  ;;  %v5108_v51 = vpack.c.bf16 %v1681_v29, %v1679_v38 }
 0x2c4   :  { %1978 = vmatmul.bf16.gmra.mxu3 %v5000_v16  ;;  %2288 = vmatmul.bf16.gmra.mxu1 %v5000_v16  ;;  %v1524_v63 = vpop.f32.mrf.mxu0 }
 0x2c5   :  { %v1525_v47 = vadd.f32 %v1524_v63, %v4917_v55  ;;  %v5113_v59 = vpack.c.bf16 %v1680_v49, %v1678_v48 }
 0x2c6   :  { %v1346_v45 = vpop.f32.mrf.mxu2 }
 0x2c7   :  { %v1614_v46 = vadd.f32 %v1613_v43, %v1525_v47  ;;  %v1347_v57 = vadd.f32 %v1346_v45, %v4920_v60  ;;  %v1435_v21 = vpop.f32.mrf.mxu3  ;;  %2199 = vmatmul.bf16.gmra.mxu0 %v5008_v31 }
 0x2c9   :  { %v1436_v58 = vadd.f32 %v1435_v21, %v1347_v57  ;;  %v1615_v56 = vpop.f32.mrf.mxu1  ;;  %v1683_v54 = vmax.f32 %v1614_v46, 0.0 }
 0x2cb   :  { %v1682_v22 = vmax.f32 %v1436_v58, 0.0 }
 0x2cc   :  { %v1526_v39 = vpop.f32.mrf.mxu0 }
 0x2cd   :  { %v1527_v41 = vadd.f32 %v1526_v39, %v4917_v55 }
 0x2ce   :  { %v1348_v5 = vpop.f32.mrf.mxu2 }
 0x2cf   :  { %v1616_v52 = vadd.f32 %v1615_v56, %v1527_v41  ;;  %v1349_v16 = vadd.f32 %v1348_v5, %v4920_v60  ;;  %v1437_v4 = vpop.f32.mrf.mxu3 }
 0x2d1   :  { %v1685_v1 = vmax.f32 %v1616_v52, 0.0  ;;  %v1438_v50 = vadd.f32 %v1437_v4, %v1349_v16  ;;  %v1618_v3 = vpop.f32.mrf.mxu1 }
 0x2d3   :  { %v1684_v61 = vmax.f32 %v1438_v50, 0.0  ;;  %1894 = vmatmul.bf16.gmra.mxu2 %v5029_v19  ;;  %v5120_v18 = vpack.c.bf16 %v1685_v1, %v1683_v54 }
 0x2d4   :  { %1983 = vmatmul.bf16.gmra.mxu3 %v5024_v32  ;;  %2293 = vmatmul.bf16.gmra.mxu1 %v5024_v32  ;;  %v1529_v31 = vpop.f32.mrf.mxu0 }
 0x2d5   :  { %v1530_v44 = vadd.f32 %v1529_v31, %v4917_v55  ;;  %v5125_v36 = vpack.c.bf16 %v1684_v61, %v1682_v22 }
 0x2d6   :  { %v1351_v26 = vpop.f32.mrf.mxu2 }
 0x2d7   :  { %v1619_v25 = vadd.f32 %v1618_v3, %v1530_v44  ;;  %v1352_v0 = vadd.f32 %v1351_v26, %v4920_v60  ;;  %v1440_v35 = vpop.f32.mrf.mxu3  ;;  %2204 = vmatmul.bf16.gmra.mxu0 %v5029_v19 }
 0x2d9   :  { %v1441_v28 = vadd.f32 %v1440_v35, %v1352_v0  ;;  %v1620_v7 = vpop.f32.mrf.mxu1  ;;  %v1687_v8 = vmax.f32 %v1619_v25, 0.0 }
 0x2db   :  { %v1686_v11 = vmax.f32 %v1441_v28, 0.0 }
 0x2dc   :  { %v1531_v10 = vpop.f32.mrf.mxu0 }
 0x2dd   :  { %v1532_v27 = vadd.f32 %v1531_v10, %v4917_v55 }
 0x2de   :  { %v1353_v53 = vpop.f32.mrf.mxu2 }
 0x2df   :  { %v1621_v2 = vadd.f32 %v1620_v7, %v1532_v27  ;;  %v1354_v32 = vadd.f32 %v1353_v53, %v4920_v60  ;;  %v1442_v23 = vpop.f32.mrf.mxu3 }
 0x2e1   :  { %v1689_v12 = vmax.f32 %v1621_v2, 0.0  ;;  %v1443_v20 = vadd.f32 %v1442_v23, %v1354_v32  ;;  %v1623_v14 = vpop.f32.mrf.mxu1 }
 0x2e3   :  { %v1688_v62 = vmax.f32 %v1443_v20, 0.0  ;;  %1899 = vmatmul.bf16.gmra.mxu2 %v5053_v37  ;;  %v5132_v13 = vpack.c.bf16 %v1689_v12, %v1687_v8 }
 0x2e4   :  { %1988 = vmatmul.bf16.gmra.mxu3 %v5048_v24  ;;  %2298 = vmatmul.bf16.gmra.mxu1 %v5048_v24  ;;  %v1534_v19 = vpop.f32.mrf.mxu0 }
 0x2e5   :  { %v1535_v38 = vadd.f32 %v1534_v19, %v4917_v55  ;;  %v5137_v29 = vpack.c.bf16 %v1688_v62, %v1686_v11 }
 0x2e6   :  { %v1356_v15 = vpop.f32.mrf.mxu2 }
 0x2e7   :  { %v1624_v43 = vadd.f32 %v1623_v14, %v1535_v38  ;;  %v1357_v48 = vadd.f32 %v1356_v15, %v4920_v60  ;;  %v1445_v49 = vpop.f32.mrf.mxu3  ;;  %2209 = vmatmul.bf16.gmra.mxu0 %v5053_v37 }
 0x2e9   :  { %v1446_v63 = vadd.f32 %v1445_v49, %v1357_v48  ;;  %v1625_v47 = vpop.f32.mrf.mxu1  ;;  %v1691_v56 = vmax.f32 %v1624_v43, 0.0 }
 0x2eb   :  { %v1690_v52 = vmax.f32 %v1446_v63, 0.0 }
 0x2ec   :  { %v1536_v45 = vpop.f32.mrf.mxu0 }
 0x2ed   :  { %v1537_v46 = vadd.f32 %v1536_v45, %v4917_v55 }
 0x2ee   :  { %v1358_v57 = vpop.f32.mrf.mxu2 }
 0x2ef   :  { %v1626_v21 = vadd.f32 %v1625_v47, %v1537_v46  ;;  %v1359_v24 = vadd.f32 %v1358_v57, %v4920_v60  ;;  %v1447_v58 = vpop.f32.mrf.mxu3 }
 0x2f1   :  { %v1693_v39 = vmax.f32 %v1626_v21, 0.0  ;;  %v1448_v41 = vadd.f32 %v1447_v58, %v1359_v24  ;;  %v1628_v5 = vpop.f32.mrf.mxu1  ;;  %v5170_v21 = vld [vmem:[%s5813_s11] ss:$0 sm:$0xff] }
 0x2f3   :  { %v1692_v16 = vmax.f32 %v1448_v41, 0.0  ;;  %1904 = vmatmul.bf16.gmra.mxu2 %v5065_v30  ;;  %v5144_v4 = vpack.c.bf16 %v1693_v39, %v1691_v56 }
 0x2f4   :  { %1993 = vmatmul.bf16.gmra.mxu3 %v5060_v42  ;;  %2303 = vmatmul.bf16.gmra.mxu1 %v5060_v42  ;;  %v1539_v37 = vpop.f32.mrf.mxu0 }
 0x2f5   :  { %v1540_v54 = vadd.f32 %v1539_v37, %v4917_v55  ;;  %v5149_v1 = vpack.c.bf16 %v1692_v16, %v1690_v52 }
 0x2f6   :  { %v1361_v50 = vpop.f32.mrf.mxu2 }
 0x2f7   :  { %v1629_v3 = vadd.f32 %v1628_v5, %v1540_v54  ;;  %v1362_v22 = vadd.f32 %v1361_v50, %v4920_v60  ;;  %v1450_v61 = vpop.f32.mrf.mxu3  ;;  %2214 = vmatmul.bf16.gmra.mxu0 %v5065_v30 }
 0x2f9   :  { %v1451_v31 = vadd.f32 %v1450_v61, %v1362_v22  ;;  %v1630_v44 = vpop.f32.mrf.mxu1  ;;  %v1695_v7 = vmax.f32 %v1629_v3, 0.0 }
 0x2fb   :  { %v1694_v2 = vmax.f32 %v1451_v31, 0.0 }
 0x2fc   :  { %v1541_v26 = vpop.f32.mrf.mxu0 }
 0x2fd   :  { %v1542_v25 = vadd.f32 %v1541_v26, %v4917_v55 }
 0x2fe   :  { %v1363_v0 = vpop.f32.mrf.mxu2 }
 0x2ff   :  { %v1631_v35 = vadd.f32 %v1630_v44, %v1542_v25  ;;  %v1364_v42 = vadd.f32 %v1363_v0, %v4920_v60  ;;  %v1452_v28 = vpop.f32.mrf.mxu3 }
 0x301   :  { %v1697_v10 = vmax.f32 %v1631_v35, 0.0  ;;  %v1453_v27 = vadd.f32 %v1452_v28, %v1364_v42  ;;  %v1633_v53 = vpop.f32.mrf.mxu1  ;;  %v2482_v42 = vld [vmem:[%s5803_s1] sm:$0xff] }
 0x303   :  { %v1696_v32 = vmax.f32 %v1453_v27, 0.0  ;;  %1909 = vmatmul.bf16.gmra.mxu2 %v5077_v9  ;;  %v5156_v23 = vpack.c.bf16 %v1697_v10, %v1695_v7 }
 0x304   :  { %1998 = vmatmul.bf16.gmra.mxu3 %v5072_v33  ;;  %2308 = vmatmul.bf16.gmra.mxu1 %v5072_v33  ;;  %v1544_v30 = vpop.f32.mrf.mxu0 }
 0x305   :  { %v1545_v8 = vadd.f32 %v1544_v30, %v4917_v55  ;;  %v5161_v12 = vpack.c.bf16 %v1696_v32, %v1694_v2 }
 0x306   :  { %v1366_v20 = vpop.f32.mrf.mxu2 }
 0x307   :  { %v1634_v14 = vadd.f32 %v1633_v53, %v1545_v8  ;;  %v1367_v11 = vadd.f32 %v1366_v20, %v4920_v60  ;;  %v1455_v62 = vpop.f32.mrf.mxu3  ;;  %2219 = vmatmul.bf16.gmra.mxu0 %v5077_v9 }
 0x309   :  { %v1456_v19 = vadd.f32 %v1455_v62, %v1367_v11  ;;  %v1635_v38 = vpop.f32.mrf.mxu1  ;;  %v1699_v47 = vmax.f32 %v1634_v14, 0.0 }
 0x30b   :  { %v1698_v9 = vmax.f32 %v1456_v19, 0.0  ;;  %v2483_v19 = vld [vmem:[%s5803_s1 + $0x8] sm:$0xff] }
 0x30c   :  { %v1546_v15 = vpop.f32.mrf.mxu0 }
 0x30d   :  { %v1547_v43 = vadd.f32 %v1546_v15, %v4917_v55 }
 0x30e   :  { %v1368_v48 = vpop.f32.mrf.mxu2 }
 0x30f   :  { %v1636_v49 = vadd.f32 %v1635_v38, %v1547_v43  ;;  %v1369_v33 = vadd.f32 %v1368_v48, %v4920_v60  ;;  %v1457_v63 = vpop.f32.mrf.mxu3 }
 0x311   :  { %v1701_v45 = vmax.f32 %v1636_v49, 0.0  ;;  %v1458_v46 = vadd.f32 %v1457_v63, %v1369_v33  ;;  %v2274_v57 = vpop.f32.mrf.mxu1 }
 0x313   :  { %v1700_v24 = vmax.f32 %v1458_v46, 0.0  ;;  %1914 = vmatmul.bf16.gmra.mxu2 %v5089_v17  ;;  %v5173_v58 = vpack.c.bf16 %v1701_v45, %v1699_v47 }
 0x314   :  { %2003 = vmatmul.bf16.gmra.mxu3 %v5084_v34  ;;  %2313 = vmatmul.bf16.gmra.mxu1 %v5084_v34  ;;  %v2185_v55 = vpop.f32.mrf.mxu0  ;;  %v5188_v34 = vld [vmem:[%s5811_s9] ss:$0 sm:$0xff] }
 0x315   :  { %v2186_v60 = vadd.f32 %v5170_v21, %v2185_v55  ;;  %v5178_v56 = vpack.c.bf16 %v1700_v24, %v1698_v9  ;;  %v2610_v55 = vmul.f32 -0.5, %v2482_v42 }
 0x316   :  { %v1875_v39 = vpop.f32.mrf.mxu2 }
 0x317   :  { %v2275_v41 = vadd.f32 %v2274_v57, %v2186_v60  ;;  %v1964_v5 = vpop.f32.mrf.mxu3  ;;  %2224 = vmatmul.bf16.gmra.mxu0 %v5089_v17  ;;  %v1876_v26 = vadd.f32 %v5188_v34, %v1875_v39 }
 0x319   :  { %v2354_v52 = vmax.f32 %v2275_v41, -20.0  ;;  %v2276_v16 = vpop.f32.mrf.mxu1  ;;  %v1965_v10 = vadd.f32 %v1964_v5, %v1876_v26  ;;  %v5223_v5 = vld [vmem:[%s5803_s1 + $0x10] sm:$0xff] }
 0x31b   :  { %v5181_v37 = vmin.f32 %v2354_v52, 2.0 }
 0x31c   :  { %v2187_v54 = vpop.f32.mrf.mxu0 }
 0x31d   :  { %v2418_v50 = vmul.f32 1.442695, %v5181_v37  ;;  %v2188_v3 = vadd.f32 %v5170_v21, %v2187_v54 }
 0x31e   :  { %v1877_v22 = vpop.f32.mrf.mxu2 }
 0x31f   :  { %3721 = vpow2.f32 %v2418_v50  ;;  %v2277_v61 = vadd.f32 %v2276_v16, %v2188_v3  ;;  %v1966_v31 = vpop.f32.mrf.mxu3  ;;  %v1878_v20 = vadd.f32 %v5188_v34, %v1877_v22 }
 0x321   :  { %v2355_v44 = vmax.f32 %v2277_v61, -20.0  ;;  %v2279_v17 = vpop.f32.mrf.mxu1 }
 0x323   :  { %v5191_v25 = vmin.f32 %v2355_v44, 2.0  ;;  %1919 = vmatmul.bf16.gmra.mxu2 %v5101_v40 }
 0x324   :  { %2008 = vmatmul.bf16.gmra.mxu3 %v5096_v6  ;;  %2318 = vmatmul.bf16.gmra.mxu1 %v5096_v6  ;;  %v2190_v0 = vpop.f32.mrf.mxu0 }
 0x325   :  { %v3722_v35 = vpop.eup %3721  ;;  %v2420_v28 = vmul.f32 1.442695, %v5191_v25  ;;  %v2191_v7 = vadd.f32 %v5170_v21, %v2190_v0 }
 0x326   :  { %v2514_v27 = vmul.f32 %v3722_v35, %v2482_v42  ;;  %v1880_v53 = vpop.f32.mrf.mxu2 }
 0x327   :  { %3723 = vpow2.f32 %v2420_v28  ;;  %v2280_v2 = vadd.f32 %v2279_v17, %v2191_v7  ;;  %v1969_v32 = vpop.f32.mrf.mxu3  ;;  %2229 = vmatmul.bf16.gmra.mxu0 %v5101_v40  ;;  %v1967_v40 = vadd.f32 %v1966_v31, %v1878_v20  ;;  %v1881_v9 = vadd.f32 %v5188_v34, %v1880_v53 }
 0x328   :  { %v2546_v30 = vadd.f32 %v2514_v27, %v1965_v10  ;;  %v2611_v7 = vmul.f32 -0.5, %v2483_v19 }
 0x329   :  { %v2356_v6 = vmax.f32 %v2280_v2, -20.0  ;;  %v2281_v8 = vpop.f32.mrf.mxu1  ;;  %v1970_v50 = vadd.f32 %v1969_v32, %v1881_v9  ;;  %v5240_v2 = vld [vmem:[%s5803_s1 + $0x18] sm:$0xff] }
 0x32a   :  { %3725 = vtanh.f32 %v2546_v30 }
 0x32b   :  { %v5203_v14 = vmin.f32 %v2356_v6, 2.0 }
 0x32c   :  { %v2192_v11 = vpop.f32.mrf.mxu0 }
 0x32d   :  { %v3724_v62 = vpop.eup %3723  ;;  %v2422_v38 = vmul.f32 1.442695, %v5203_v14  ;;  %v2193_v15 = vadd.f32 %v5170_v21, %v2192_v11 }
 0x32e   :  { %v2515_v43 = vmul.f32 %v3724_v62, %v2483_v19  ;;  %v1882_v48 = vpop.f32.mrf.mxu2 }
 0x32f   :  { %3727 = vpow2.f32 %v2422_v38  ;;  %v2282_v49 = vadd.f32 %v2281_v8, %v2193_v15  ;;  %v1971_v33 = vpop.f32.mrf.mxu3  ;;  %v1883_v28 = vadd.f32 %v5188_v34, %v1882_v48  ;;  %v2643_v38 = vmul.f32 %v2611_v7, %v2483_v19 }
 0x330   :  { %v3726_v63 = vpop.eup %3725  ;;  %v2547_v47 = vadd.f32 %v2515_v43, %v1967_v40 }
 0x331   :  { %3027 = vst.msk [vmem:[%s5814_s12] sm:$0xff] %vm2930_vm1, %v3726_v63  ;;  %v2357_v45 = vmax.f32 %v2282_v49, -20.0  ;;  %v2284_v46 = vpop.f32.mrf.mxu1  ;;  %v2738_v57 = vmul.f32 %v3726_v63, %v3726_v63  ;;  %v1972_v20 = vadd.f32 %v1971_v33, %v1883_v28 }
 0x332   :  { %3729 = vtanh.f32 %v2547_v47 }
 0x333   :  { %v5215_v24 = vmin.f32 %v2357_v45, 2.0  ;;  %1924 = vmatmul.bf16.gmra.mxu2 %v5113_v59  ;;  %v2770_v60 = vsub.f32 1.0, %v2738_v57 }
 0x334   :  { %2013 = vmatmul.bf16.gmra.mxu3 %v5108_v51  ;;  %2323 = vmatmul.bf16.gmra.mxu1 %v5108_v51  ;;  %v2195_v39 = vpop.f32.mrf.mxu0  ;;  %v2642_v51 = vmul.f32 %v2610_v55, %v2482_v42  ;;  %v2675_v55 = vsub.f32 %v2643_v38, %v5191_v25 }
 0x335   :  { %v3728_v41 = vpop.eup %3727  ;;  %v2424_v52 = vmul.f32 1.442695, %v5215_v24  ;;  %v2196_v16 = vadd.f32 %v5170_v21, %v2195_v39  ;;  %v2802_v54 = vadd.f32 1e-06, %v2770_v60 }
 0x336   :  { %v2516_v3 = vmul.f32 %v3728_v41, %v5223_v5  ;;  %v1885_v22 = vpop.f32.mrf.mxu2 }
 0x337   :  { %3731 = vpow2.f32 %v2424_v52  ;;  %v2285_v61 = vadd.f32 %v2284_v46, %v2196_v16  ;;  %v1974_v31 = vpop.f32.mrf.mxu3  ;;  %2234 = vmatmul.bf16.gmra.mxu0 %v5113_v59  ;;  %v2674_v59 = vsub.f32 %v2642_v51, %v5181_v37  ;;  %v1886_v19 = vadd.f32 %v5188_v34, %v1885_v22  ;;  %v5261_v52 = vld [vmem:[%s5803_s1 + $0x20] sm:$0xff] }
 0x338   :  { %v3730_v44 = vpop.eup %3729  ;;  %v2548_v17 = vadd.f32 %v2516_v3, %v1970_v50  ;;  %3733 = vlog2.f32 %v2802_v54  ;;  %v2612_v46 = vmul.f32 -0.5, %v5223_v5 }
 0x339   :  { %3028 = vst.msk [vmem:[%s5814_s12 + $0x8] sm:$0xff] %vm2930_vm1, %v3730_v44  ;;  %v2358_v26 = vmax.f32 %v2285_v61, -20.0  ;;  %v2286_v0 = vpop.f32.mrf.mxu1  ;;  %v2739_v35 = vmul.f32 %v3730_v44, %v3730_v44  ;;  %v3578_v40 = vadd.f32 -0.9189385, %v2674_v59  ;;  %v1975_v25 = vadd.f32 %v1974_v31, %v1886_v19 }
 0x33a   :  { %3735 = vtanh.f32 %v2548_v17  ;;  %v3579_v17 = vadd.f32 -0.9189385, %v2675_v55  ;;  %v2614_v55 = vmul.f32 -0.5, %v5261_v52 }
 0x33b   :  { %v5234_v10 = vmin.f32 %v2358_v26, 2.0  ;;  %v2771_v42 = vsub.f32 1.0, %v2739_v35 }
 0x33c   :  { %v2197_v27 = vpop.f32.mrf.mxu0 }
 0x33d   :  { %v3732_v53 = vpop.eup %3731  ;;  %v2426_v32 = vmul.f32 1.442695, %v5234_v10  ;;  %v2198_v30 = vadd.f32 %v5170_v21, %v2197_v27  ;;  %v2803_v6 = vadd.f32 1e-06, %v2771_v42  ;;  %v2613_v42 = vmul.f32 -0.5, %v5240_v2 }
 0x33e   :  { %v3734_v8 = vpop.eup %3733  ;;  %v2517_v11 = vmul.f32 %v3732_v53, %v5240_v2  ;;  %v1887_v62 = vpop.f32.mrf.mxu2 }
 0x33f   :  { %3737 = vpow2.f32 %v2426_v32  ;;  %v2287_v37 = vadd.f32 %v2286_v0, %v2198_v30  ;;  %v1976_v15 = vpop.f32.mrf.mxu3  ;;  %v2835_v43 = vmul.f32 0.6931472, %v3734_v8  ;;  %v5281_v8 = vld [vmem:[%s5803_s1 + $0x28] sm:$0xff] }
 0x340   :  { %v3736_v48 = vpop.eup %3735  ;;  %v2549_v49 = vadd.f32 %v2517_v11, %v1972_v20  ;;  %3739 = vlog2.f32 %v2803_v6 }
 0x341   :  { %3029 = vst.msk [vmem:[%s5814_s12 + $0x10] sm:$0xff] %vm2930_vm1, %v3736_v48  ;;  %v2359_v63 = vmax.f32 %v2287_v37, -20.0  ;;  %v2289_v47 = vpop.f32.mrf.mxu1  ;;  %v2898_v33 = vsub.f32 %v3578_v40, %v2835_v43  ;;  %v2740_v45 = vmul.f32 %v3736_v48, %v3736_v48 }
 0x342   :  { %3741 = vtanh.f32 %v2549_v49 }
 0x343   :  { %v5251_v57 = vmin.f32 %v2359_v63, 2.0  ;;  %1929 = vmatmul.bf16.gmra.mxu2 %v5125_v36  ;;  %v2931_v9 = vsel %vm2930_vm1, %v2898_v33, 0.0  ;;  %v2772_v60 = vsub.f32 1.0, %v2740_v45 }
 0x344   :  { %2018 = vmatmul.bf16.gmra.mxu3 %v5120_v18  ;;  %2328 = vmatmul.bf16.gmra.mxu1 %v5120_v18  ;;  %v2200_v39 = vpop.f32.mrf.mxu0  ;;  %v2644_v18 = vmul.f32 %v2612_v46, %v5223_v5  ;;  %v1888_v5 = vadd.f32 %v5188_v34, %v1887_v62 }
 0x345   :  { %v3738_v41 = vpop.eup %3737  ;;  %v2428_v16 = vmul.f32 1.442695, %v5251_v57  ;;  %2932 = vadd.xlane.f32.xlu0 %v2931_v9  ;;  %v2201_v54 = vadd.f32 %v5170_v21, %v2200_v39  ;;  %v2804_v50 = vadd.f32 1e-06, %v2772_v60 }
 0x346   :  { %v3740_v3 = vpop.eup %3739  ;;  %v2518_v22 = vmul.f32 %v3738_v41, %v5261_v52  ;;  %v1890_v61 = vpop.f32.mrf.mxu2  ;;  %v2676_v53 = vsub.f32 %v2644_v18, %v5203_v14  ;;  %v1977_v37 = vadd.f32 %v1976_v15, %v1888_v5  ;;  %v2645_v14 = vmul.f32 %v2613_v42, %v5240_v2 }
 0x347   :  { %3743 = vpow2.f32 %v2428_v16  ;;  %v2290_v51 = vadd.f32 %v2289_v47, %v2201_v54  ;;  %v1979_v44 = vpop.f32.mrf.mxu3  ;;  %2239 = vmatmul.bf16.gmra.mxu0 %v5125_v36  ;;  %v2837_v26 = vmul.f32 0.6931472, %v3740_v3  ;;  %v1891_v2 = vadd.f32 %v5188_v34, %v1890_v61  ;;  %v5303_v3 = vld [vmem:[%s5803_s1 + $0x30] sm:$0xff] }
 0x348   :  { %v3742_v0 = vpop.eup %3741  ;;  %v2550_v35 = vadd.f32 %v2518_v22, %v1975_v25  ;;  %3745 = vlog2.f32 %v2804_v50  ;;  %v3580_v63 = vadd.f32 -0.9189385, %v2676_v53  ;;  %v2677_v41 = vsub.f32 %v2645_v14, %v5215_v24 }
 0x349   :  { %3030 = vst.msk [vmem:[%s5814_s12 + $0x18] sm:$0xff] %vm2930_vm1, %v3742_v0  ;;  %v2360_v31 = vmax.f32 %v2290_v51, -20.0  ;;  %v2291_v28 = vpop.f32.mrf.mxu1  ;;  %v2899_v7 = vsub.f32 %v3579_v17, %v2837_v26  ;;  %v2741_v59 = vmul.f32 %v3742_v0, %v3742_v0  ;;  %v1980_v24 = vadd.f32 %v1979_v44, %v1891_v2 }
 0x34a   :  { %3747 = vtanh.f32 %v2550_v35  ;;  %v3581_v35 = vadd.f32 -0.9189385, %v2677_v41 }
 0x34b   :  { %v5274_v36 = vmin.f32 %v2360_v31, 2.0  ;;  %v2934_v27 = vsel %vm2930_vm1, %v2899_v7, 0.0  ;;  %v2773_v32 = vsub.f32 1.0, %v2741_v59 }
 0x34c   :  { %v2202_v30 = vpop.f32.mrf.mxu0 }
 0x34d   :  { %v3744_v6 = vpop.eup %3743  ;;  %v2430_v20 = vmul.f32 1.442695, %v5274_v36  ;;  %2935 = vadd.xlane.f32.xlu0 %v2934_v27  ;;  %v2203_v11 = vadd.f32 %v5170_v21, %v2202_v30  ;;  %v2805_v62 = vadd.f32 1e-06, %v2773_v32  ;;  %v2615_v27 = vmul.f32 -0.5, %v5281_v8 }
 0x34e   :  { %v3746_v38 = vpop.eup %3745  ;;  %v2519_v40 = vmul.f32 %v3744_v6, %v5281_v8  ;;  %v1892_v43 = vpop.f32.mrf.mxu2 }
 0x34f   :  { %3749 = vpow2.f32 %v2430_v20  ;;  %v2292_v48 = vadd.f32 %v2291_v28, %v2203_v11  ;;  %v1981_v49 = vpop.f32.mrf.mxu3  ;;  %v2839_v47 = vmul.f32 0.6931472, %v3746_v38  ;;  %v5323_v11 = vld [vmem:[%s5803_s1 + $0x38] sm:$0xff] }
 0x350   :  { %v3748_v33 = vpop.eup %3747  ;;  %v2551_v45 = vadd.f32 %v2519_v40, %v1977_v37  ;;  %3751 = vlog2.f32 %v2805_v62 }
 0x351   :  { %3031 = vst.msk [vmem:[%s5814_s12 + $0x20] sm:$0xff] %vm2930_vm1, %v3748_v33  ;;  %v2361_v19 = vmax.f32 %v2292_v48, -20.0  ;;  %v2294_v15 = vpop.f32.mrf.mxu1  ;;  %v2900_v46 = vsub.f32 %v3580_v63, %v2839_v47  ;;  %v2742_v9 = vmul.f32 %v3748_v33, %v3748_v33 }
 0x352   :  { %3753 = vtanh.f32 %v2551_v45 }
 0x353   :  { %v5293_v60 = vmin.f32 %v2361_v19, 2.0  ;;  %1934 = vmatmul.bf16.gmra.mxu2 %v5137_v29  ;;  %v2937_v39 = vsel %vm2930_vm1, %v2900_v46, 0.0  ;;  %v2774_v16 = vsub.f32 1.0, %v2742_v9 }
 0x354   :  { %2023 = vmatmul.bf16.gmra.mxu3 %v5132_v13  ;;  %2333 = vmatmul.bf16.gmra.mxu1 %v5132_v13  ;;  %v2205_v54 = vpop.f32.mrf.mxu0  ;;  %v2646_v13 = vmul.f32 %v2614_v55, %v5261_v52  ;;  %v1893_v52 = vadd.f32 %v5188_v34, %v1892_v43  ;;  %v2616_v55 = vmul.f32 -0.5, %v5303_v3 }
 0x355   :  { %v3750_v50 = vpop.eup %3749  ;;  %v2432_v25 = vmul.f32 1.442695, %v5293_v60  ;;  %2938 = vadd.xlane.f32.xlu1 %v2937_v39  ;;  %v2206_v22 = vadd.f32 %v5170_v21, %v2205_v54  ;;  %v2806_v61 = vadd.f32 1e-06, %v2774_v16 }
 0x356   :  { %v3752_v18 = vpop.eup %3751  ;;  %v2520_v51 = vmul.f32 %v3750_v50, %v5303_v3  ;;  %v1895_v17 = vpop.f32.mrf.mxu2  ;;  %v2678_v32 = vsub.f32 %v2646_v13, %v5234_v10  ;;  %v1982_v43 = vadd.f32 %v1981_v49, %v1893_v52  ;;  %v2647_v10 = vmul.f32 %v2615_v27, %v5281_v8 }
 0x357   :  { %3755 = vpow2.f32 %v2432_v25  ;;  %v2295_v26 = vadd.f32 %v2294_v15, %v2206_v22  ;;  %v1984_v0 = vpop.f32.mrf.mxu3  ;;  %2244 = vmatmul.bf16.gmra.mxu0 %v5137_v29  ;;  %v2841_v31 = vmul.f32 0.6931472, %v3752_v18  ;;  %v1896_v8 = vadd.f32 %v5188_v34, %v1895_v17  ;;  %v5345_v22 = vld [vmem:[%s5803_s1 + $0x40] sm:$0xff] }
 0x358   :  { %v3754_v28 = vpop.eup %3753  ;;  %v2552_v7 = vadd.f32 %v2520_v51, %v1980_v24  ;;  %3757 = vlog2.f32 %v2806_v61  ;;  %v3582_v33 = vadd.f32 -0.9189385, %v2678_v32  ;;  %v2679_v16 = vsub.f32 %v2647_v10, %v5251_v57 }
 0x359   :  { %3032 = vst.msk [vmem:[%s5814_s12 + $0x28] sm:$0xff] %vm2930_vm1, %v3754_v28  ;;  %v2362_v44 = vmax.f32 %v2295_v26, -20.0  ;;  %v2296_v59 = vpop.f32.mrf.mxu1  ;;  %v2901_v5 = vsub.f32 %v3581_v35, %v2841_v31  ;;  %v2743_v42 = vmul.f32 %v3754_v28, %v3754_v28  ;;  %v1985_v57 = vadd.f32 %v1984_v0, %v1896_v8 }
 0x35a   :  { %3759 = vtanh.f32 %v2552_v7  ;;  %v3583_v31 = vadd.f32 -0.9189385, %v2679_v16  ;;  %v2617_v52 = vmul.f32 -0.5, %v5323_v11 }
 0x35b   :  { %v5316_v29 = vmin.f32 %v2362_v44, 2.0  ;;  %v2940_v53 = vsel %vm2930_vm1, %v2901_v5, 0.0  ;;  %v2775_v30 = vsub.f32 1.0, %v2743_v42 }
 0x35c   :  { %v2207_v6 = vpop.f32.mrf.mxu0 }
 0x35d   :  { %v3756_v20 = vpop.eup %3755  ;;  %v2434_v62 = vmul.f32 1.442695, %v5316_v29  ;;  %2941 = vadd.xlane.f32.xlu1 %v2940_v53  ;;  %v2208_v38 = vadd.f32 %v5170_v21, %v2207_v6  ;;  %v2807_v37 = vadd.f32 1e-06, %v2775_v30 }
 0x35e   :  { %v3758_v40 = vpop.eup %3757  ;;  %v2521_v14 = vmul.f32 %v3756_v20, %v5323_v11  ;;  %v1897_v48 = vpop.f32.mrf.mxu2  ;;  %v5365_v20 = vld [vmem:[%s5803_s1 + $0x48] sm:$0xff] }
 0x35f   :  { %3761 = vpow2.f32 %v2434_v62  ;;  %v2297_v63 = vadd.f32 %v2296_v59, %v2208_v38  ;;  %v1986_v47 = vpop.f32.mrf.mxu3  ;;  %v2843_v45 = vmul.f32 0.6931472, %v3758_v40 }
 0x360   :  { %v3760_v19 = vpop.eup %3759  ;;  %v2553_v15 = vadd.f32 %v2521_v14, %v1982_v43  ;;  %3763 = vlog2.f32 %v2807_v37 }
 0x361   :  { %3033 = vst.msk [vmem:[%s5814_s12 + $0x30] sm:$0xff] %vm2930_vm1, %v3760_v19  ;;  %v2363_v46 = vmax.f32 %v2297_v63, -20.0  ;;  %v2299_v49 = vpop.f32.mrf.mxu1  ;;  %v2902_v9 = vsub.f32 %v3582_v33, %v2843_v45  ;;  %v2744_v2 = vmul.f32 %v3760_v19, %v3760_v19 }
 0x362   :  { %3765 = vtanh.f32 %v2553_v15 }
 0x363   :  { %v5335_v39 = vmin.f32 %v2363_v46, 2.0  ;;  %1939 = vmatmul.bf16.gmra.mxu2 %v5149_v1  ;;  %v2943_v41 = vsel %vm2930_vm1, %v2902_v9, 0.0  ;;  %v2776_v54 = vsub.f32 1.0, %v2744_v2  ;;  %v2618_v2 = vmul.f32 -0.5, %v5345_v22 }
 0x364   :  { %2028 = vmatmul.bf16.gmra.mxu3 %v5144_v4  ;;  %2338 = vmatmul.bf16.gmra.mxu1 %v5144_v4  ;;  %v2210_v50 = vpop.f32.mrf.mxu0  ;;  %v2648_v4 = vmul.f32 %v2616_v55, %v5303_v3  ;;  %v1898_v3 = vadd.f32 %v5188_v34, %v1897_v48 }
 0x365   :  { %v3762_v25 = vpop.eup %3761  ;;  %v2436_v61 = vmul.f32 1.442695, %v5335_v39  ;;  %2944 = vadd.xlane.f32.xlu2 %v2943_v41  ;;  %v2211_v18 = vadd.f32 %v5170_v21, %v2210_v50  ;;  %v2808_v24 = vadd.f32 1e-06, %v2776_v54 }
 0x366   :  { %v3764_v51 = vpop.eup %3763  ;;  %v2522_v17 = vmul.f32 %v3762_v25, %v5345_v22  ;;  %v1900_v13 = vpop.f32.mrf.mxu2  ;;  %v2680_v53 = vsub.f32 %v2648_v4, %v5274_v36  ;;  %v1987_v43 = vadd.f32 %v1986_v47, %v1898_v3  ;;  %v2649_v36 = vmul.f32 %v2617_v52, %v5323_v11  ;;  %v5387_v25 = vld [vmem:[%s5803_s1 + $0x50] sm:$0xff] }
 0x367   :  { %3767 = vpow2.f32 %v2436_v61  ;;  %v2300_v26 = vadd.f32 %v2299_v49, %v2211_v18  ;;  %v1989_v35 = vpop.f32.mrf.mxu3  ;;  %2249 = vmatmul.bf16.gmra.mxu0 %v5149_v1  ;;  %v2845_v28 = vmul.f32 0.6931472, %v3764_v51  ;;  %v1901_v11 = vadd.f32 %v5188_v34, %v1900_v13 }
 0x368   :  { %v3766_v7 = vpop.eup %3765  ;;  %v2554_v44 = vadd.f32 %v2522_v17, %v1985_v57  ;;  %3769 = vlog2.f32 %v2808_v24  ;;  %v3584_v33 = vadd.f32 -0.9189385, %v2680_v53  ;;  %v2681_v41 = vsub.f32 %v2649_v36, %v5293_v60 }
 0x369   :  { %3034 = vst.msk [vmem:[%s5814_s12 + $0x38] sm:$0xff] %vm2930_vm1, %v3766_v7  ;;  %v2364_v0 = vmax.f32 %v2300_v26, -20.0  ;;  %v2301_v59 = vpop.f32.mrf.mxu1  ;;  %v2903_v5 = vsub.f32 %v3583_v31, %v2845_v28  ;;  %v2745_v42 = vmul.f32 %v3766_v7, %v3766_v7  ;;  %v1990_v60 = vadd.f32 %v1989_v35, %v1901_v11 }
 0x36a   :  { %3771 = vtanh.f32 %v2554_v44  ;;  %v3585_v26 = vadd.f32 -0.9189385, %v2681_v41 }
 0x36b   :  { %v5358_v1 = vmin.f32 %v2364_v0, 2.0  ;;  %v2946_v27 = vsel %vm2930_vm1, %v2903_v5, 0.0  ;;  %v2777_v32 = vsub.f32 1.0, %v2745_v42  ;;  %v2619_v5 = vmul.f32 -0.5, %v5365_v20 }
 0x36c   :  { %v2212_v30 = vpop.f32.mrf.mxu0 }
 0x36d   :  { %v3768_v6 = vpop.eup %3767  ;;  %v2438_v62 = vmul.f32 1.442695, %v5358_v1  ;;  %2947 = vadd.xlane.f32.xlu2 %v2946_v27  ;;  %v2213_v38 = vadd.f32 %v5170_v21, %v2212_v30  ;;  %v2809_v37 = vadd.f32 1e-06, %v2777_v32  ;;  %v5407_v32 = vld [vmem:[%s5803_s1 + $0x58] sm:$0xff] }
 0x36e   :  { %v3770_v40 = vpop.eup %3769  ;;  %v2523_v14 = vmul.f32 %v3768_v6, %v5365_v20  ;;  %v1902_v48 = vpop.f32.mrf.mxu2 }
 0x36f   :  { %3773 = vpow2.f32 %v2438_v62  ;;  %v2302_v10 = vadd.f32 %v2301_v59, %v2213_v38  ;;  %v1991_v63 = vpop.f32.mrf.mxu3  ;;  %v2847_v45 = vmul.f32 0.6931472, %v3770_v40 }
 0x370   :  { %v3772_v19 = vpop.eup %3771  ;;  %v2555_v15 = vadd.f32 %v2523_v14, %v1987_v43  ;;  %3775 = vlog2.f32 %v2809_v37 }
 0x371   :  { %3035 = vst.msk [vmem:[%s5814_s12 + $0x40] sm:$0xff] %vm2930_vm1, %v3772_v19  ;;  %v2365_v46 = vmax.f32 %v2302_v10, -20.0  ;;  %v2304_v47 = vpop.f32.mrf.mxu1  ;;  %v2904_v49 = vsub.f32 %v3584_v33, %v2847_v45  ;;  %v2746_v9 = vmul.f32 %v3772_v19, %v3772_v19 }
 0x372   :  { %3777 = vtanh.f32 %v2555_v15 }
 0x373   :  { %v5377_v8 = vmin.f32 %v2365_v46, 2.0  ;;  %1944 = vmatmul.bf16.gmra.mxu2 %v5161_v12  ;;  %v2949_v55 = vsel %vm2930_vm1, %v2904_v49, 0.0  ;;  %v2778_v16 = vsub.f32 1.0, %v2746_v9 }
 0x374   :  { %2033 = vmatmul.bf16.gmra.mxu3 %v5156_v23  ;;  %2343 = vmatmul.bf16.gmra.mxu1 %v5156_v23  ;;  %v2215_v54 = vpop.f32.mrf.mxu0  ;;  %v2650_v23 = vmul.f32 %v2618_v2, %v5345_v22  ;;  %v1903_v22 = vadd.f32 %v5188_v34, %v1902_v48 }
 0x375   :  { %v3774_v50 = vpop.eup %3773  ;;  %v2440_v61 = vmul.f32 1.442695, %v5377_v8  ;;  %2950 = vadd.xlane.f32.xlu0 %v2949_v55  ;;  %v2216_v18 = vadd.f32 %v5170_v21, %v2215_v54  ;;  %v2810_v24 = vadd.f32 1e-06, %v2778_v16  ;;  %v5429_v16 = vld [vmem:[%s5803_s1 + $0x60] sm:$0xff] }
 0x376   :  { %v3776_v51 = vpop.eup %3775  ;;  %v2524_v57 = vmul.f32 %v3774_v50, %v5387_v25  ;;  %v1905_v17 = vpop.f32.mrf.mxu2  ;;  %v2682_v3 = vsub.f32 %v2650_v23, %v5316_v29  ;;  %v1992_v37 = vadd.f32 %v1991_v63, %v1903_v22  ;;  %v2651_v29 = vmul.f32 %v2619_v5, %v5365_v20 }
 0x377   :  { %3779 = vpow2.f32 %v2440_v61  ;;  %v2305_v13 = vadd.f32 %v2304_v47, %v2216_v18  ;;  %v1994_v4 = vpop.f32.mrf.mxu3  ;;  %2254 = vmatmul.bf16.gmra.mxu0 %v5161_v12  ;;  %v2849_v31 = vmul.f32 0.6931472, %v3776_v51  ;;  %v1906_v20 = vadd.f32 %v5188_v34, %v1905_v17 }
 0x378   :  { %v3778_v28 = vpop.eup %3777  ;;  %v2556_v7 = vadd.f32 %v2524_v57, %v1990_v60  ;;  %3781 = vlog2.f32 %v2810_v24  ;;  %v3586_v36 = vadd.f32 -0.9189385, %v2682_v3  ;;  %v2620_v47 = vmul.f32 -0.5, %v5387_v25  ;;  %v5448_v3 = vld [vmem:[%s5803_s1 + $0x68] sm:$0xff] }
 0x379   :  { %3036 = vst.msk [vmem:[%s5814_s12 + $0x48] sm:$0xff] %vm2930_vm1, %v3778_v28  ;;  %v2366_v35 = vmax.f32 %v2305_v13, -20.0  ;;  %v2306_v44 = vpop.f32.mrf.mxu1  ;;  %v2905_v0 = vsub.f32 %v3585_v26, %v2849_v31  ;;  %v2747_v59 = vmul.f32 %v3778_v28, %v3778_v28  ;;  %v2683_v11 = vsub.f32 %v2651_v29, %v5335_v39 }
 0x37a   :  { %3783 = vtanh.f32 %v2556_v7  ;;  %v1995_v39 = vadd.f32 %v1994_v4, %v1906_v20 }
 0x37b   :  { %v5400_v12 = vmin.f32 %v2366_v35, 2.0  ;;  %v2952_v42 = vsel %vm2930_vm1, %v2905_v0, 0.0  ;;  %v2779_v52 = vsub.f32 1.0, %v2747_v59  ;;  %v3587_v17 = vadd.f32 -0.9189385, %v2683_v11  ;;  %v5468_v11 = vld [vmem:[%s5803_s1 + $0x70] sm:$0xff] }
 0x37c   :  { %2953 = vadd.xlane.f32.xlu1 %v2952_v42  ;;  %v2217_v27 = vpop.f32.mrf.mxu0  ;;  %v2621_v35 = vmul.f32 -0.5, %v5407_v32 }
 0x37d   :  { %v3780_v53 = vpop.eup %3779  ;;  %v2442_v30 = vmul.f32 1.442695, %v5400_v12  ;;  %v2218_v6 = vadd.f32 %v5170_v21, %v2217_v27  ;;  %v2811_v62 = vadd.f32 1e-06, %v2779_v52 }
 0x37e   :  { %v3782_v38 = vpop.eup %3781  ;;  %v2525_v40 = vmul.f32 %v3780_v53, %v5407_v32  ;;  %v1907_v43 = vpop.f32.mrf.mxu2 }
 0x37f   :  { %3785 = vpow2.f32 %v2442_v30  ;;  %v2307_v14 = vadd.f32 %v2306_v44, %v2218_v6  ;;  %v1996_v48 = vpop.f32.mrf.mxu3  ;;  %v2851_v10 = vmul.f32 0.6931472, %v3782_v38 }
 0x380   :  { %v3784_v33 = vpop.eup %3783  ;;  %v2557_v45 = vadd.f32 %v2525_v40, %v1992_v37  ;;  %3787 = vlog2.f32 %v2811_v62 }
 0x381   :  { %3037 = vst.msk [vmem:[%s5814_s12 + $0x50] sm:$0xff] %vm2930_vm1, %v3784_v33  ;;  %v2367_v19 = vmax.f32 %v2307_v14, -20.0  ;;  %v2309_v63 = vpop.f32.mrf.mxu1  ;;  %v2906_v15 = vsub.f32 %v3586_v36, %v2851_v10  ;;  %v2748_v46 = vmul.f32 %v3784_v33, %v3784_v33 }
 0x382   :  { %3789 = vtanh.f32 %v2557_v45 }
 0x383   :  { %v5419_v49 = vmin.f32 %v2367_v19, 2.0  ;;  %1949 = vmatmul.bf16.gmra.mxu2 %v5178_v56  ;;  %v2955_v9 = vsel %vm2930_vm1, %v2906_v15, 0.0  ;;  %v2780_v2 = vsub.f32 1.0, %v2748_v46  ;;  %v2622_v19 = vmul.f32 -0.5, %v5429_v16 }
 0x384   :  { %2038 = vmatmul.bf16.gmra.mxu3 %v5173_v58  ;;  %2348 = vmatmul.bf16.gmra.mxu1 %v5173_v58  ;;  %v2220_v55 = vpop.f32.mrf.mxu0  ;;  %v2652_v58 = vmul.f32 %v2620_v47, %v5387_v25  ;;  %v1908_v25 = vadd.f32 %v5188_v34, %v1907_v43 }
 0x385   :  { %v3786_v41 = vpop.eup %3785  ;;  %v2444_v54 = vmul.f32 1.442695, %v5419_v49  ;;  %2956 = vadd.xlane.f32.xlu2 %v2955_v9  ;;  %v2221_v50 = vadd.f32 %v5170_v21, %v2220_v55  ;;  %v2812_v61 = vadd.f32 1e-06, %v2780_v2 }
 0x386   :  { %v3788_v18 = vpop.eup %3787  ;;  %v2526_v24 = vmul.f32 %v3786_v41, %v5429_v16  ;;  %v1910_v51 = vpop.f32.mrf.mxu2  ;;  %v2684_v59 = vsub.f32 %v2652_v58, %v5358_v1  ;;  %v1997_v6 = vadd.f32 %v1996_v48, %v1908_v25  ;;  %v2653_v1 = vmul.f32 %v2621_v35, %v5407_v32 }
 0x387   :  { %3791 = vpow2.f32 %v2444_v54  ;;  %v2310_v60 = vadd.f32 %v2309_v63, %v2221_v50  ;;  %v1999_v57 = vpop.f32.mrf.mxu3  ;;  %v2853_v23 = vmul.f32 0.6931472, %v3788_v18  ;;  %v1911_v32 = vadd.f32 %v5188_v34, %v1910_v51 }
 0x388   :  { %v3790_v13 = vpop.eup %3789  ;;  %v2558_v26 = vadd.f32 %v2526_v24, %v1995_v39  ;;  %3793 = vlog2.f32 %v2812_v61  ;;  %v3588_v43 = vadd.f32 -0.9189385, %v2684_v59  ;;  %v2685_v46 = vsub.f32 %v2653_v1, %v5377_v8 }
 0x389   :  { %3038 = vst.msk [vmem:[%s5814_s12 + $0x58] sm:$0xff] %vm2930_vm1, %v3790_v13  ;;  %v2368_v31 = vmax.f32 %v2310_v60, -20.0  ;;  %v2311_v4 = vpop.f32.mrf.mxu1  ;;  %v2907_v28 = vsub.f32 %v3587_v17, %v2853_v23  ;;  %v2749_v7 = vmul.f32 %v3790_v13, %v3790_v13  ;;  %v2654_v8 = vmul.f32 %v2622_v19, %v5429_v16  ;;  %v5511_v19 = vld [vmem:[%s5803_s1 + $0x80] sm:$0xff] }
 0x38a   :  { %3795 = vtanh.f32 %v2558_v26  ;;  %v3589_v24 = vadd.f32 -0.9189385, %v2685_v46  ;;  %v2623_v26 = vmul.f32 -0.5, %v5448_v3  ;;  %v5517_v46 = vld [vmem:[%s5813_s11] ss:$0 sm:$0xff] }
 0x38b   :  { %v5441_v44 = vmin.f32 %v2368_v31, 2.0  ;;  %v2958_v0 = vsel %vm2930_vm1, %v2907_v28, 0.0  ;;  %v2781_v22 = vsub.f32 1.0, %v2749_v7  ;;  %v2686_v28 = vsub.f32 %v2654_v8, %v5400_v12 }
 0x38c   :  { %2959 = vadd.xlane.f32.xlu0 %v2958_v0  ;;  %v2222_v5 = vpop.f32.mrf.mxu0  ;;  %v5487_v0 = vld [vmem:[%s5803_s1 + $0x78] sm:$0xff]  ;;  %v2655_v12 = vmul.f32 %v2623_v26, %v5448_v3 }
 0x38d   :  { %v3792_v42 = vpop.eup %3791  ;;  %v2446_v52 = vmul.f32 1.442695, %v5441_v44  ;;  %v2223_v27 = vadd.f32 %v5170_v21, %v2222_v5  ;;  %v2813_v53 = vadd.f32 1e-06, %v2781_v22 }
 0x38e   :  { %v3794_v30 = vpop.eup %3793  ;;  %v2527_v62 = vmul.f32 %v3792_v42, %v5448_v3  ;;  %v1912_v38 = vpop.f32.mrf.mxu2  ;;  %v5500_v3 = vld [vmem:[%s5811_s9] ss:$0 sm:$0xff] }
 0x38f   :  { %3797 = vpow2.f32 %v2446_v52  ;;  %v2312_v37 = vadd.f32 %v2311_v4, %v2223_v27  ;;  %v2001_v40 = vpop.f32.mrf.mxu3  ;;  %v2855_v29 = vmul.f32 0.6931472, %v3794_v30  ;;  %v1913_v16 = vadd.f32 %v5188_v34, %v1912_v38 }
 0x390   :  { %v3796_v14 = vpop.eup %3795  ;;  %v2559_v36 = vadd.f32 %v2527_v62, %v1997_v6  ;;  %3799 = vlog2.f32 %v2813_v53  ;;  %v3590_v6 = vadd.f32 -0.9189385, %v2686_v28 }
 0x391   :  { %3039 = vst.msk [vmem:[%s5814_s12 + $0x60] sm:$0xff] %vm2930_vm1, %v3796_v14  ;;  %v2369_v10 = vmax.f32 %v2312_v37, -20.0  ;;  %v2314_v48 = vpop.f32.mrf.mxu1  ;;  %v2908_v33 = vsub.f32 %v3588_v43, %v2855_v29  ;;  %v2750_v45 = vmul.f32 %v3796_v14, %v3796_v14  ;;  %v2002_v42 = vadd.f32 %v2001_v40, %v1913_v16 }
 0x392   :  { %3801 = vtanh.f32 %v2559_v36  ;;  %v2624_v14 = vmul.f32 -0.5, %v5468_v11 }
 0x393   :  { %v5460_v63 = vmin.f32 %v2369_v10, 2.0  ;;  %2259 = vmatmul.bf16.vlgmr.msra.gmra.mxu2 %v5178_v56  ;;  %v2961_v15 = vsel %vm2930_vm1, %v2908_v33, 0.0  ;;  %v2782_v20 = vsub.f32 1.0, %v2750_v45  ;;  %v2000_v56 = vadd.f32 %v1999_v57, %v1911_v32 }
 0x394   :  { %2962 = vadd.xlane.f32.xlu1 %v2961_v15  ;;  %v2225_v47 = vpop.f32.mrf.mxu0 }
 0x395   :  { %v3798_v9 = vpop.eup %3797  ;;  %v2448_v2 = vmul.f32 1.442695, %v5460_v63  ;;  %v2226_v55 = vadd.f32 %v5170_v21, %v2225_v47  ;;  %v2814_v41 = vadd.f32 1e-06, %v2782_v20 }
 0x396   :  { %v3800_v54 = vpop.eup %3799  ;;  %v2528_v50 = vmul.f32 %v3798_v9, %v5468_v11  ;;  %v1915_v61 = vpop.f32.mrf.mxu2 }
 0x397   :  { %3803 = vpow2.f32 %v2448_v2  ;;  %v2315_v18 = vadd.f32 %v2314_v48, %v2226_v55  ;;  %v2004_v39 = vpop.f32.mrf.mxu3  ;;  %v2857_v51 = vmul.f32 0.6931472, %v3800_v54  ;;  %v1916_v29 = vadd.f32 %v5500_v3, %v1915_v61 }
 0x398   :  { %v3802_v58 = vpop.eup %3801  ;;  %v2560_v60 = vadd.f32 %v2528_v50, %v2000_v56  ;;  %3805 = vlog2.f32 %v2814_v41  ;;  %v2687_v48 = vsub.f32 %v2655_v12, %v5419_v49  ;;  %v2656_v41 = vmul.f32 %v2624_v14, %v5468_v11 }
 0x399   :  { %3040 = vst.msk [vmem:[%s5814_s12 + $0x68] sm:$0xff] %vm2930_vm1, %v3802_v58  ;;  %v2370_v17 = vmax.f32 %v2315_v18, -20.0  ;;  %v2316_v57 = vpop.f32.mrf.mxu1  ;;  %v2909_v23 = vsub.f32 %v3589_v24, %v2857_v51  ;;  %v2751_v13 = vmul.f32 %v3802_v58, %v3802_v58  ;;  %v2005_v9 = vadd.f32 %v2004_v39, %v1916_v29 }
 0x39a   :  { %3807 = vtanh.f32 %v2560_v60  ;;  %v3591_v50 = vadd.f32 -0.9189385, %v2687_v48  ;;  %v2625_v60 = vmul.f32 -0.5, %v5487_v0 }
 0x39b   :  { %v5480_v31 = vmin.f32 %v2370_v17, 2.0  ;;  %v2964_v4 = vsel %vm2930_vm1, %v2909_v23, 0.0  ;;  %v2783_v7 = vsub.f32 1.0, %v2751_v13  ;;  %v2688_v23 = vsub.f32 %v2656_v41, %v5441_v44 }
 0x39c   :  { %2965 = vadd.xlane.f32.xlu2 %v2964_v4  ;;  %v2227_v25 = vpop.f32.mrf.mxu0  ;;  %v5535_v4 = vld [vmem:[%s5803_s1 + $0x88] sm:$0xff]  ;;  %v2657_v44 = vmul.f32 %v2625_v60, %v5487_v0 }
 0x39d   :  { %v3804_v35 = vpop.eup %3803  ;;  %v2450_v59 = vmul.f32 1.442695, %v5480_v31  ;;  %v2228_v34 = vadd.f32 %v5170_v21, %v2227_v25  ;;  %v2815_v22 = vadd.f32 1e-06, %v2783_v7 }
 0x39e   :  { %v3806_v5 = vpop.eup %3805  ;;  %v2529_v52 = vmul.f32 %v3804_v35, %v5487_v0  ;;  %v1917_v27 = vpop.f32.mrf.mxu2 }
 0x39f   :  { %3809 = vpow2.f32 %v2450_v59  ;;  %v2317_v53 = vadd.f32 %v2316_v57, %v2228_v34  ;;  %v2006_v30 = vpop.f32.mrf.mxu3  ;;  %v2859_v62 = vmul.f32 0.6931472, %v3806_v5  ;;  %v1918_v11 = vadd.f32 %v5500_v3, %v1917_v27 }
 0x3a0   :  { %v3808_v38 = vpop.eup %3807  ;;  %v2561_v1 = vadd.f32 %v2529_v52, %v2002_v42  ;;  %3811 = vlog2.f32 %v2815_v22  ;;  %v3592_v52 = vadd.f32 -0.9189385, %v2688_v23 }
 0x3a1   :  { %3041 = vst.msk [vmem:[%s5814_s12 + $0x70] sm:$0xff] %vm2930_vm1, %v3808_v38  ;;  %v2371_v21 = vmax.f32 %v2317_v53, -20.0  ;;  %v2319_v37 = vpop.f32.mrf.mxu1  ;;  %v2910_v40 = vsub.f32 %v3590_v6, %v2859_v62  ;;  %v2752_v43 = vmul.f32 %v3808_v38, %v3808_v38  ;;  %v2007_v59 = vadd.f32 %v2006_v30, %v1918_v11 }
 0x3a2   :  { %3813 = vtanh.f32 %v2561_v1  ;;  %v2626_v1 = vmul.f32 -0.5, %v5511_v19 }
 0x3a3   :  { %v5504_v36 = vmin.f32 %v2371_v21, 2.0  ;;  %v2967_v10 = vsel %vm2930_vm1, %v2910_v40, 0.0  ;;  %v2784_v33 = vsub.f32 1.0, %v2752_v43  ;;  %v2689_v40 = vsub.f32 %v2657_v44, %v5460_v63 }
 0x3a4   :  { %2968 = vadd.xlane.f32.xlu0 %v2967_v10  ;;  %v2230_v45 = vpop.f32.mrf.mxu0  ;;  %v5554_v10 = vld [vmem:[%s5803_s1 + $0x90] sm:$0xff]  ;;  %v2658_v63 = vmul.f32 %v2626_v1, %v5511_v19 }
 0x3a5   :  { %v3810_v32 = vpop.eup %3809  ;;  %v2452_v15 = vmul.f32 1.442695, %v5504_v36  ;;  %v2231_v20 = vadd.f32 %v5517_v46, %v2230_v45  ;;  %v2816_v47 = vadd.f32 1e-06, %v2784_v33 }
 0x3a6   :  { %v3812_v49 = vpop.eup %3811  ;;  %v2530_v2 = vmul.f32 %v3810_v32, %v5511_v19  ;;  %v1920_v55 = vpop.f32.mrf.mxu2 }
 0x3a7   :  { %3815 = vpow2.f32 %v2452_v15  ;;  %v2320_v54 = vadd.f32 %v2319_v37, %v2231_v20  ;;  %v2009_v56 = vpop.f32.mrf.mxu3  ;;  %v2861_v61 = vmul.f32 0.6931472, %v3812_v49  ;;  %v1921_v0 = vadd.f32 %v5500_v3, %v1920_v55 }
 0x3a8   :  { %v3814_v8 = vpop.eup %3813  ;;  %v2562_v18 = vadd.f32 %v2530_v2, %v2005_v9  ;;  %3817 = vlog2.f32 %v2816_v47  ;;  %v3593_v2 = vadd.f32 -0.9189385, %v2689_v40 }
 0x3a9   :  { %3042 = vst.msk [vmem:[%s5814_s12 + $0x78] sm:$0xff] %vm2930_vm1, %v3814_v8  ;;  %v2372_v24 = vmax.f32 %v2320_v54, -20.0  ;;  %v2321_v39 = vpop.f32.mrf.mxu1  ;;  %v2911_v51 = vsub.f32 %v3591_v50, %v2861_v61  ;;  %v2753_v58 = vmul.f32 %v3814_v8, %v3814_v8  ;;  %v2010_v15 = vadd.f32 %v2009_v56, %v1921_v0 }
 0x3aa   :  { %3819 = vtanh.f32 %v2562_v18  ;;  %v2627_v18 = vmul.f32 -0.5, %v5535_v4 }
 0x3ab   :  { %v5528_v17 = vmin.f32 %v2372_v24, 2.0  ;;  %v2970_v57 = vsel %vm2930_vm1, %v2911_v51, 0.0  ;;  %v2785_v13 = vsub.f32 1.0, %v2753_v58  ;;  %v2690_v51 = vsub.f32 %v2658_v63, %v5480_v31 }
 0x3ac   :  { %2971 = vadd.xlane.f32.xlu1 %v2970_v57  ;;  %v2232_v16 = vpop.f32.mrf.mxu0  ;;  %v5573_v57 = vld [vmem:[%s5803_s1 + $0x98] sm:$0xff]  ;;  %v2659_v31 = vmul.f32 %v2627_v18, %v5535_v4 }
 0x3ad   :  { %v3816_v26 = vpop.eup %3815  ;;  %v2454_v28 = vmul.f32 1.442695, %v5528_v17  ;;  %v2233_v7 = vadd.f32 %v5517_v46, %v2232_v16  ;;  %v2817_v25 = vadd.f32 1e-06, %v2785_v13 }
 0x3ae   :  { %v3818_v35 = vpop.eup %3817  ;;  %v2531_v34 = vmul.f32 %v3816_v26, %v5535_v4  ;;  %v1922_v22 = vpop.f32.mrf.mxu2 }
 0x3af   :  { %3821 = vpow2.f32 %v2454_v28  ;;  %v2322_v5 = vadd.f32 %v2321_v39, %v2233_v7  ;;  %v2011_v42 = vpop.f32.mrf.mxu3  ;;  %v2863_v27 = vmul.f32 0.6931472, %v3818_v35  ;;  %v1923_v19 = vadd.f32 %v5500_v3, %v1922_v22 }
 0x3b0   :  { %v3820_v12 = vpop.eup %3819  ;;  %v2563_v53 = vadd.f32 %v2531_v34, %v2007_v59  ;;  %3823 = vlog2.f32 %v2817_v25  ;;  %v3594_v34 = vadd.f32 -0.9189385, %v2690_v51 }
 0x3b1   :  { %3043 = vst.msk [vmem:[%s5814_s12 + $0x80] sm:$0xff] %vm2930_vm1, %v3820_v12  ;;  %v2373_v6 = vmax.f32 %v2322_v5, -20.0  ;;  %v2324_v30 = vpop.f32.mrf.mxu1  ;;  %v2912_v62 = vsub.f32 %v3592_v52, %v2863_v27  ;;  %v2754_v38 = vmul.f32 %v3820_v12, %v3820_v12  ;;  %v2012_v28 = vadd.f32 %v2011_v42, %v1923_v19 }
 0x3b2   :  { %3825 = vtanh.f32 %v2563_v53  ;;  %v2628_v53 = vmul.f32 -0.5, %v5554_v10 }
 0x3b3   :  { %v5547_v21 = vmin.f32 %v2373_v6, 2.0  ;;  %v2973_v37 = vsel %vm2930_vm1, %v2912_v62, 0.0  ;;  %v2786_v43 = vsub.f32 1.0, %v2754_v38  ;;  %v2691_v62 = vsub.f32 %v2659_v31, %v5504_v36 }
 0x3b4   :  { %2974 = vadd.xlane.f32.xlu2 %v2973_v37  ;;  %v2235_v29 = vpop.f32.mrf.mxu0  ;;  %v5592_v37 = vld [vmem:[%s5803_s1 + $0xa0] sm:$0xff]  ;;  %v2660_v36 = vmul.f32 %v2628_v53, %v5554_v10 }
 0x3b5   :  { %v3822_v14 = vpop.eup %3821  ;;  %v2456_v48 = vmul.f32 1.442695, %v5547_v21  ;;  %v2236_v33 = vadd.f32 %v5517_v46, %v2235_v29  ;;  %v2818_v45 = vadd.f32 1e-06, %v2786_v43 }
 0x3b6   :  { %v3824_v32 = vpop.eup %3823  ;;  %v2532_v20 = vmul.f32 %v3822_v14, %v5554_v10  ;;  %v1925_v47 = vpop.f32.mrf.mxu2 }
 0x3b7   :  { %3827 = vpow2.f32 %v2456_v48  ;;  %v2325_v49 = vadd.f32 %v2324_v30, %v2236_v33  ;;  %v2014_v9 = vpop.f32.mrf.mxu3  ;;  %v2865_v55 = vmul.f32 0.6931472, %v3824_v32  ;;  %v1926_v4 = vadd.f32 %v5500_v3, %v1925_v47 }
 0x3b8   :  { %v3826_v41 = vpop.eup %3825  ;;  %v2564_v54 = vadd.f32 %v2532_v20, %v2010_v15  ;;  %3829 = vlog2.f32 %v2818_v45  ;;  %v3595_v20 = vadd.f32 -0.9189385, %v2691_v62 }
 0x3b9   :  { %3044 = vst.msk [vmem:[%s5814_s12 + $0x88] sm:$0xff] %vm2930_vm1, %v3826_v41  ;;  %v2374_v50 = vmax.f32 %v2325_v49, -20.0  ;;  %v2326_v56 = vpop.f32.mrf.mxu1  ;;  %v2913_v61 = vsub.f32 %v3593_v2, %v2865_v55  ;;  %v2755_v8 = vmul.f32 %v3826_v41, %v3826_v41  ;;  %v2015_v48 = vadd.f32 %v2014_v9, %v1926_v4 }
 0x3ba   :  { %3831 = vtanh.f32 %v2564_v54  ;;  %v2629_v54 = vmul.f32 -0.5, %v5573_v57 }
 0x3bb   :  { %v5566_v24 = vmin.f32 %v2374_v50, 2.0  ;;  %v2976_v39 = vsel %vm2930_vm1, %v2913_v61, 0.0  ;;  %v2787_v58 = vsub.f32 1.0, %v2755_v8  ;;  %v2692_v61 = vsub.f32 %v2660_v36, %v5528_v17 }
 0x3bc   :  { %2977 = vadd.xlane.f32.xlu0 %v2976_v39  ;;  %v2237_v11 = vpop.f32.mrf.mxu0  ;;  %v5611_v39 = vld [vmem:[%s5803_s1 + $0xa8] sm:$0xff]  ;;  %v2661_v17 = vmul.f32 %v2629_v54, %v5573_v57 }
 0x3bd   :  { %v3828_v60 = vpop.eup %3827  ;;  %v2458_v23 = vmul.f32 1.442695, %v5566_v24  ;;  %v2238_v13 = vadd.f32 %v5517_v46, %v2237_v11  ;;  %v2819_v16 = vadd.f32 1e-06, %v2787_v58 }
 0x3be   :  { %v3830_v26 = vpop.eup %3829  ;;  %v2533_v7 = vmul.f32 %v3828_v60, %v5573_v57  ;;  %v1927_v25 = vpop.f32.mrf.mxu2 }
 0x3bf   :  { %3833 = vpow2.f32 %v2458_v23  ;;  %v2327_v35 = vadd.f32 %v2326_v56, %v2238_v13  ;;  %v2016_v59 = vpop.f32.mrf.mxu3  ;;  %v2867_v22 = vmul.f32 0.6931472, %v3830_v26  ;;  %v1928_v10 = vadd.f32 %v5500_v3, %v1927_v25 }
 0x3c0   :  { %v3832_v44 = vpop.eup %3831  ;;  %v2565_v5 = vadd.f32 %v2533_v7, %v2012_v28  ;;  %3835 = vlog2.f32 %v2819_v16  ;;  %v3596_v28 = vadd.f32 -0.9189385, %v2692_v61 }
 0x3c1   :  { %3045 = vst.msk [vmem:[%s5814_s12 + $0x90] sm:$0xff] %vm2930_vm1, %v3832_v44  ;;  %v2375_v52 = vmax.f32 %v2327_v35, -20.0  ;;  %v2329_v42 = vpop.f32.mrf.mxu1  ;;  %v2914_v27 = vsub.f32 %v3594_v34, %v2867_v22  ;;  %v2756_v12 = vmul.f32 %v3832_v44, %v3832_v44  ;;  %v2017_v23 = vadd.f32 %v2016_v59, %v1928_v10 }
 0x3c2   :  { %3837 = vtanh.f32 %v2565_v5  ;;  %v2630_v5 = vmul.f32 -0.5, %v5592_v37 }
 0x3c3   :  { %v5585_v6 = vmin.f32 %v2375_v52, 2.0  ;;  %v2979_v30 = vsel %vm2930_vm1, %v2914_v27, 0.0  ;;  %v2788_v38 = vsub.f32 1.0, %v2756_v12  ;;  %v2693_v27 = vsub.f32 %v2661_v17, %v5547_v21 }
 0x3c4   :  { %2980 = vadd.xlane.f32.xlu1 %v2979_v30  ;;  %v2240_v0 = vpop.f32.mrf.mxu0  ;;  %v5630_v30 = vld [vmem:[%s5803_s1 + $0xb0] sm:$0xff]  ;;  %v2662_v21 = vmul.f32 %v2630_v5, %v5592_v37  ;;  %v5668_v5 = vld [vmem:[%s5803_s1 + $0xc0] sm:$0xff] }
 0x3c5   :  { %v3834_v1 = vpop.eup %3833  ;;  %v2460_v40 = vmul.f32 1.442695, %v5585_v6  ;;  %v2241_v43 = vadd.f32 %v5517_v46, %v2240_v0  ;;  %v2820_v29 = vadd.f32 1e-06, %v2788_v38 }
 0x3c6   :  { %v3836_v14 = vpop.eup %3835  ;;  %v2534_v33 = vmul.f32 %v3834_v1, %v5592_v37  ;;  %v1930_v45 = vpop.f32.mrf.mxu2  ;;  %v2631_v37 = vmul.f32 -0.5, %v5611_v39 }
 0x3c7   :  { %3839 = vpow2.f32 %v2460_v40  ;;  %v2330_v32 = vadd.f32 %v2329_v42, %v2241_v43  ;;  %v2019_v15 = vpop.f32.mrf.mxu3  ;;  %v2869_v47 = vmul.f32 0.6931472, %v3836_v14  ;;  %v1931_v57 = vadd.f32 %v5500_v3, %v1930_v45 }
 0x3c8   :  { %v3838_v63 = vpop.eup %3837  ;;  %v2566_v49 = vadd.f32 %v2534_v33, %v2015_v48  ;;  %3841 = vlog2.f32 %v2820_v29  ;;  %v3597_v48 = vadd.f32 -0.9189385, %v2693_v27 }
 0x3c9   :  { %3046 = vst.msk [vmem:[%s5814_s12 + $0x98] sm:$0xff] %vm2930_vm1, %v3838_v63  ;;  %v2376_v2 = vmax.f32 %v2330_v32, -20.0  ;;  %v2331_v9 = vpop.f32.mrf.mxu1  ;;  %v2915_v55 = vsub.f32 %v3595_v20, %v2869_v47  ;;  %v2757_v41 = vmul.f32 %v3838_v63, %v3838_v63  ;;  %v2020_v40 = vadd.f32 %v2019_v15, %v1931_v57 }
 0x3ca   :  { %3843 = vtanh.f32 %v2566_v49 }
 0x3cb   :  { %v5604_v50 = vmin.f32 %v2376_v2, 2.0  ;;  %v2982_v56 = vsel %vm2930_vm1, %v2915_v55, 0.0  ;;  %v2789_v8 = vsub.f32 1.0, %v2757_v41  ;;  %v2694_v55 = vsub.f32 %v2662_v21, %v5566_v24 }
 0x3cc   :  { %2983 = vadd.xlane.f32.xlu2 %v2982_v56  ;;  %v2242_v19 = vpop.f32.mrf.mxu0  ;;  %v5649_v56 = vld [vmem:[%s5803_s1 + $0xb8] sm:$0xff]  ;;  %v2663_v24 = vmul.f32 %v2631_v37, %v5611_v39 }
 0x3cd   :  { %v3840_v18 = vpop.eup %3839  ;;  %v2462_v51 = vmul.f32 1.442695, %v5604_v50  ;;  %v2243_v58 = vadd.f32 %v5517_v46, %v2242_v19  ;;  %v2821_v11 = vadd.f32 1e-06, %v2789_v8 }
 0x3ce   :  { %v3842_v60 = vpop.eup %3841  ;;  %v2535_v13 = vmul.f32 %v3840_v18, %v5611_v39  ;;  %v1932_v16 = vpop.f32.mrf.mxu2  ;;  %v2632_v39 = vmul.f32 -0.5, %v5630_v30 }
 0x3cf   :  { %3845 = vpow2.f32 %v2462_v51  ;;  %v2332_v26 = vadd.f32 %v2331_v9, %v2243_v58  ;;  %v2871_v7 = vmul.f32 0.6931472, %v3842_v60  ;;  %v2021_v34 = vpop.f32.mrf.mxu3  ;;  %v1933_v63 = vadd.f32 %v5500_v3, %v1932_v16 }
 0x3d0   :  { %v3844_v25 = vpop.eup %3843  ;;  %v2567_v31 = vadd.f32 %v2535_v13, %v2017_v23  ;;  %3847 = vlog2.f32 %v2821_v11  ;;  %v3598_v23 = vadd.f32 -0.9189385, %v2694_v55 }
 0x3d1   :  { %3047 = vst.msk [vmem:[%s5814_s12 + $0xa0] sm:$0xff] %vm2930_vm1, %v3844_v25  ;;  %v2377_v35 = vmax.f32 %v2332_v26, -20.0  ;;  %v2334_v59 = vpop.f32.mrf.mxu1  ;;  %v2916_v22 = vsub.f32 %v3596_v28, %v2871_v7  ;;  %v2758_v44 = vmul.f32 %v3844_v25, %v3844_v25  ;;  %v2022_v51 = vadd.f32 %v2021_v34, %v1933_v63 }
 0x3d2   :  { %3849 = vtanh.f32 %v2567_v31 }
 0x3d3   :  { %v5623_v52 = vmin.f32 %v2377_v35, 2.0  ;;  %v2985_v42 = vsel %vm2930_vm1, %v2916_v22, 0.0  ;;  %v2790_v12 = vsub.f32 1.0, %v2758_v44 }
 0x3d4   :  { %2986 = vadd.xlane.f32.xlu0 %v2985_v42  ;;  %v2245_v4 = vpop.f32.mrf.mxu0 }
 0x3d5   :  { %v3846_v53 = vpop.eup %3845  ;;  %v2464_v62 = vmul.f32 1.442695, %v5623_v52  ;;  %v2246_v38 = vadd.f32 %v5517_v46, %v2245_v4  ;;  %v2822_v0 = vadd.f32 1e-06, %v2790_v12 }
 0x3d6   :  { %v3848_v1 = vpop.eup %3847  ;;  %v2536_v43 = vmul.f32 %v3846_v53, %v5630_v30  ;;  %v1935_v29 = vpop.f32.mrf.mxu2 }
 0x3d7   :  { %3851 = vpow2.f32 %v2464_v62  ;;  %v2335_v14 = vadd.f32 %v2334_v59, %v2246_v38  ;;  %v2873_v33 = vmul.f32 0.6931472, %v3848_v1  ;;  %v2024_v2 = vpop.f32.mrf.mxu3  ;;  %v1936_v31 = vadd.f32 %v5500_v3, %v1935_v29 }
 0x3d8   :  { %v3850_v45 = vpop.eup %3849  ;;  %v2568_v36 = vadd.f32 %v2536_v43, %v2020_v40  ;;  %3853 = vlog2.f32 %v2822_v0  ;;  %v2695_v59 = vsub.f32 %v2663_v24, %v5585_v6  ;;  %v2664_v0 = vmul.f32 %v2632_v39, %v5630_v30 }
 0x3d9   :  { %3048 = vst.msk [vmem:[%s5814_s12 + $0xa8] sm:$0xff] %vm2930_vm1, %v3850_v45  ;;  %v2378_v32 = vmax.f32 %v2335_v14, -20.0  ;;  %v2336_v20 = vpop.f32.mrf.mxu1  ;;  %v2917_v15 = vsub.f32 %v3597_v48, %v2873_v33  ;;  %v2759_v47 = vmul.f32 %v3850_v45, %v3850_v45  ;;  %v2025_v62 = vadd.f32 %v2024_v2, %v1936_v31  ;;  %v5687_v2 = vld [vmem:[%s5803_s1 + $0xc8] sm:$0xff] }
 0x3da   :  { %3855 = vtanh.f32 %v2568_v36  ;;  %v3599_v40 = vadd.f32 -0.9189385, %v2695_v59  ;;  %v2633_v30 = vmul.f32 -0.5, %v5649_v56 }
 0x3db   :  { %v5642_v49 = vmin.f32 %v2378_v32, 2.0  ;;  %v2988_v9 = vsel %vm2930_vm1, %v2917_v15, 0.0  ;;  %v2791_v41 = vsub.f32 1.0, %v2759_v47  ;;  %v2696_v15 = vsub.f32 %v2664_v0, %v5604_v50 }
 0x3dc   :  { %2989 = vadd.xlane.f32.xlu1 %v2988_v9  ;;  %v2247_v10 = vpop.f32.mrf.mxu0  ;;  %v2665_v50 = vmul.f32 %v2633_v30, %v5649_v56  ;;  %v5725_v30 = vld [vmem:[%s5803_s1 + $0xd8] sm:$0xff] }
 0x3dd   :  { %v3852_v54 = vpop.eup %3851  ;;  %v2466_v61 = vmul.f32 1.442695, %v5642_v49  ;;  %v2248_v8 = vadd.f32 %v5517_v46, %v2247_v10  ;;  %v2823_v19 = vadd.f32 1e-06, %v2791_v41 }
 0x3de   :  { %v3854_v18 = vpop.eup %3853  ;;  %v2537_v58 = vmul.f32 %v3852_v54, %v5649_v56  ;;  %v1937_v11 = vpop.f32.mrf.mxu2  ;;  %v2634_v56 = vmul.f32 -0.5, %v5668_v5 }
 0x3df   :  { %3857 = vpow2.f32 %v2466_v61  ;;  %v2337_v60 = vadd.f32 %v2336_v20, %v2248_v8  ;;  %v2875_v13 = vmul.f32 0.6931472, %v3854_v18  ;;  %v2026_v27 = vpop.f32.mrf.mxu3  ;;  %v1938_v45 = vadd.f32 %v5500_v3, %v1937_v11 }
 0x3e0   :  { %v3856_v16 = vpop.eup %3855  ;;  %v2569_v17 = vadd.f32 %v2537_v58, %v2022_v51  ;;  %3859 = vlog2.f32 %v2823_v19  ;;  %v3600_v51 = vadd.f32 -0.9189385, %v2696_v15 }
 0x3e1   :  { %3049 = vst.msk [vmem:[%s5814_s12 + $0xb0] sm:$0xff] %vm2930_vm1, %v3856_v16  ;;  %v2379_v26 = vmax.f32 %v2337_v60, -20.0  ;;  %v2339_v28 = vpop.f32.mrf.mxu1  ;;  %v2918_v7 = vsub.f32 %v3598_v23, %v2875_v13  ;;  %v2760_v25 = vmul.f32 %v3856_v16, %v3856_v16  ;;  %v2027_v54 = vadd.f32 %v2026_v27, %v1938_v45 }
 0x3e2   :  { %3861 = vtanh.f32 %v2569_v17 }
 0x3e3   :  { %v5661_v35 = vmin.f32 %v2379_v26, 2.0  ;;  %v2991_v34 = vsel %vm2930_vm1, %v2918_v7, 0.0  ;;  %v2792_v22 = vsub.f32 1.0, %v2760_v25 }
 0x3e4   :  { %2992 = vadd.xlane.f32.xlu2 %v2991_v34  ;;  %v2250_v44 = vpop.f32.mrf.mxu0  ;;  %v5706_v34 = vld [vmem:[%s5803_s1 + $0xd0] sm:$0xff] }
 0x3e5   :  { %v3858_v57 = vpop.eup %3857  ;;  %v2468_v42 = vmul.f32 1.442695, %v5661_v35  ;;  %v2251_v12 = vadd.f32 %v5517_v46, %v2250_v44  ;;  %v2824_v4 = vadd.f32 1e-06, %v2792_v22 }
 0x3e6   :  { %v3860_v53 = vpop.eup %3859  ;;  %v2538_v38 = vmul.f32 %v3858_v57, %v5668_v5  ;;  %v1940_v6 = vpop.f32.mrf.mxu2 }
 0x3e7   :  { %3863 = vpow2.f32 %v2468_v42  ;;  %v2340_v1 = vadd.f32 %v2339_v28, %v2251_v12  ;;  %v2877_v43 = vmul.f32 0.6931472, %v3860_v53  ;;  %v2029_v19 = vpop.f32.mrf.mxu3  ;;  %v1941_v16 = vadd.f32 %v5500_v3, %v1940_v6 }
 0x3e8   :  { %v3862_v29 = vpop.eup %3861  ;;  %v2570_v21 = vadd.f32 %v2538_v38, %v2025_v62  ;;  %3865 = vlog2.f32 %v2824_v4  ;;  %v2697_v28 = vsub.f32 %v2665_v50, %v5623_v52  ;;  %v2666_v12 = vmul.f32 %v2634_v56, %v5668_v5  ;;  %v2510_v56 = vld [vmem:[%s5803_s1 + $0xe0] sm:$0xff] }
 0x3e9   :  { %3050 = vst.msk [vmem:[%s5814_s12 + $0xb8] sm:$0xff] %vm2930_vm1, %v3862_v29  ;;  %v2380_v14 = vmax.f32 %v2340_v1, -20.0  ;;  %v2919_v48 = vsub.f32 %v3599_v40, %v2877_v43  ;;  %v2761_v33 = vmul.f32 %v3862_v29, %v3862_v29  ;;  %v2341_v36 = vpop.f32.mrf.mxu1  ;;  %v2030_v42 = vadd.f32 %v2029_v19, %v1941_v16 }
 0x3ea   :  { %3867 = vtanh.f32 %v2570_v21  ;;  %v3601_v53 = vadd.f32 -0.9189385, %v2697_v28  ;;  %v2635_v5 = vmul.f32 -0.5, %v5687_v2 }
 0x3eb   :  { %v5680_v32 = vmin.f32 %v2380_v14, 2.0  ;;  %v2994_v20 = vsel %vm2930_vm1, %v2919_v48, 0.0  ;;  %v2793_v47 = vsub.f32 1.0, %v2761_v33  ;;  %v2698_v48 = vsub.f32 %v2666_v12, %v5642_v49 }
 0x3ec   :  { %2995 = vadd.xlane.f32.xlu0 %v2994_v20  ;;  %v2252_v63 = vpop.f32.mrf.mxu0  ;;  %v2637_v12 = vmul.f32 -0.5, %v5725_v30 }
 0x3ed   :  { %v3864_v37 = vpop.eup %3863  ;;  %v2470_v9 = vmul.f32 1.442695, %v5680_v32  ;;  %v2253_v55 = vadd.f32 %v5517_v46, %v2252_v63  ;;  %v2825_v41 = vadd.f32 1e-06, %v2793_v47 }
 0x3ee   :  { %v3866_v10 = vpop.eup %3865  ;;  %v2539_v61 = vmul.f32 %v3864_v37, %v5687_v2  ;;  %v1942_v8 = vpop.f32.mrf.mxu2 }
 0x3ef   :  { %3869 = vpow2.f32 %v2470_v9  ;;  %v2342_v18 = vadd.f32 %v2341_v36, %v2253_v55  ;;  %v2879_v58 = vmul.f32 0.6931472, %v3866_v10  ;;  %v2031_v0 = vpop.f32.mrf.mxu3  ;;  %v1943_v29 = vadd.f32 %v5500_v3, %v1942_v8 }
 0x3f0   :  { %v3868_v11 = vpop.eup %3867  ;;  %v2571_v24 = vadd.f32 %v2539_v61, %v2027_v54  ;;  %3871 = vlog2.f32 %v2825_v41  ;;  %v2667_v41 = vmul.f32 %v2635_v5, %v5687_v2  ;;  %v3602_v54 = vadd.f32 -0.9189385, %v2698_v48 }
 0x3f1   :  { %3051 = vst.msk [vmem:[%s5814_s12 + $0xc0] sm:$0xff] %vm2930_vm1, %v3868_v11  ;;  %v2381_v60 = vmax.f32 %v2342_v18, -20.0  ;;  %v2920_v23 = vsub.f32 %v3600_v51, %v2879_v58  ;;  %v2762_v13 = vmul.f32 %v3868_v11, %v3868_v11  ;;  %v2344_v25 = vpop.f32.mrf.mxu1  ;;  %v2032_v37 = vadd.f32 %v2031_v0, %v1943_v29 }
 0x3f2   :  { %3873 = vtanh.f32 %v2571_v24  ;;  %v2636_v2 = vmul.f32 -0.5, %v5706_v34  ;;  %v2669_v5 = vmul.f32 %v2637_v12, %v5725_v30 }
 0x3f3   :  { %v5699_v17 = vmin.f32 %v2381_v60, 2.0  ;;  %v2997_v26 = vsel %vm2930_vm1, %v2920_v23, 0.0  ;;  %v2794_v7 = vsub.f32 1.0, %v2762_v13  ;;  %v2699_v23 = vsub.f32 %v2667_v41, %v5661_v35 }
 0x3f4   :  { %2998 = vadd.xlane.f32.xlu1 %v2997_v26  ;;  %v2255_v31 = vpop.f32.mrf.mxu0  ;;  %v2668_v35 = vmul.f32 %v2636_v2, %v5706_v34 }
 0x3f5   :  { %v3870_v39 = vpop.eup %3869  ;;  %v2472_v59 = vmul.f32 1.442695, %v5699_v17  ;;  %v2256_v22 = vadd.f32 %v5517_v46, %v2255_v31  ;;  %v2826_v44 = vadd.f32 1e-06, %v2794_v7 }
 0x3f6   :  { %v3872_v57 = vpop.eup %3871  ;;  %v2540_v27 = vmul.f32 %v3870_v39, %v5706_v34  ;;  %v1945_v52 = vpop.f32.mrf.mxu2 }
 0x3f7   :  { %3875 = vpow2.f32 %v2472_v59  ;;  %v2345_v4 = vadd.f32 %v2344_v25, %v2256_v22  ;;  %v2881_v62 = vmul.f32 0.6931472, %v3872_v57  ;;  %v1946_v58 = vadd.f32 %v5500_v3, %v1945_v52  ;;  %v2034_v11 = vpop.f32.mrf.mxu3 }
 0x3f8   :  { %v3874_v38 = vpop.eup %3873  ;;  %v2572_v6 = vadd.f32 %v2540_v27, %v2030_v42  ;;  %3877 = vlog2.f32 %v2826_v44  ;;  %v3603_v59 = vadd.f32 -0.9189385, %v2699_v23 }
 0x3f9   :  { %3052 = vst.msk [vmem:[%s5814_s12 + $0xc8] sm:$0xff] %vm2930_vm1, %v3874_v38  ;;  %v2382_v1 = vmax.f32 %v2345_v4, -20.0  ;;  %v2921_v40 = vsub.f32 %v3601_v53, %v2881_v62  ;;  %v2763_v43 = vmul.f32 %v3874_v38, %v3874_v38  ;;  %v2346_v55 = vpop.f32.mrf.mxu1  ;;  %v2035_v25 = vadd.f32 %v2034_v11, %v1946_v58 }
 0x3fa   :  { %3879 = vtanh.f32 %v2572_v6  ;;  %v2700_v53 = vsub.f32 %v2668_v35, %v5680_v32  ;;  %v2511_v6 = vld [vmem:[%s5803_s1 + $0xe8] sm:$0xff] }
 0x3fb   :  { %v5718_v21 = vmin.f32 %v2382_v1, 2.0  ;;  %v3000_v14 = vsel %vm2930_vm1, %v2921_v40, 0.0  ;;  %v2795_v33 = vsub.f32 1.0, %v2763_v43 }
 0x3fc   :  { %3001 = vadd.xlane.f32.xlu2 %v3000_v14  ;;  %v2257_v45 = vpop.f32.mrf.mxu0  ;;  %v3604_v14 = vadd.f32 -0.9189385, %v2700_v53  ;;  %v2512_v53 = vld [vmem:[%s5803_s1 + $0xf0] sm:$0xff] }
 0x3fd   :  { %v3876_v36 = vpop.eup %3875  ;;  %v2474_v20 = vmul.f32 1.442695, %v5718_v21  ;;  %v2258_v15 = vadd.f32 %v5517_v46, %v2257_v45  ;;  %v2827_v47 = vadd.f32 1e-06, %v2795_v33 }
 0x3fe   :  { %v3878_v63 = vpop.eup %3877  ;;  %v2541_v9 = vmul.f32 %v3876_v36, %v5725_v30  ;;  %v1947_v49 = vpop.f32.mrf.mxu2 }
 0x3ff   :  { %3881 = vpow2.f32 %v2474_v20  ;;  %v2347_v10 = vadd.f32 %v2346_v55, %v2258_v15  ;;  %v2883_v61 = vmul.f32 0.6931472, %v3878_v63  ;;  %v1948_v52 = vadd.f32 %v5500_v3, %v1947_v49  ;;  %v2036_v38 = vpop.f32.mrf.mxu3 }
 0x400   :  { %v3880_v8 = vpop.eup %3879  ;;  %v2573_v50 = vadd.f32 %v2541_v9, %v2032_v37  ;;  %3883 = vlog2.f32 %v2827_v47  ;;  %v2701_v20 = vsub.f32 %v2669_v5, %v5699_v17  ;;  %v2638_v15 = vmul.f32 -0.5, %v2510_v56 }
 0x401   :  { %3053 = vst.msk [vmem:[%s5814_s12 + $0xd0] sm:$0xff] %vm2930_vm1, %v3880_v8  ;;  %v2383_v19 = vmax.f32 %v2347_v10, -20.0  ;;  %v2922_v18 = vsub.f32 %v3602_v54, %v2883_v61  ;;  %v2764_v51 = vmul.f32 %v3880_v8, %v3880_v8  ;;  %v2037_v40 = vadd.f32 %v2036_v38, %v1948_v52  ;;  %v2349_v9 = vpop.f32.mrf.mxu1 }
 0x402   :  { %3885 = vtanh.f32 %v2573_v50  ;;  %v3605_v49 = vadd.f32 -0.9189385, %v2701_v20  ;;  %v2670_v10 = vmul.f32 %v2638_v15, %v2510_v56 }
 0x403   :  { %v5737_v24 = vmin.f32 %v2383_v19, 2.0  ;;  %v3003_v60 = vsel %vm2930_vm1, %v2922_v18, 0.0  ;;  %v2796_v13 = vsub.f32 1.0, %v2764_v51  ;;  %v2639_v51 = vmul.f32 -0.5, %v2511_v6 }
 0x404   :  { %3004 = vadd.xlane.f32.xlu0 %v3003_v60  ;;  %v2702_v18 = vsub.f32 %v2670_v10, %v5718_v21  ;;  %v2939_v10 = vpop.xlane.xlu1 %2938 }
 0x405   :  { %v3882_v16 = vpop.eup %3881  ;;  %v2476_v26 = vmul.f32 1.442695, %v5737_v24  ;;  %v2828_v28 = vadd.f32 1e-06, %v2796_v13 }
 0x406   :  { %v3884_v7 = vpop.eup %3883  ;;  %v2542_v31 = vmul.f32 %v3882_v16, %v2510_v56  ;;  %v5745_v39 = vpop.f32.mrf.mxu2  ;;  %v3606_v16 = vadd.f32 -0.9189385, %v2702_v18 }
 0x407   :  { %3887 = vpow2.f32 %v2476_v26  ;;  %v2885_v22 = vmul.f32 0.6931472, %v3884_v7  ;;  %v2671_v26 = vmul.f32 %v2639_v51, %v2511_v6  ;;  %v2945_v51 = vpop.xlane.xlu2 %2944 }
 0x408   :  { %v3886_v44 = vpop.eup %3885  ;;  %v2574_v57 = vadd.f32 %v2542_v31, %v2035_v25  ;;  %3889 = vlog2.f32 %v2828_v28 }
 0x409   :  { %3054 = vst.msk [vmem:[%s5814_s12 + $0xd8] sm:$0xff] %vm2930_vm1, %v3886_v44  ;;  %v2923_v42 = vsub.f32 %v3603_v59, %v2885_v22  ;;  %v2765_v27 = vmul.f32 %v3886_v44, %v3886_v44  ;;  %v2351_v25 = vpop.f32.mrf.mxu1  ;;  %v2703_v22 = vsub.f32 %v2671_v26, %v5737_v24  ;;  %v1951_v44 = vadd.f32 %v5500_v3, %v5745_v39 }
 0x40a   :  { %3891 = vtanh.f32 %v2574_v57 }
 0x40b   :  { %v3006_v4 = vsel %vm2930_vm1, %v2923_v42, 0.0  ;;  %v2797_v34 = vsub.f32 1.0, %v2765_v27  ;;  %v2039_v42 = vpop.f32.mrf.mxu3  ;;  %v3607_v52 = vadd.f32 -0.9189385, %v2703_v22 }
 0x40c   :  { %3007 = vadd.xlane.f32.xlu1 %v3006_v4 }
 0x40d   :  { %v3888_v62 = vpop.eup %3887  ;;  %v2829_v0 = vadd.f32 1e-06, %v2797_v34  ;;  %v2040_v34 = vadd.f32 %v2039_v42, %v1951_v44 }
 0x40e   :  { %v3890_v1 = vpop.eup %3889  ;;  %v2543_v43 = vmul.f32 %v3888_v62, %v2511_v6  ;;  %v5759_v29 = vpop.f32.mrf.mxu2 }
 0x40f   :  { %v2887_v48 = vmul.f32 0.6931472, %v3890_v1  ;;  %3893 = vlog2.f32 %v2829_v0  ;;  %v1953_v39 = vadd.f32 %v5500_v3, %v5759_v29 }
 0x410   :  { %v3892_v32 = vpop.eup %3891  ;;  %v2575_v33 = vadd.f32 %v2543_v43, %v2037_v40  ;;  %v2513_v40 = vld [vmem:[%s5803_s1 + $0xf8] sm:$0xff] }
 0x411   :  { %3055 = vst.msk [vmem:[%s5814_s12 + $0xe0] sm:$0xff] %vm2930_vm1, %v3892_v32  ;;  %v2924_v45 = vsub.f32 %v3604_v14, %v2887_v48  ;;  %v2766_v36 = vmul.f32 %v3892_v32, %v3892_v32 }
 0x412   :  { %3895 = vtanh.f32 %v2575_v33  ;;  %v2640_v33 = vmul.f32 -0.5, %v2512_v53 }
 0x413   :  { %v3009_v47 = vsel %vm2930_vm1, %v2924_v45, 0.0  ;;  %v2798_v63 = vsub.f32 1.0, %v2766_v36  ;;  %v2041_v1 = vpop.f32.mrf.mxu3 }
 0x414   :  { %3010 = vadd.xlane.f32.xlu2 %v3009_v47  ;;  %v2042_v43 = vadd.f32 %v2041_v1, %v1953_v39  ;;  %v2672_v45 = vmul.f32 %v2640_v33, %v2512_v53  ;;  %v2641_v47 = vmul.f32 -0.5, %v2513_v40 }
 0x415   :  { %v3894_v30 = vpop.eup %3893  ;;  %v2830_v37 = vadd.f32 1e-06, %v2798_v63 }
 0x416   :  { %v2260_v55 = vpop.f32.mrf.mxu2  ;;  %v2889_v41 = vmul.f32 0.6931472, %v3894_v30 }
 0x417   :  { %v2261_v54 = vadd.f32 %v5517_v46, %v2260_v55  ;;  %3897 = vlog2.f32 %v2830_v37 }
 0x418   :  { %v3896_v61 = vpop.eup %3895  ;;  %v2925_v8 = vsub.f32 %v3605_v49, %v2889_v41  ;;  %v2673_v49 = vmul.f32 %v2641_v47, %v2513_v40 }
 0x419   :  { %3056 = vst.msk [vmem:[%s5814_s12 + $0xe8] sm:$0xff] %vm2930_vm1, %v3896_v61  ;;  %v2350_v17 = vadd.f32 %v2349_v9, %v2261_v54  ;;  %v2767_v50 = vmul.f32 %v3896_v61, %v3896_v61 }
 0x41a   :  { %v3012_v19 = vsel %vm2930_vm1, %v2925_v8, 0.0 }
 0x41b   :  { %v2384_v58 = vmax.f32 %v2350_v17, -20.0  ;;  %3013 = vadd.xlane.f32.xlu0 %v3012_v19  ;;  %v2799_v2 = vsub.f32 1.0, %v2767_v50  ;;  %v2933_v19 = vpop.xlane.xlu0 %2932 }
 0x41d   :  { %v3898_v11 = vpop.eup %3897  ;;  %v2416_v60 = vmin.f32 %v2384_v58, 2.0  ;;  %v2831_v23 = vadd.f32 1e-06, %v2799_v2  ;;  %v2942_v2 = vpop.xlane.xlu1 %2941 }
 0x41e   :  { %v2262_v13 = vpop.f32.mrf.mxu2  ;;  %v2891_v56 = vmul.f32 0.6931472, %v3898_v11 }
 0x41f   :  { %v2478_v28 = vmul.f32 1.442695, %v2416_v60  ;;  %v2263_v7 = vadd.f32 %v5517_v46, %v2262_v13  ;;  %3899 = vlog2.f32 %v2831_v23  ;;  %v2704_v15 = vsub.f32 %v2672_v45, %v2416_v60  ;;  %v2948_v60 = vpop.xlane.xlu2 %2947 }
 0x420   :  { %v2926_v31 = vsub.f32 %v3606_v16, %v2891_v56 }
 0x421   :  { %3901 = vpow2.f32 %v2478_v28  ;;  %v2352_v59 = vadd.f32 %v2351_v25, %v2263_v7  ;;  %v3608_v9 = vadd.f32 -0.9189385, %v2704_v15 }
 0x422   :  { %v3015_v21 = vsel %vm2930_vm1, %v2926_v31, 0.0 }
 0x423   :  { %v2385_v35 = vmax.f32 %v2352_v59, -20.0  ;;  %3016 = vadd.xlane.f32.xlu1 %v3015_v21  ;;  %v2936_v11 = vpop.xlane.xlu0 %2935 }
 0x425   :  { %v3900_v57 = vpop.eup %3899  ;;  %v2417_v27 = vmin.f32 %v2385_v35, 2.0  ;;  %v2954_v23 = vpop.xlane.xlu1 %2953 }
 0x426   :  { %v2893_v12 = vmul.f32 0.6931472, %v3900_v57 }
 0x427   :  { %v3902_v46 = vpop.eup %3901  ;;  %v2480_v4 = vmul.f32 1.442695, %v2417_v27  ;;  %v2705_v61 = vsub.f32 %v2673_v49, %v2417_v27  ;;  %v2957_v16 = vpop.xlane.xlu2 %2956 }
 0x428   :  { %v2927_v62 = vsub.f32 %v3607_v52, %v2893_v12  ;;  %v2544_v38 = vmul.f32 %v3902_v46, %v2512_v53 }
 0x429   :  { %3903 = vpow2.f32 %v2480_v4  ;;  %v3609_v17 = vadd.f32 -0.9189385, %v2705_v61 }
 0x42a   :  { %v3018_v24 = vsel %vm2930_vm1, %v2927_v62, 0.0  ;;  %v2576_v6 = vadd.f32 %v2544_v38, %v2040_v34 }
 0x42b   :  { %3019 = vadd.xlane.f32.xlu2 %v3018_v24  ;;  %v2951_v13 = vpop.xlane.xlu0 %2950 }
 0x42c   :  { %3905 = vtanh.f32 %v2576_v6  ;;  %v3129_v6 = vlaneseq }
 0x42d   :  { %v2963_v56 = vpop.xlane.xlu1 %2962 }
 0x42e   :  { %vm3131_vm3 = vcmp.lt.s32.totalorder %v3129_v6, 256 }
 0x42f   :  { %v3904_v0 = vpop.eup %3903  ;;  %v2966_v28 = vpop.xlane.xlu2 %2965 }
 0x430   :  { %v2545_v5 = vmul.f32 %v3904_v0, %v2513_v40 }
 0x432   :  { %v3906_v14 = vpop.eup %3905  ;;  %v2577_v48 = vadd.f32 %v2545_v5, %v2042_v43 }
 0x433   :  { %v2768_v32 = vmul.f32 %v3906_v14, %v3906_v14  ;;  %3057 = vst.msk [vmem:[%s5814_s12 + $0xf0] sm:$0xff] %vm2930_vm1, %v3906_v14  ;;  %v2960_v26 = vpop.xlane.xlu0 %2959 }
 0x434   :  { %3907 = vtanh.f32 %v2577_v48 }
 0x435   :  { %v2800_v3 = vsub.f32 1.0, %v2768_v32  ;;  %v2972_v7 = vpop.xlane.xlu1 %2971 }
 0x437   :  { %v2832_v29 = vadd.f32 1e-06, %v2800_v3  ;;  %v2975_v31 = vpop.xlane.xlu2 %2974 }
 0x439   :  { %3909 = vlog2.f32 %v2832_v29 }
 0x43a   :  { %v3908_v36 = vpop.eup %3907 }
 0x43b   :  { %v2769_v20 = vmul.f32 %v3908_v36, %v3908_v36  ;;  %3058 = vst.msk [vmem:[%s5814_s12 + $0xf8] sm:$0xff] %vm2930_vm1, %v3908_v36  ;;  %v2969_v25 = vpop.xlane.xlu0 %2968  ;;  %s3941_s12 = smov [#allocation2]  }
 0x43c   :  { %s3141_s24 = sshll.u32 %s3941_s12, 4  ;;  %s3142_s24 = int_to_ptr.vmem [resolvable:$true] %s3141_s24 }
 0x43d   :  { %v2801_v63 = vsub.f32 1.0, %v2769_v20  ;;  %v2981_v59 = vpop.xlane.xlu1 %2980 }
 0x43f   :  { %v3910_v30 = vpop.eup %3909  ;;  %v2833_v37 = vadd.f32 1e-06, %v2801_v63  ;;  %v2984_v22 = vpop.xlane.xlu2 %2983 }
 0x440   :  { %v2895_v55 = vmul.f32 0.6931472, %v3910_v30 }
 0x441   :  { %3911 = vlog2.f32 %v2833_v37 }
 0x442   :  { %v2928_v41 = vsub.f32 %v3608_v9, %v2895_v55 }
 0x443   :  { %v2978_v21 = vpop.xlane.xlu0 %2977 }
 0x444   :  { %v3021_v54 = vsel %vm2930_vm1, %v2928_v41, 0.0 }
 0x445   :  { %3022 = vadd.xlane.f32.xlu0 %v3021_v54 }
 0x447   :  { %v3912_v8 = vpop.eup %3911 }
 0x448   :  { %v2897_v50 = vmul.f32 0.6931472, %v3912_v8 }
 0x44a   :  { %v2929_v18 = vsub.f32 %v3609_v17, %v2897_v50 }
 0x44b   :  { %v2987_v35 = vpop.xlane.xlu0 %2986 }
 0x44c   :  { %v3024_v58 = vsel %vm2930_vm1, %v2929_v18, 0.0 }
 0x44d   :  { %3025 = vadd.xlane.f32.xlu1 %v3024_v58 }
 0x44f   :  { %v2990_v44 = vpop.xlane.xlu1 %2989 }
 0x454   :  { %3059 = vxpose.xlu2.b32.start [1/16] (narrow) %v2933_v19, 8 }
 0x457   :  { %v2993_v57 = vpop.xlane.xlu2 %2992 }
 0x45c   :  { %3060 = vxpose.xlu2.b32.cont [2/16] (narrow) %v2936_v11, 8 }
 0x45f   :  { %v2996_v42 = vpop.xlane.xlu0 %2995 }
 0x464   :  { %3061 = vxpose.xlu2.b32.cont [3/16] (narrow) %v2939_v10, 8 }
 0x467   :  { %v2999_v27 = vpop.xlane.xlu1 %2998 }
 0x46c   :  { %3062 = vxpose.xlu2.b32.cont [4/16] (narrow) %v2942_v2, 8 }
 0x46e   :  { %3091 = vxpose.xlu0.b32.start [1/16] (narrow) %v2981_v59, 8 }
 0x46f   :  { %v3002_v52 = vpop.xlane.xlu2 %3001 }
 0x474   :  { %3063 = vxpose.xlu2.b32.cont [5/16] (narrow) %v2945_v51, 8 }
 0x476   :  { %3092 = vxpose.xlu0.b32.cont [2/16] (narrow) %v2984_v22, 8 }
 0x477   :  { %v3005_v12 = vpop.xlane.xlu0 %3004 }
 0x47c   :  { %3064 = vxpose.xlu2.b32.cont [6/16] (narrow) %v2948_v60, 8 }
 0x47e   :  { %3093 = vxpose.xlu0.b32.cont [3/16] (narrow) %v2987_v35, 8 }
 0x47f   :  { %v3008_v46 = vpop.xlane.xlu1 %3007 }
 0x484   :  { %3065 = vxpose.xlu2.b32.cont [7/16] (narrow) %v2951_v13, 8 }
 0x486   :  { %3094 = vxpose.xlu0.b32.cont [4/16] (narrow) %v2990_v44, 8 }
 0x487   :  { %v3011_v4 = vpop.xlane.xlu2 %3010 }
 0x48c   :  { %3066 = vxpose.xlu2.b32.cont [8/16] (narrow) %v2954_v23, 8 }
 0x48e   :  { %3095 = vxpose.xlu0.b32.cont [5/16] (narrow) %v2993_v57, 8  ;;  %v3014_v53 = vpop.xlane.xlu0 %3013 }
 0x494   :  { %3067 = vxpose.xlu2.b32.cont [9/16] (narrow) %v2957_v16, 8 }
 0x496   :  { %3096 = vxpose.xlu0.b32.cont [6/16] (narrow) %v2996_v42, 8  ;;  %v3017_v34 = vpop.xlane.xlu1 %3016 }
 0x49c   :  { %3068 = vxpose.xlu2.b32.cont [10/16] (narrow) %v2960_v26, 8 }
 0x49e   :  { %3097 = vxpose.xlu0.b32.cont [7/16] (narrow) %v2999_v27, 8  ;;  %v3020_v62 = vpop.xlane.xlu2 %3019 }
 0x4a4   :  { %3069 = vxpose.xlu2.b32.cont [11/16] (narrow) %v2963_v56, 8 }
 0x4a6   :  { %3098 = vxpose.xlu0.b32.cont [8/16] (narrow) %v3002_v52, 8 }
 0x4ac   :  { %3070 = vxpose.xlu2.b32.cont [12/16] (narrow) %v2966_v28, 8 }
 0x4ae   :  { %3099 = vxpose.xlu0.b32.cont [9/16] (narrow) %v3005_v12, 8 }
 0x4b4   :  { %3071 = vxpose.xlu2.b32.cont [13/16] (narrow) %v2969_v25, 8 }
 0x4b6   :  { %3100 = vxpose.xlu0.b32.cont [10/16] (narrow) %v3008_v46, 8 }
 0x4b8   :  { %v3023_v38 = vpop.xlane.xlu0 %3022 }
 0x4bc   :  { %3072 = vxpose.xlu2.b32.cont [14/16] (narrow) %v2972_v7, 8 }
 0x4be   :  { %3101 = vxpose.xlu0.b32.cont [11/16] (narrow) %v3011_v4, 8 }
 0x4c0   :  { %v3026_v24 = vpop.xlane.xlu1 %3025 }
 0x4c4   :  { %3073 = vxpose.xlu2.b32.cont [15/16] (narrow) %v2975_v31, 8 }
 0x4c6   :  { %3102 = vxpose.xlu0.b32.cont [12/16] (narrow) %v3014_v53, 8 }
 0x4cc   :  { %3074 = vxpose.xlu2.b32.end [16/16] (narrow) %v2978_v21, 8 }
 0x4ce   :  { %3103 = vxpose.xlu0.b32.cont [13/16] (narrow) %v3017_v34, 8 }
 0x4d6   :  { %3104 = vxpose.xlu0.b32.cont [14/16] (narrow) %v3020_v62, 8 }
 0x4de   :  { %3105 = vxpose.xlu0.b32.cont [15/16] (narrow) %v3023_v38, 8 }
 0x4e6   :  { %3106 = vxpose.xlu0.b32.end [16/16] (narrow) %v3026_v24, 8 }
 0x4ed   :  { %v3075_v0 = vpop.trf.xlu2 }
 0x512   :  { %v3107_v39 = vpop.trf.xlu0 }
 0x513   :  { %v3125_v1 = vrot.slane %v3107_v39, 7 }
 0x515   :  { %v3127_v40 = vsel %vm3126_vm2, %v3075_v0, %v3125_v1 }
 0x516   :  { %3133 = vst.msk [vmem:[#allocation2] sm:$0x3] %vm3131_vm3, %v3127_v40 }
 0x517   :  { %3146 = dma.vmem_to_hbm [thread:$0]  %s3142_s24, 32, %s3144_s25, [#allocation3]  }
 0x518   :  { %3939 = dma.done.wait [#allocation3], 32  }
 0x519   :  { %3940 = vsyncadd [#allocation3], 4294967264 }
 0x51a   :  { %3153 = vsyncpa [#allocation3], 1 }

</bundles_post_ra>
